<compile_context>
chip_gen: v7x
topology: tpu7x:2x2x1
jax: 0.10.0
libtpu: 0.0.40
codegen_flags: <defaults>
</compile_context>

<pallas_src>
import numpy as np
import jax
import jax.numpy as jnp
from jax.experimental import pallas as pl
from jax.experimental.pallas import tpu as pltpu


def _round_up(x, m):
    return ((x + m - 1) // m) * m


# ----------------------------------------------------------------------------
# Fused kernel: [gi pre-pass -> GRU recurrence] x num_layers -> FC epilogue
# Gate order follows PyTorch: (r, z, n); gate g lives at lanes [g*HP, g*HP+H).
# ----------------------------------------------------------------------------
def make_fused_kernel(num_layers, W, Bp, HP, unroll):
    """Build the fused (GRU stack + FC) kernel body for a static layer count."""

    def kernel(*refs):
        # refs = [x2d, (wih_t, whh_t, bih, bhh) * L, fc_w_t, fc_b,
        #         out, gi_scratch, seq_scratch]
        x_ref = refs[0]
        layer_refs = refs[1:1 + 4 * num_layers]
        fcw_ref = refs[1 + 4 * num_layers]
        fcb_ref = refs[2 + 4 * num_layers]
        out_ref = refs[3 + 4 * num_layers]
        gi_ref = refs[4 + 4 * num_layers]
        seq_ref = refs[5 + 4 * num_layers]

        for l in range(num_layers):
            wih_t = layer_refs[4 * l][...]       # (In_l, 3*HP), lane-padded gates
            whh_t = layer_refs[4 * l + 1][...]   # (HP, 3*HP),   lane-padded
            bih = layer_refs[4 * l + 2][...]     # (1, 3*HP)
            bhh = layer_refs[4 * l + 3][...]     # (1, 3*HP)

            # (1) Parallel pre-pass: input projections for EVERY timestep in one
            #     MXU-friendly GEMM (lane-dense 3*HP output); b_ih folded in.
            cur = x_ref[...] if l == 0 else seq_ref[...]
            gi_ref[...] = (
                jnp.dot(cur, wih_t, preferred_element_type=jnp.float32) + bih
            )

            # Hoist the hidden-bias broadcast out of the time loop.
            bhh_b = jnp.broadcast_to(bhh, (Bp, 3 * HP))

            # (2) Serial recurrence: one fused (Bp,HP)@(HP,3*HP) matmul per step;
            #     all gate slices are 128-lane-aligned full vregs.
            def step(t, h, whh_t=whh_t, bhh_b=bhh_b):
                row = pl.multiple_of(t * Bp, Bp)
                gi = gi_ref[pl.ds(row, Bp), :]                            # (Bp, 3*HP)
                gh = jnp.dot(h, whh_t,
                             preferred_element_type=jnp.float32) + bhh_b  # (Bp, 3*HP)
                r = jax.nn.sigmoid(gi[:, :HP] + gh[:, :HP])
                z = jax.nn.sigmoid(gi[:, HP:2 * HP] + gh[:, HP:2 * HP])
                n = jnp.tanh(gi[:, 2 * HP:] + r * gh[:, 2 * HP:])
                h_new = n + z * (h - n)          # == (1-z)*n + z*h, one fewer op
                seq_ref[pl.ds(row, Bp), :] = h_new   # unmasked (Bp, HP) store
                return h_new

            h0 = jnp.zeros((Bp, HP), jnp.float32)    # matches _init_hidden_ zeros
            jax.lax.fori_loop(0, W, step, h0, unroll=unroll)

        # (3) FC epilogue: one GEMM over the whole sequence, single lane-dense
        #     (W*Bp, CP) store.
        out_ref[...] = (
            jnp.dot(seq_ref[...], fcw_ref[...], preferred_element_type=jnp.float32)
            + fcb_ref[...]
        )

    return kernel


# ----------------------------------------------------------------------------
# Host-side weight preparation (do ONCE, reuse across forward calls):
# transpose + zero-pad so gate g starts at lane g*HP, hidden rows padded to HP,
# FC output padded to CP lanes.
# ----------------------------------------------------------------------------
def _pad_gate_cols(w_t, H, HP):
    """(K, 3H) -> (K, 3*HP) with gate g's columns at [g*HP, g*HP+H)."""
    K = w_t.shape[0]
    out = jnp.zeros((K, 3 * HP), w_t.dtype)
    for g in range(3):
        out = out.at[:, g * HP:g * HP + H].set(w_t[:, g * H:(g + 1) * H])
    return out


def _pad_gate_bias(b, H, HP):
    out = jnp.zeros((3 * HP,), b.dtype)
    for g in range(3):
        out = out.at[g * HP:g * HP + H].set(b[g * H:(g + 1) * H])
    return out.reshape(1, 3 * HP)


def prepare_weights(gru_params, fc_w, fc_b):
    """Returns (weight_args, meta). Call once; reuse for every forward."""
    H = gru_params[0][1].shape[1]          # w_hh is (3H, H)
    C = fc_w.shape[0]
    HP = _round_up(H, 128)
    CP = _round_up(C, 128)
    num_layers = len(gru_params)

    weight_args = []
    for layer, (w_ih, w_hh, b_ih, b_hh) in enumerate(gru_params):
        wih_t = _pad_gate_cols(w_ih.T, H, HP)          # (In, 3*HP)
        if layer > 0:                                  # input is HP-lane hidden seq
            wih_t = jnp.pad(wih_t, ((0, HP - H), (0, 0)))
        whh_t = _pad_gate_cols(w_hh.T, H, HP)          # (H, 3*HP)
        whh_t = jnp.pad(whh_t, ((0, HP - H), (0, 0)))  # (HP, 3*HP), zero rows
        weight_args += [wih_t, whh_t,
                        _pad_gate_bias(b_ih, H, HP), _pad_gate_bias(b_hh, H, HP)]

    fcw_t = jnp.pad(fc_w.T, ((0, HP - H), (0, CP - C)))   # (HP, CP)
    fcb = jnp.pad(fc_b, ((0, CP - C),)).reshape(1, CP)     # (1, CP)
    weight_args += [fcw_t, fcb]

    meta = dict(H=H, HP=HP, C=C, CP=CP, num_layers=num_layers)
    return weight_args, meta


# ----------------------------------------------------------------------------
# Wrapper: feature prep, batch padding, pallas_call
# ----------------------------------------------------------------------------
def sequence_predictor_forward(x_nchw, weight_args, meta):
    """x_nchw: (B, 1, Himg, W) float32 -> logits (W, B, num_classes)."""
    B, _, Himg, W = x_nchw.shape
    H, HP, C, CP = meta["H"], meta["HP"], meta["C"], meta["CP"]
    num_layers = meta["num_layers"]
    Bp = _round_up(B, 8)                   # pad batch to full 8-row sublanes

    # _prepare_features_: squeeze channel, permute to (W, B, Himg); pad batch.
    # Padded rows are row-independent (GRU/FC act row-wise) and sliced off.
    x = jnp.transpose(jnp.squeeze(x_nchw, axis=1), (2, 0, 1))   # (W, B, Himg)
    if Bp != B:
        x = jnp.pad(x, ((0, 0), (0, Bp - B), (0, 0)))
    x2d = x.reshape(W * Bp, Himg)

    args = [x2d] + list(weight_args)
    in_specs = [pl.BlockSpec(x2d.shape, lambda i: (0, 0))]
    for a in weight_args:
        in_specs.append(pl.BlockSpec(a.shape, lambda i: (0, 0)))

    # Cost estimate for XLA's scheduler around the fused custom call.
    flops = 0
    for l in range(num_layers):
        in_l = Himg if l == 0 else HP
        flops += 2 * (W * Bp) * in_l * 3 * HP      # gi pre-pass
        flops += 2 * W * Bp * HP * 3 * HP          # recurrence
    flops += 2 * (W * Bp) * HP * CP                # FC
    transcendentals = num_layers * W * Bp * 3 * HP
    bytes_accessed = sum(int(a.size) * a.dtype.itemsize for a in args)
    bytes_accessed += W * Bp * CP * 4
    cost = pl.CostEstimate(flops=int(flops),
                           transcendentals=int(transcendentals),
                           bytes_accessed=int(bytes_accessed))

    # Explicit VMEM budget: inputs + output + scratch (gi, seq), x2 + headroom.
    vmem_bytes = bytes_accessed + (W * Bp * 3 * HP + W * Bp * HP) * 4
    vmem_limit = int(min(2 * vmem_bytes + (8 << 20), 96 << 20))

    unroll = W if W <= 16 else 4           # full unroll only for short sequences

    kernel = make_fused_kernel(num_layers, W, Bp, HP, unroll)
    out2d = pl.pallas_call(
        kernel,
        out_shape=jax.ShapeDtypeStruct((W * Bp, CP), jnp.float32),
        grid_spec=pltpu.PrefetchScalarGridSpec(
            num_scalar_prefetch=0,
            grid=(1,),
            in_specs=in_specs,
            out_specs=pl.BlockSpec((W * Bp, CP), lambda i: (0, 0)),
            scratch_shapes=[
                pltpu.VMEM((W * Bp, 3 * HP), jnp.float32),   # gi for all steps
                pltpu.VMEM((W * Bp, HP), jnp.float32),       # current layer seq
            ],
        ),
        compiler_params=pltpu.CompilerParams(
            dimension_semantics=("arbitrary",),
            vmem_limit_bytes=vmem_limit,
        ),
        cost_estimate=cost,
    )(*args)

    return out2d.reshape(W, Bp, CP)[:, :B, :C]


# ----------------------------------------------------------------------------
# Pure-JAX reference (for correctness check) — mirrors PyTorch GRU exactly.
# ----------------------------------------------------------------------------
def reference_forward(x_nchw, gru_params, fc_w, fc_b):
    x = jnp.transpose(jnp.squeeze(x_nchw, axis=1), (2, 0, 1))  # (W, B, H)
    h_seq = x
    for (w_ih, w_hh, b_ih, b_hh) in gru_params:
        H = w_hh.shape[1]

        def step(h, x_t, w_ih=w_ih, w_hh=w_hh, b_ih=b_ih, b_hh=b_hh, H=H):
            gi = x_t @ w_ih.T + b_ih
            gh = h @ w_hh.T + b_hh
            r = jax.nn.sigmoid(gi[:, :H] + gh[:, :H])
            z = jax.nn.sigmoid(gi[:, H:2 * H] + gh[:, H:2 * H])
            n = jnp.tanh(gi[:, 2 * H:] + r * gh[:, 2 * H:])
            h_new = (1.0 - z) * n + z * h
            return h_new, h_new

        h0 = jnp.zeros((h_seq.shape[1], H), jnp.float32)
        _, h_seq = jax.lax.scan(step, h0, h_seq)
    return h_seq @ fc_w.T + fc_b


# ----------------------------------------------------------------------------
# Parameter init (PyTorch-style U(-1/sqrt(H), 1/sqrt(H))), deterministic.
# ----------------------------------------------------------------------------
def init_params(key, input_size, hidden_size, num_layers, num_classes):
    k = 1.0 / np.sqrt(hidden_size)
    gru_params = []
    for layer in range(num_layers):
        in_feat = input_size if layer == 0 else hidden_size
        key, k1, k2, k3, k4 = jax.random.split(key, 5)
        w_ih = jax.random.uniform(k1, (3 * hidden_size, in_feat), jnp.float32, -k, k)
        w_hh = jax.random.uniform(k2, (3 * hidden_size, hidden_size), jnp.float32, -k, k)
        b_ih = jax.random.uniform(k3, (3 * hidden_size,), jnp.float32, -k, k)
        b_hh = jax.random.uniform(k4, (3 * hidden_size,), jnp.float32, -k, k)
        gru_params.append((w_ih, w_hh, b_ih, b_hh))
    key, k5, k6 = jax.random.split(key, 3)
    kf = 1.0 / np.sqrt(hidden_size)
    fc_w = jax.random.uniform(k5, (num_classes, hidden_size), jnp.float32, -kf, kf)
    fc_b = jax.random.uniform(k6, (num_classes,), jnp.float32, -kf, kf)
    return gru_params, fc_w, fc_b


if __name__ == "__main__":
    # Small shapes: batch=2, C=1, image height (=GRU input_size)=32, width (=seq len)=8
    B, C, Himg, Wimg = 2, 1, 32, 8
    input_size, hidden_size, num_layers, num_classes = Himg, 32, 2, 10

    key = jax.random.PRNGKey(0)
    key, kx = jax.random.split(key)
    x = jax.random.normal(kx, (B, C, Himg, Wimg), jnp.float32)

    gru_params, fc_w, fc_b = init_params(key, input_size, hidden_size,
                                         num_layers, num_classes)

    # Weight transpose / lane padding done once, reused for every forward call.
    weight_args, meta = prepare_weights(gru_params, fc_w, fc_b)

    out = sequence_predictor_forward(x, weight_args, meta)
    out = jax.block_until_ready(out)

    ref = reference_forward(x, gru_params, fc_w, fc_b)
    np.testing.assert_allclose(np.asarray(out), np.asarray(ref),
                               rtol=1e-4, atol=1e-4)
    assert out.shape == (Wimg, B, num_classes)

    print("KERNEL_OK")
</pallas_src>

<mosaic_0001>
module attributes {stable_mosaic.version = 11 : i64} {
  func.func @kernel(%arg0: i32, %arg1: memref<64x32xf32, #tpu.memory_space<vmem>>, %arg2: memref<32x384xf32, #tpu.memory_space<vmem>>, %arg3: memref<128x384xf32, #tpu.memory_space<vmem>>, %arg4: memref<1x384xf32, #tpu.memory_space<vmem>>, %arg5: memref<1x384xf32, #tpu.memory_space<vmem>>, %arg6: memref<128x384xf32, #tpu.memory_space<vmem>>, %arg7: memref<128x384xf32, #tpu.memory_space<vmem>>, %arg8: memref<1x384xf32, #tpu.memory_space<vmem>>, %arg9: memref<1x384xf32, #tpu.memory_space<vmem>>, %arg10: memref<128x128xf32, #tpu.memory_space<vmem>>, %arg11: memref<1x128xf32, #tpu.memory_space<vmem>>, %arg12: memref<64x128xf32, #tpu.memory_space<vmem>>, %arg13: memref<64x384xf32, #tpu.memory_space<vmem>>, %arg14: memref<64x128xf32, #tpu.memory_space<vmem>>) attributes {dimension_semantics = [#tpu.dimension_semantics<arbitrary>], iteration_bounds = array<i64: 1>, scalar_prefetch = 0 : i64, scratch_operands = 2 : i64, tpu.core_type = #tpu.core_type<tc>, window_params = [{pipeline_mode = #tpu.pipeline_mode<synchronous>, transform_indices = @transform_0, window_bounds = array<i64: 64, 32>}, {pipeline_mode = #tpu.pipeline_mode<synchronous>, transform_indices = @transform_1, window_bounds = array<i64: 32, 384>}, {pipeline_mode = #tpu.pipeline_mode<synchronous>, transform_indices = @transform_2, window_bounds = array<i64: 128, 384>}, {pipeline_mode = #tpu.pipeline_mode<synchronous>, transform_indices = @transform_3, window_bounds = array<i64: 1, 384>}, {pipeline_mode = #tpu.pipeline_mode<synchronous>, transform_indices = @transform_4, window_bounds = array<i64: 1, 384>}, {pipeline_mode = #tpu.pipeline_mode<synchronous>, transform_indices = @transform_5, window_bounds = array<i64: 128, 384>}, {pipeline_mode = #tpu.pipeline_mode<synchronous>, transform_indices = @transform_6, window_bounds = array<i64: 128, 384>}, {pipeline_mode = #tpu.pipeline_mode<synchronous>, transform_indices = @transform_7, window_bounds = array<i64: 1, 384>}, {pipeline_mode = #tpu.pipeline_mode<synchronous>, transform_indices = @transform_8, window_bounds = array<i64: 1, 384>}, {pipeline_mode = #tpu.pipeline_mode<synchronous>, transform_indices = @transform_9, window_bounds = array<i64: 128, 128>}, {pipeline_mode = #tpu.pipeline_mode<synchronous>, transform_indices = @transform_10, window_bounds = array<i64: 1, 128>}, {pipeline_mode = #tpu.pipeline_mode<synchronous>, transform_indices = @transform_11, window_bounds = array<i64: 64, 128>}]} {
    %c0 = arith.constant 0 : index
    %c0_0 = arith.constant 0 : index
    %0 = vector.load %arg2[%c0, %c0_0] : memref<32x384xf32, #tpu.memory_space<vmem>>, vector<32x384xf32>
    %c0_1 = arith.constant 0 : index
    %c0_2 = arith.constant 0 : index
    %1 = vector.load %arg3[%c0_1, %c0_2] : memref<128x384xf32, #tpu.memory_space<vmem>>, vector<128x384xf32>
    %c0_3 = arith.constant 0 : index
    %c0_4 = arith.constant 0 : index
    %2 = vector.load %arg4[%c0_3, %c0_4] : memref<1x384xf32, #tpu.memory_space<vmem>>, vector<1x384xf32>
    %c0_5 = arith.constant 0 : index
    %c0_6 = arith.constant 0 : index
    %3 = vector.load %arg5[%c0_5, %c0_6] : memref<1x384xf32, #tpu.memory_space<vmem>>, vector<1x384xf32>
    %c0_7 = arith.constant 0 : index
    %c0_8 = arith.constant 0 : index
    %4 = vector.load %arg1[%c0_7, %c0_8] : memref<64x32xf32, #tpu.memory_space<vmem>>, vector<64x32xf32>
    %cst = arith.constant dense<0.000000e+00> : vector<64x384xf32>
    %5 = tpu.matmul %4, %0, %cst {dimension_numbers = #tpu.dot_dimension_numbers<[1], [0], [0], [1], [0, 0, 1, 1], [], []>} : vector<64x32xf32>, vector<32x384xf32>, vector<64x384xf32> -> vector<64x384xf32>
    %6 = vector.broadcast %2 : vector<1x384xf32> to vector<64x384xf32>
    %7 = arith.addf %5, %6 : vector<64x384xf32>
    %c0_9 = arith.constant 0 : index
    %c0_10 = arith.constant 0 : index
    %8 = vector.load %arg13[%c0_9, %c0_10] : memref<64x384xf32, #tpu.memory_space<vmem>>, vector<64x384xf32>
    tpu.vector_store %arg13[%c0_9, %c0_10], %7 {strides = array<i32>} : memref<64x384xf32, #tpu.memory_space<vmem>>, vector<64x384xf32>,
    %9 = vector.shape_cast %3 : vector<1x384xf32> to vector<1x384xf32>
    %10 = vector.broadcast %9 : vector<1x384xf32> to vector<8x384xf32>
    %cst_11 = arith.constant 0.000000e+00 : f32
    %11 = vector.broadcast %cst_11 : f32 to vector<8x128xf32>
    %c0_i32 = arith.constant 0 : i32
    %c8_i32 = arith.constant 8 : i32
    %12 = arith.muli %c0_i32, %c8_i32 : i32
    %13 = tpu.assume_multiple %12, 8 : i32
    %14 = arith.index_cast %13 : i32 to index
    %c0_12 = arith.constant 0 : index
    %15 = vector.load %arg13[%14, %c0_12] : memref<64x384xf32, #tpu.memory_space<vmem>>, vector<8x384xf32>
    %cst_13 = arith.constant dense<0.000000e+00> : vector<8x384xf32>
    %16 = tpu.matmul %11, %1, %cst_13 {dimension_numbers = #tpu.dot_dimension_numbers<[1], [0], [0], [1], [0, 0, 1, 1], [], []>} : vector<8x128xf32>, vector<128x384xf32>, vector<8x384xf32> -> vector<8x384xf32>
    %17 = arith.addf %16, %10 : vector<8x384xf32>
    %18 = vector.extract_strided_slice %15 {offsets = [0, 0], sizes = [8, 128], strides = [1, 1]} : vector<8x384xf32> to vector<8x128xf32>
    %19 = vector.extract_strided_slice %17 {offsets = [0, 0], sizes = [8, 128], strides = [1, 1]} : vector<8x384xf32> to vector<8x128xf32>
    %20 = arith.addf %18, %19 : vector<8x128xf32>
    %21 = arith.negf %20 : vector<8x128xf32>
    %22 = math.exp %21 : vector<8x128xf32>
    %cst_14 = arith.constant 1.000000e+00 : f32
    %23 = vector.broadcast %cst_14 : f32 to vector<8x128xf32>
    %24 = arith.addf %23, %22 : vector<8x128xf32>
    %25 = arith.divf %23, %24 : vector<8x128xf32>
    %26 = vector.extract_strided_slice %15 {offsets = [0, 128], sizes = [8, 128], strides = [1, 1]} : vector<8x384xf32> to vector<8x128xf32>
    %27 = vector.extract_strided_slice %17 {offsets = [0, 128], sizes = [8, 128], strides = [1, 1]} : vector<8x384xf32> to vector<8x128xf32>
    %28 = arith.addf %26, %27 : vector<8x128xf32>
    %29 = arith.negf %28 : vector<8x128xf32>
    %30 = math.exp %29 : vector<8x128xf32>
    %cst_15 = arith.constant 1.000000e+00 : f32
    %31 = vector.broadcast %cst_15 : f32 to vector<8x128xf32>
    %32 = arith.addf %31, %30 : vector<8x128xf32>
    %33 = arith.divf %31, %32 : vector<8x128xf32>
    %34 = vector.extract_strided_slice %15 {offsets = [0, 256], sizes = [8, 128], strides = [1, 1]} : vector<8x384xf32> to vector<8x128xf32>
    %35 = vector.extract_strided_slice %17 {offsets = [0, 256], sizes = [8, 128], strides = [1, 1]} : vector<8x384xf32> to vector<8x128xf32>
    %36 = arith.mulf %25, %35 : vector<8x128xf32>
    %37 = arith.addf %34, %36 : vector<8x128xf32>
    %38 = math.tanh %37 : vector<8x128xf32>
    %39 = arith.subf %11, %38 : vector<8x128xf32>
    %40 = arith.mulf %33, %39 : vector<8x128xf32>
    %41 = arith.addf %38, %40 : vector<8x128xf32>
    %42 = arith.index_cast %13 : i32 to index
    %c0_16 = arith.constant 0 : index
    %43 = vector.load %arg14[%42, %c0_16] : memref<64x128xf32, #tpu.memory_space<vmem>>, vector<8x128xf32>
    tpu.vector_store %arg14[%42, %c0_16], %41 {strides = array<i32>} : memref<64x128xf32, #tpu.memory_space<vmem>>, vector<8x128xf32>,
    %c1_i32 = arith.constant 1 : i32
    %c8_i32_17 = arith.constant 8 : i32
    %44 = arith.muli %c1_i32, %c8_i32_17 : i32
    %45 = tpu.assume_multiple %44, 8 : i32
    %46 = arith.index_cast %45 : i32 to index
    %c0_18 = arith.constant 0 : index
    %47 = vector.load %arg13[%46, %c0_18] : memref<64x384xf32, #tpu.memory_space<vmem>>, vector<8x384xf32>
    %cst_19 = arith.constant dense<0.000000e+00> : vector<8x384xf32>
    %48 = tpu.matmul %41, %1, %cst_19 {dimension_numbers = #tpu.dot_dimension_numbers<[1], [0], [0], [1], [0, 0, 1, 1], [], []>} : vector<8x128xf32>, vector<128x384xf32>, vector<8x384xf32> -> vector<8x384xf32>
    %49 = arith.addf %48, %10 : vector<8x384xf32>
    %50 = vector.extract_strided_slice %47 {offsets = [0, 0], sizes = [8, 128], strides = [1, 1]} : vector<8x384xf32> to vector<8x128xf32>
    %51 = vector.extract_strided_slice %49 {offsets = [0, 0], sizes = [8, 128], strides = [1, 1]} : vector<8x384xf32> to vector<8x128xf32>
    %52 = arith.addf %50, %51 : vector<8x128xf32>
    %53 = arith.negf %52 : vector<8x128xf32>
    %54 = math.exp %53 : vector<8x128xf32>
    %cst_20 = arith.constant 1.000000e+00 : f32
    %55 = vector.broadcast %cst_20 : f32 to vector<8x128xf32>
    %56 = arith.addf %55, %54 : vector<8x128xf32>
    %57 = arith.divf %55, %56 : vector<8x128xf32>
    %58 = vector.extract_strided_slice %47 {offsets = [0, 128], sizes = [8, 128], strides = [1, 1]} : vector<8x384xf32> to vector<8x128xf32>
    %59 = vector.extract_strided_slice %49 {offsets = [0, 128], sizes = [8, 128], strides = [1, 1]} : vector<8x384xf32> to vector<8x128xf32>
    %60 = arith.addf %58, %59 : vector<8x128xf32>
    %61 = arith.negf %60 : vector<8x128xf32>
    %62 = math.exp %61 : vector<8x128xf32>
    %cst_21 = arith.constant 1.000000e+00 : f32
    %63 = vector.broadcast %cst_21 : f32 to vector<8x128xf32>
    %64 = arith.addf %63, %62 : vector<8x128xf32>
    %65 = arith.divf %63, %64 : vector<8x128xf32>
    %66 = vector.extract_strided_slice %47 {offsets = [0, 256], sizes = [8, 128], strides = [1, 1]} : vector<8x384xf32> to vector<8x128xf32>
    %67 = vector.extract_strided_slice %49 {offsets = [0, 256], sizes = [8, 128], strides = [1, 1]} : vector<8x384xf32> to vector<8x128xf32>
    %68 = arith.mulf %57, %67 : vector<8x128xf32>
    %69 = arith.addf %66, %68 : vector<8x128xf32>
    %70 = math.tanh %69 : vector<8x128xf32>
    %71 = arith.subf %41, %70 : vector<8x128xf32>
    %72 = arith.mulf %65, %71 : vector<8x128xf32>
    %73 = arith.addf %70, %72 : vector<8x128xf32>
    %74 = arith.index_cast %45 : i32 to index
    %c0_22 = arith.constant 0 : index
    %75 = vector.load %arg14[%74, %c0_22] : memref<64x128xf32, #tpu.memory_space<vmem>>, vector<8x128xf32>
    tpu.vector_store %arg14[%74, %c0_22], %73 {strides = array<i32>} : memref<64x128xf32, #tpu.memory_space<vmem>>, vector<8x128xf32>,
    %c2_i32 = arith.constant 2 : i32
    %c8_i32_23 = arith.constant 8 : i32
    %76 = arith.muli %c2_i32, %c8_i32_23 : i32
    %77 = tpu.assume_multiple %76, 8 : i32
    %78 = arith.index_cast %77 : i32 to index
    %c0_24 = arith.constant 0 : index
    %79 = vector.load %arg13[%78, %c0_24] : memref<64x384xf32, #tpu.memory_space<vmem>>, vector<8x384xf32>
    %cst_25 = arith.constant dense<0.000000e+00> : vector<8x384xf32>
    %80 = tpu.matmul %73, %1, %cst_25 {dimension_numbers = #tpu.dot_dimension_numbers<[1], [0], [0], [1], [0, 0, 1, 1], [], []>} : vector<8x128xf32>, vector<128x384xf32>, vector<8x384xf32> -> vector<8x384xf32>
    %81 = arith.addf %80, %10 : vector<8x384xf32>
    %82 = vector.extract_strided_slice %79 {offsets = [0, 0], sizes = [8, 128], strides = [1, 1]} : vector<8x384xf32> to vector<8x128xf32>
    %83 = vector.extract_strided_slice %81 {offsets = [0, 0], sizes = [8, 128], strides = [1, 1]} : vector<8x384xf32> to vector<8x128xf32>
    %84 = arith.addf %82, %83 : vector<8x128xf32>
    %85 = arith.negf %84 : vector<8x128xf32>
    %86 = math.exp %85 : vector<8x128xf32>
    %cst_26 = arith.constant 1.000000e+00 : f32
    %87 = vector.broadcast %cst_26 : f32 to vector<8x128xf32>
    %88 = arith.addf %87, %86 : vector<8x128xf32>
    %89 = arith.divf %87, %88 : vector<8x128xf32>
    %90 = vector.extract_strided_slice %79 {offsets = [0, 128], sizes = [8, 128], strides = [1, 1]} : vector<8x384xf32> to vector<8x128xf32>
    %91 = vector.extract_strided_slice %81 {offsets = [0, 128], sizes = [8, 128], strides = [1, 1]} : vector<8x384xf32> to vector<8x128xf32>
    %92 = arith.addf %90, %91 : vector<8x128xf32>
    %93 = arith.negf %92 : vector<8x128xf32>
    %94 = math.exp %93 : vector<8x128xf32>
    %cst_27 = arith.constant 1.000000e+00 : f32
    %95 = vector.broadcast %cst_27 : f32 to vector<8x128xf32>
    %96 = arith.addf %95, %94 : vector<8x128xf32>
    %97 = arith.divf %95, %96 : vector<8x128xf32>
    %98 = vector.extract_strided_slice %79 {offsets = [0, 256], sizes = [8, 128], strides = [1, 1]} : vector<8x384xf32> to vector<8x128xf32>
    %99 = vector.extract_strided_slice %81 {offsets = [0, 256], sizes = [8, 128], strides = [1, 1]} : vector<8x384xf32> to vector<8x128xf32>
    %100 = arith.mulf %89, %99 : vector<8x128xf32>
    %101 = arith.addf %98, %100 : vector<8x128xf32>
    %102 = math.tanh %101 : vector<8x128xf32>
    %103 = arith.subf %73, %102 : vector<8x128xf32>
    %104 = arith.mulf %97, %103 : vector<8x128xf32>
    %105 = arith.addf %102, %104 : vector<8x128xf32>
    %106 = arith.index_cast %77 : i32 to index
    %c0_28 = arith.constant 0 : index
    %107 = vector.load %arg14[%106, %c0_28] : memref<64x128xf32, #tpu.memory_space<vmem>>, vector<8x128xf32>
    tpu.vector_store %arg14[%106, %c0_28], %105 {strides = array<i32>} : memref<64x128xf32, #tpu.memory_space<vmem>>, vector<8x128xf32>,
    %c3_i32 = arith.constant 3 : i32
    %c8_i32_29 = arith.constant 8 : i32
    %108 = arith.muli %c3_i32, %c8_i32_29 : i32
    %109 = tpu.assume_multiple %108, 8 : i32
    %110 = arith.index_cast %109 : i32 to index
    %c0_30 = arith.constant 0 : index
    %111 = vector.load %arg13[%110, %c0_30] : memref<64x384xf32, #tpu.memory_space<vmem>>, vector<8x384xf32>
    %cst_31 = arith.constant dense<0.000000e+00> : vector<8x384xf32>
    %112 = tpu.matmul %105, %1, %cst_31 {dimension_numbers = #tpu.dot_dimension_numbers<[1], [0], [0], [1], [0, 0, 1, 1], [], []>} : vector<8x128xf32>, vector<128x384xf32>, vector<8x384xf32> -> vector<8x384xf32>
    %113 = arith.addf %112, %10 : vector<8x384xf32>
    %114 = vector.extract_strided_slice %111 {offsets = [0, 0], sizes = [8, 128], strides = [1, 1]} : vector<8x384xf32> to vector<8x128xf32>
    %115 = vector.extract_strided_slice %113 {offsets = [0, 0], sizes = [8, 128], strides = [1, 1]} : vector<8x384xf32> to vector<8x128xf32>
    %116 = arith.addf %114, %115 : vector<8x128xf32>
    %117 = arith.negf %116 : vector<8x128xf32>
    %118 = math.exp %117 : vector<8x128xf32>
    %cst_32 = arith.constant 1.000000e+00 : f32
    %119 = vector.broadcast %cst_32 : f32 to vector<8x128xf32>
    %120 = arith.addf %119, %118 : vector<8x128xf32>
    %121 = arith.divf %119, %120 : vector<8x128xf32>
    %122 = vector.extract_strided_slice %111 {offsets = [0, 128], sizes = [8, 128], strides = [1, 1]} : vector<8x384xf32> to vector<8x128xf32>
    %123 = vector.extract_strided_slice %113 {offsets = [0, 128], sizes = [8, 128], strides = [1, 1]} : vector<8x384xf32> to vector<8x128xf32>
    %124 = arith.addf %122, %123 : vector<8x128xf32>
    %125 = arith.negf %124 : vector<8x128xf32>
    %126 = math.exp %125 : vector<8x128xf32>
    %cst_33 = arith.constant 1.000000e+00 : f32
    %127 = vector.broadcast %cst_33 : f32 to vector<8x128xf32>
    %128 = arith.addf %127, %126 : vector<8x128xf32>
    %129 = arith.divf %127, %128 : vector<8x128xf32>
    %130 = vector.extract_strided_slice %111 {offsets = [0, 256], sizes = [8, 128], strides = [1, 1]} : vector<8x384xf32> to vector<8x128xf32>
    %131 = vector.extract_strided_slice %113 {offsets = [0, 256], sizes = [8, 128], strides = [1, 1]} : vector<8x384xf32> to vector<8x128xf32>
    %132 = arith.mulf %121, %131 : vector<8x128xf32>
    %133 = arith.addf %130, %132 : vector<8x128xf32>
    %134 = math.tanh %133 : vector<8x128xf32>
    %135 = arith.subf %105, %134 : vector<8x128xf32>
    %136 = arith.mulf %129, %135 : vector<8x128xf32>
    %137 = arith.addf %134, %136 : vector<8x128xf32>
    %138 = arith.index_cast %109 : i32 to index
    %c0_34 = arith.constant 0 : index
    %139 = vector.load %arg14[%138, %c0_34] : memref<64x128xf32, #tpu.memory_space<vmem>>, vector<8x128xf32>
    tpu.vector_store %arg14[%138, %c0_34], %137 {strides = array<i32>} : memref<64x128xf32, #tpu.memory_space<vmem>>, vector<8x128xf32>,
    %c4_i32 = arith.constant 4 : i32
    %c8_i32_35 = arith.constant 8 : i32
    %140 = arith.muli %c4_i32, %c8_i32_35 : i32
    %141 = tpu.assume_multiple %140, 8 : i32
    %142 = arith.index_cast %141 : i32 to index
    %c0_36 = arith.constant 0 : index
    %143 = vector.load %arg13[%142, %c0_36] : memref<64x384xf32, #tpu.memory_space<vmem>>, vector<8x384xf32>
    %cst_37 = arith.constant dense<0.000000e+00> : vector<8x384xf32>
    %144 = tpu.matmul %137, %1, %cst_37 {dimension_numbers = #tpu.dot_dimension_numbers<[1], [0], [0], [1], [0, 0, 1, 1], [], []>} : vector<8x128xf32>, vector<128x384xf32>, vector<8x384xf32> -> vector<8x384xf32>
    %145 = arith.addf %144, %10 : vector<8x384xf32>
    %146 = vector.extract_strided_slice %143 {offsets = [0, 0], sizes = [8, 128], strides = [1, 1]} : vector<8x384xf32> to vector<8x128xf32>
    %147 = vector.extract_strided_slice %145 {offsets = [0, 0], sizes = [8, 128], strides = [1, 1]} : vector<8x384xf32> to vector<8x128xf32>
    %148 = arith.addf %146, %147 : vector<8x128xf32>
    %149 = arith.negf %148 : vector<8x128xf32>
    %150 = math.exp %149 : vector<8x128xf32>
    %cst_38 = arith.constant 1.000000e+00 : f32
    %151 = vector.broadcast %cst_38 : f32 to vector<8x128xf32>
    %152 = arith.addf %151, %150 : vector<8x128xf32>
    %153 = arith.divf %151, %152 : vector<8x128xf32>
    %154 = vector.extract_strided_slice %143 {offsets = [0, 128], sizes = [8, 128], strides = [1, 1]} : vector<8x384xf32> to vector<8x128xf32>
    %155 = vector.extract_strided_slice %145 {offsets = [0, 128], sizes = [8, 128], strides = [1, 1]} : vector<8x384xf32> to vector<8x128xf32>
    %156 = arith.addf %154, %155 : vector<8x128xf32>
    %157 = arith.negf %156 : vector<8x128xf32>
    %158 = math.exp %157 : vector<8x128xf32>
    %cst_39 = arith.constant 1.000000e+00 : f32
    %159 = vector.broadcast %cst_39 : f32 to vector<8x128xf32>
    %160 = arith.addf %159, %158 : vector<8x128xf32>
    %161 = arith.divf %159, %160 : vector<8x128xf32>
    %162 = vector.extract_strided_slice %143 {offsets = [0, 256], sizes = [8, 128], strides = [1, 1]} : vector<8x384xf32> to vector<8x128xf32>
    %163 = vector.extract_strided_slice %145 {offsets = [0, 256], sizes = [8, 128], strides = [1, 1]} : vector<8x384xf32> to vector<8x128xf32>
    %164 = arith.mulf %153, %163 : vector<8x128xf32>
    %165 = arith.addf %162, %164 : vector<8x128xf32>
    %166 = math.tanh %165 : vector<8x128xf32>
    %167 = arith.subf %137, %166 : vector<8x128xf32>
    %168 = arith.mulf %161, %167 : vector<8x128xf32>
    %169 = arith.addf %166, %168 : vector<8x128xf32>
    %170 = arith.index_cast %141 : i32 to index
    %c0_40 = arith.constant 0 : index
    %171 = vector.load %arg14[%170, %c0_40] : memref<64x128xf32, #tpu.memory_space<vmem>>, vector<8x128xf32>
    tpu.vector_store %arg14[%170, %c0_40], %169 {strides = array<i32>} : memref<64x128xf32, #tpu.memory_space<vmem>>, vector<8x128xf32>,
    %c5_i32 = arith.constant 5 : i32
    %c8_i32_41 = arith.constant 8 : i32
    %172 = arith.muli %c5_i32, %c8_i32_41 : i32
    %173 = tpu.assume_multiple %172, 8 : i32
    %174 = arith.index_cast %173 : i32 to index
    %c0_42 = arith.constant 0 : index
    %175 = vector.load %arg13[%174, %c0_42] : memref<64x384xf32, #tpu.memory_space<vmem>>, vector<8x384xf32>
    %cst_43 = arith.constant dense<0.000000e+00> : vector<8x384xf32>
    %176 = tpu.matmul %169, %1, %cst_43 {dimension_numbers = #tpu.dot_dimension_numbers<[1], [0], [0], [1], [0, 0, 1, 1], [], []>} : vector<8x128xf32>, vector<128x384xf32>, vector<8x384xf32> -> vector<8x384xf32>
    %177 = arith.addf %176, %10 : vector<8x384xf32>
    %178 = vector.extract_strided_slice %175 {offsets = [0, 0], sizes = [8, 128], strides = [1, 1]} : vector<8x384xf32> to vector<8x128xf32>
    %179 = vector.extract_strided_slice %177 {offsets = [0, 0], sizes = [8, 128], strides = [1, 1]} : vector<8x384xf32> to vector<8x128xf32>
    %180 = arith.addf %178, %179 : vector<8x128xf32>
    %181 = arith.negf %180 : vector<8x128xf32>
    %182 = math.exp %181 : vector<8x128xf32>
    %cst_44 = arith.constant 1.000000e+00 : f32
    %183 = vector.broadcast %cst_44 : f32 to vector<8x128xf32>
    %184 = arith.addf %183, %182 : vector<8x128xf32>
    %185 = arith.divf %183, %184 : vector<8x128xf32>
    %186 = vector.extract_strided_slice %175 {offsets = [0, 128], sizes = [8, 128], strides = [1, 1]} : vector<8x384xf32> to vector<8x128xf32>
    %187 = vector.extract_strided_slice %177 {offsets = [0, 128], sizes = [8, 128], strides = [1, 1]} : vector<8x384xf32> to vector<8x128xf32>
    %188 = arith.addf %186, %187 : vector<8x128xf32>
    %189 = arith.negf %188 : vector<8x128xf32>
    %190 = math.exp %189 : vector<8x128xf32>
    %cst_45 = arith.constant 1.000000e+00 : f32
    %191 = vector.broadcast %cst_45 : f32 to vector<8x128xf32>
    %192 = arith.addf %191, %190 : vector<8x128xf32>
    %193 = arith.divf %191, %192 : vector<8x128xf32>
    %194 = vector.extract_strided_slice %175 {offsets = [0, 256], sizes = [8, 128], strides = [1, 1]} : vector<8x384xf32> to vector<8x128xf32>
    %195 = vector.extract_strided_slice %177 {offsets = [0, 256], sizes = [8, 128], strides = [1, 1]} : vector<8x384xf32> to vector<8x128xf32>
    %196 = arith.mulf %185, %195 : vector<8x128xf32>
    %197 = arith.addf %194, %196 : vector<8x128xf32>
    %198 = math.tanh %197 : vector<8x128xf32>
    %199 = arith.subf %169, %198 : vector<8x128xf32>
    %200 = arith.mulf %193, %199 : vector<8x128xf32>
    %201 = arith.addf %198, %200 : vector<8x128xf32>
    %202 = arith.index_cast %173 : i32 to index
    %c0_46 = arith.constant 0 : index
    %203 = vector.load %arg14[%202, %c0_46] : memref<64x128xf32, #tpu.memory_space<vmem>>, vector<8x128xf32>
    tpu.vector_store %arg14[%202, %c0_46], %201 {strides = array<i32>} : memref<64x128xf32, #tpu.memory_space<vmem>>, vector<8x128xf32>,
    %c6_i32 = arith.constant 6 : i32
    %c8_i32_47 = arith.constant 8 : i32
    %204 = arith.muli %c6_i32, %c8_i32_47 : i32
    %205 = tpu.assume_multiple %204, 8 : i32
    %206 = arith.index_cast %205 : i32 to index
    %c0_48 = arith.constant 0 : index
    %207 = vector.load %arg13[%206, %c0_48] : memref<64x384xf32, #tpu.memory_space<vmem>>, vector<8x384xf32>
    %cst_49 = arith.constant dense<0.000000e+00> : vector<8x384xf32>
    %208 = tpu.matmul %201, %1, %cst_49 {dimension_numbers = #tpu.dot_dimension_numbers<[1], [0], [0], [1], [0, 0, 1, 1], [], []>} : vector<8x128xf32>, vector<128x384xf32>, vector<8x384xf32> -> vector<8x384xf32>
    %209 = arith.addf %208, %10 : vector<8x384xf32>
    %210 = vector.extract_strided_slice %207 {offsets = [0, 0], sizes = [8, 128], strides = [1, 1]} : vector<8x384xf32> to vector<8x128xf32>
    %211 = vector.extract_strided_slice %209 {offsets = [0, 0], sizes = [8, 128], strides = [1, 1]} : vector<8x384xf32> to vector<8x128xf32>
    %212 = arith.addf %210, %211 : vector<8x128xf32>
    %213 = arith.negf %212 : vector<8x128xf32>
    %214 = math.exp %213 : vector<8x128xf32>
    %cst_50 = arith.constant 1.000000e+00 : f32
    %215 = vector.broadcast %cst_50 : f32 to vector<8x128xf32>
    %216 = arith.addf %215, %214 : vector<8x128xf32>
    %217 = arith.divf %215, %216 : vector<8x128xf32>
    %218 = vector.extract_strided_slice %207 {offsets = [0, 128], sizes = [8, 128], strides = [1, 1]} : vector<8x384xf32> to vector<8x128xf32>
    %219 = vector.extract_strided_slice %209 {offsets = [0, 128], sizes = [8, 128], strides = [1, 1]} : vector<8x384xf32> to vector<8x128xf32>
    %220 = arith.addf %218, %219 : vector<8x128xf32>
    %221 = arith.negf %220 : vector<8x128xf32>
    %222 = math.exp %221 : vector<8x128xf32>
    %cst_51 = arith.constant 1.000000e+00 : f32
    %223 = vector.broadcast %cst_51 : f32 to vector<8x128xf32>
    %224 = arith.addf %223, %222 : vector<8x128xf32>
    %225 = arith.divf %223, %224 : vector<8x128xf32>
    %226 = vector.extract_strided_slice %207 {offsets = [0, 256], sizes = [8, 128], strides = [1, 1]} : vector<8x384xf32> to vector<8x128xf32>
    %227 = vector.extract_strided_slice %209 {offsets = [0, 256], sizes = [8, 128], strides = [1, 1]} : vector<8x384xf32> to vector<8x128xf32>
    %228 = arith.mulf %217, %227 : vector<8x128xf32>
    %229 = arith.addf %226, %228 : vector<8x128xf32>
    %230 = math.tanh %229 : vector<8x128xf32>
    %231 = arith.subf %201, %230 : vector<8x128xf32>
    %232 = arith.mulf %225, %231 : vector<8x128xf32>
    %233 = arith.addf %230, %232 : vector<8x128xf32>
    %234 = arith.index_cast %205 : i32 to index
    %c0_52 = arith.constant 0 : index
    %235 = vector.load %arg14[%234, %c0_52] : memref<64x128xf32, #tpu.memory_space<vmem>>, vector<8x128xf32>
    tpu.vector_store %arg14[%234, %c0_52], %233 {strides = array<i32>} : memref<64x128xf32, #tpu.memory_space<vmem>>, vector<8x128xf32>,
    %c7_i32 = arith.constant 7 : i32
    %c8_i32_53 = arith.constant 8 : i32
    %236 = arith.muli %c7_i32, %c8_i32_53 : i32
    %237 = tpu.assume_multiple %236, 8 : i32
    %238 = arith.index_cast %237 : i32 to index
    %c0_54 = arith.constant 0 : index
    %239 = vector.load %arg13[%238, %c0_54] : memref<64x384xf32, #tpu.memory_space<vmem>>, vector<8x384xf32>
    %cst_55 = arith.constant dense<0.000000e+00> : vector<8x384xf32>
    %240 = tpu.matmul %233, %1, %cst_55 {dimension_numbers = #tpu.dot_dimension_numbers<[1], [0], [0], [1], [0, 0, 1, 1], [], []>} : vector<8x128xf32>, vector<128x384xf32>, vector<8x384xf32> -> vector<8x384xf32>
    %241 = arith.addf %240, %10 : vector<8x384xf32>
    %242 = vector.extract_strided_slice %239 {offsets = [0, 0], sizes = [8, 128], strides = [1, 1]} : vector<8x384xf32> to vector<8x128xf32>
    %243 = vector.extract_strided_slice %241 {offsets = [0, 0], sizes = [8, 128], strides = [1, 1]} : vector<8x384xf32> to vector<8x128xf32>
    %244 = arith.addf %242, %243 : vector<8x128xf32>
    %245 = arith.negf %244 : vector<8x128xf32>
    %246 = math.exp %245 : vector<8x128xf32>
    %cst_56 = arith.constant 1.000000e+00 : f32
    %247 = vector.broadcast %cst_56 : f32 to vector<8x128xf32>
    %248 = arith.addf %247, %246 : vector<8x128xf32>
    %249 = arith.divf %247, %248 : vector<8x128xf32>
    %250 = vector.extract_strided_slice %239 {offsets = [0, 128], sizes = [8, 128], strides = [1, 1]} : vector<8x384xf32> to vector<8x128xf32>
    %251 = vector.extract_strided_slice %241 {offsets = [0, 128], sizes = [8, 128], strides = [1, 1]} : vector<8x384xf32> to vector<8x128xf32>
    %252 = arith.addf %250, %251 : vector<8x128xf32>
    %253 = arith.negf %252 : vector<8x128xf32>
    %254 = math.exp %253 : vector<8x128xf32>
    %cst_57 = arith.constant 1.000000e+00 : f32
    %255 = vector.broadcast %cst_57 : f32 to vector<8x128xf32>
    %256 = arith.addf %255, %254 : vector<8x128xf32>
    %257 = arith.divf %255, %256 : vector<8x128xf32>
    %258 = vector.extract_strided_slice %239 {offsets = [0, 256], sizes = [8, 128], strides = [1, 1]} : vector<8x384xf32> to vector<8x128xf32>
    %259 = vector.extract_strided_slice %241 {offsets = [0, 256], sizes = [8, 128], strides = [1, 1]} : vector<8x384xf32> to vector<8x128xf32>
    %260 = arith.mulf %249, %259 : vector<8x128xf32>
    %261 = arith.addf %258, %260 : vector<8x128xf32>
    %262 = math.tanh %261 : vector<8x128xf32>
    %263 = arith.subf %233, %262 : vector<8x128xf32>
    %264 = arith.mulf %257, %263 : vector<8x128xf32>
    %265 = arith.addf %262, %264 : vector<8x128xf32>
    %266 = arith.index_cast %237 : i32 to index
    %c0_58 = arith.constant 0 : index
    %267 = vector.load %arg14[%266, %c0_58] : memref<64x128xf32, #tpu.memory_space<vmem>>, vector<8x128xf32>
    tpu.vector_store %arg14[%266, %c0_58], %265 {strides = array<i32>} : memref<64x128xf32, #tpu.memory_space<vmem>>, vector<8x128xf32>,
    %c8_i32_59 = arith.constant 8 : i32
    %c0_60 = arith.constant 0 : index
    %c0_61 = arith.constant 0 : index
    %268 = vector.load %arg6[%c0_60, %c0_61] : memref<128x384xf32, #tpu.memory_space<vmem>>, vector<128x384xf32>
    %c0_62 = arith.constant 0 : index
    %c0_63 = arith.constant 0 : index
    %269 = vector.load %arg7[%c0_62, %c0_63] : memref<128x384xf32, #tpu.memory_space<vmem>>, vector<128x384xf32>
    %c0_64 = arith.constant 0 : index
    %c0_65 = arith.constant 0 : index
    %270 = vector.load %arg8[%c0_64, %c0_65] : memref<1x384xf32, #tpu.memory_space<vmem>>, vector<1x384xf32>
    %c0_66 = arith.constant 0 : index
    %c0_67 = arith.constant 0 : index
    %271 = vector.load %arg9[%c0_66, %c0_67] : memref<1x384xf32, #tpu.memory_space<vmem>>, vector<1x384xf32>
    %c0_68 = arith.constant 0 : index
    %c0_69 = arith.constant 0 : index
    %272 = vector.load %arg14[%c0_68, %c0_69] : memref<64x128xf32, #tpu.memory_space<vmem>>, vector<64x128xf32>
    %cst_70 = arith.constant dense<0.000000e+00> : vector<64x384xf32>
    %273 = tpu.matmul %272, %268, %cst_70 {dimension_numbers = #tpu.dot_dimension_numbers<[1], [0], [0], [1], [0, 0, 1, 1], [], []>} : vector<64x128xf32>, vector<128x384xf32>, vector<64x384xf32> -> vector<64x384xf32>
    %274 = vector.broadcast %270 : vector<1x384xf32> to vector<64x384xf32>
    %275 = arith.addf %273, %274 : vector<64x384xf32>
    %c0_71 = arith.constant 0 : index
    %c0_72 = arith.constant 0 : index
    %276 = vector.load %arg13[%c0_71, %c0_72] : memref<64x384xf32, #tpu.memory_space<vmem>>, vector<64x384xf32>
    tpu.vector_store %arg13[%c0_71, %c0_72], %275 {strides = array<i32>} : memref<64x384xf32, #tpu.memory_space<vmem>>, vector<64x384xf32>,
    %277 = vector.shape_cast %271 : vector<1x384xf32> to vector<1x384xf32>
    %278 = vector.broadcast %277 : vector<1x384xf32> to vector<8x384xf32>
    %cst_73 = arith.constant 0.000000e+00 : f32
    %279 = vector.broadcast %cst_73 : f32 to vector<8x128xf32>
    %c0_i32_74 = arith.constant 0 : i32
    %c8_i32_75 = arith.constant 8 : i32
    %280 = arith.muli %c0_i32_74, %c8_i32_75 : i32
    %281 = tpu.assume_multiple %280, 8 : i32
    %282 = arith.index_cast %281 : i32 to index
    %c0_76 = arith.constant 0 : index
    %283 = vector.load %arg13[%282, %c0_76] : memref<64x384xf32, #tpu.memory_space<vmem>>, vector<8x384xf32>
    %cst_77 = arith.constant dense<0.000000e+00> : vector<8x384xf32>
    %284 = tpu.matmul %279, %269, %cst_77 {dimension_numbers = #tpu.dot_dimension_numbers<[1], [0], [0], [1], [0, 0, 1, 1], [], []>} : vector<8x128xf32>, vector<128x384xf32>, vector<8x384xf32> -> vector<8x384xf32>
    %285 = arith.addf %284, %278 : vector<8x384xf32>
    %286 = vector.extract_strided_slice %283 {offsets = [0, 0], sizes = [8, 128], strides = [1, 1]} : vector<8x384xf32> to vector<8x128xf32>
    %287 = vector.extract_strided_slice %285 {offsets = [0, 0], sizes = [8, 128], strides = [1, 1]} : vector<8x384xf32> to vector<8x128xf32>
    %288 = arith.addf %286, %287 : vector<8x128xf32>
    %289 = arith.negf %288 : vector<8x128xf32>
    %290 = math.exp %289 : vector<8x128xf32>
    %cst_78 = arith.constant 1.000000e+00 : f32
    %291 = vector.broadcast %cst_78 : f32 to vector<8x128xf32>
    %292 = arith.addf %291, %290 : vector<8x128xf32>
    %293 = arith.divf %291, %292 : vector<8x128xf32>
    %294 = vector.extract_strided_slice %283 {offsets = [0, 128], sizes = [8, 128], strides = [1, 1]} : vector<8x384xf32> to vector<8x128xf32>
    %295 = vector.extract_strided_slice %285 {offsets = [0, 128], sizes = [8, 128], strides = [1, 1]} : vector<8x384xf32> to vector<8x128xf32>
    %296 = arith.addf %294, %295 : vector<8x128xf32>
    %297 = arith.negf %296 : vector<8x128xf32>
    %298 = math.exp %297 : vector<8x128xf32>
    %cst_79 = arith.constant 1.000000e+00 : f32
    %299 = vector.broadcast %cst_79 : f32 to vector<8x128xf32>
    %300 = arith.addf %299, %298 : vector<8x128xf32>
    %301 = arith.divf %299, %300 : vector<8x128xf32>
    %302 = vector.extract_strided_slice %283 {offsets = [0, 256], sizes = [8, 128], strides = [1, 1]} : vector<8x384xf32> to vector<8x128xf32>
    %303 = vector.extract_strided_slice %285 {offsets = [0, 256], sizes = [8, 128], strides = [1, 1]} : vector<8x384xf32> to vector<8x128xf32>
    %304 = arith.mulf %293, %303 : vector<8x128xf32>
    %305 = arith.addf %302, %304 : vector<8x128xf32>
    %306 = math.tanh %305 : vector<8x128xf32>
    %307 = arith.subf %279, %306 : vector<8x128xf32>
    %308 = arith.mulf %301, %307 : vector<8x128xf32>
    %309 = arith.addf %306, %308 : vector<8x128xf32>
    %310 = arith.index_cast %281 : i32 to index
    %c0_80 = arith.constant 0 : index
    %311 = vector.load %arg14[%310, %c0_80] : memref<64x128xf32, #tpu.memory_space<vmem>>, vector<8x128xf32>
    tpu.vector_store %arg14[%310, %c0_80], %309 {strides = array<i32>} : memref<64x128xf32, #tpu.memory_space<vmem>>, vector<8x128xf32>,
    %c1_i32_81 = arith.constant 1 : i32
    %c8_i32_82 = arith.constant 8 : i32
    %312 = arith.muli %c1_i32_81, %c8_i32_82 : i32
    %313 = tpu.assume_multiple %312, 8 : i32
    %314 = arith.index_cast %313 : i32 to index
    %c0_83 = arith.constant 0 : index
    %315 = vector.load %arg13[%314, %c0_83] : memref<64x384xf32, #tpu.memory_space<vmem>>, vector<8x384xf32>
    %cst_84 = arith.constant dense<0.000000e+00> : vector<8x384xf32>
    %316 = tpu.matmul %309, %269, %cst_84 {dimension_numbers = #tpu.dot_dimension_numbers<[1], [0], [0], [1], [0, 0, 1, 1], [], []>} : vector<8x128xf32>, vector<128x384xf32>, vector<8x384xf32> -> vector<8x384xf32>
    %317 = arith.addf %316, %278 : vector<8x384xf32>
    %318 = vector.extract_strided_slice %315 {offsets = [0, 0], sizes = [8, 128], strides = [1, 1]} : vector<8x384xf32> to vector<8x128xf32>
    %319 = vector.extract_strided_slice %317 {offsets = [0, 0], sizes = [8, 128], strides = [1, 1]} : vector<8x384xf32> to vector<8x128xf32>
    %320 = arith.addf %318, %319 : vector<8x128xf32>
    %321 = arith.negf %320 : vector<8x128xf32>
    %322 = math.exp %321 : vector<8x128xf32>
    %cst_85 = arith.constant 1.000000e+00 : f32
    %323 = vector.broadcast %cst_85 : f32 to vector<8x128xf32>
    %324 = arith.addf %323, %322 : vector<8x128xf32>
    %325 = arith.divf %323, %324 : vector<8x128xf32>
    %326 = vector.extract_strided_slice %315 {offsets = [0, 128], sizes = [8, 128], strides = [1, 1]} : vector<8x384xf32> to vector<8x128xf32>
    %327 = vector.extract_strided_slice %317 {offsets = [0, 128], sizes = [8, 128], strides = [1, 1]} : vector<8x384xf32> to vector<8x128xf32>
    %328 = arith.addf %326, %327 : vector<8x128xf32>
    %329 = arith.negf %328 : vector<8x128xf32>
    %330 = math.exp %329 : vector<8x128xf32>
    %cst_86 = arith.constant 1.000000e+00 : f32
    %331 = vector.broadcast %cst_86 : f32 to vector<8x128xf32>
    %332 = arith.addf %331, %330 : vector<8x128xf32>
    %333 = arith.divf %331, %332 : vector<8x128xf32>
    %334 = vector.extract_strided_slice %315 {offsets = [0, 256], sizes = [8, 128], strides = [1, 1]} : vector<8x384xf32> to vector<8x128xf32>
    %335 = vector.extract_strided_slice %317 {offsets = [0, 256], sizes = [8, 128], strides = [1, 1]} : vector<8x384xf32> to vector<8x128xf32>
    %336 = arith.mulf %325, %335 : vector<8x128xf32>
    %337 = arith.addf %334, %336 : vector<8x128xf32>
    %338 = math.tanh %337 : vector<8x128xf32>
    %339 = arith.subf %309, %338 : vector<8x128xf32>
    %340 = arith.mulf %333, %339 : vector<8x128xf32>
    %341 = arith.addf %338, %340 : vector<8x128xf32>
    %342 = arith.index_cast %313 : i32 to index
    %c0_87 = arith.constant 0 : index
    %343 = vector.load %arg14[%342, %c0_87] : memref<64x128xf32, #tpu.memory_space<vmem>>, vector<8x128xf32>
    tpu.vector_store %arg14[%342, %c0_87], %341 {strides = array<i32>} : memref<64x128xf32, #tpu.memory_space<vmem>>, vector<8x128xf32>,
    %c2_i32_88 = arith.constant 2 : i32
    %c8_i32_89 = arith.constant 8 : i32
    %344 = arith.muli %c2_i32_88, %c8_i32_89 : i32
    %345 = tpu.assume_multiple %344, 8 : i32
    %346 = arith.index_cast %345 : i32 to index
    %c0_90 = arith.constant 0 : index
    %347 = vector.load %arg13[%346, %c0_90] : memref<64x384xf32, #tpu.memory_space<vmem>>, vector<8x384xf32>
    %cst_91 = arith.constant dense<0.000000e+00> : vector<8x384xf32>
    %348 = tpu.matmul %341, %269, %cst_91 {dimension_numbers = #tpu.dot_dimension_numbers<[1], [0], [0], [1], [0, 0, 1, 1], [], []>} : vector<8x128xf32>, vector<128x384xf32>, vector<8x384xf32> -> vector<8x384xf32>
    %349 = arith.addf %348, %278 : vector<8x384xf32>
    %350 = vector.extract_strided_slice %347 {offsets = [0, 0], sizes = [8, 128], strides = [1, 1]} : vector<8x384xf32> to vector<8x128xf32>
    %351 = vector.extract_strided_slice %349 {offsets = [0, 0], sizes = [8, 128], strides = [1, 1]} : vector<8x384xf32> to vector<8x128xf32>
    %352 = arith.addf %350, %351 : vector<8x128xf32>
    %353 = arith.negf %352 : vector<8x128xf32>
    %354 = math.exp %353 : vector<8x128xf32>
    %cst_92 = arith.constant 1.000000e+00 : f32
    %355 = vector.broadcast %cst_92 : f32 to vector<8x128xf32>
    %356 = arith.addf %355, %354 : vector<8x128xf32>
    %357 = arith.divf %355, %356 : vector<8x128xf32>
    %358 = vector.extract_strided_slice %347 {offsets = [0, 128], sizes = [8, 128], strides = [1, 1]} : vector<8x384xf32> to vector<8x128xf32>
    %359 = vector.extract_strided_slice %349 {offsets = [0, 128], sizes = [8, 128], strides = [1, 1]} : vector<8x384xf32> to vector<8x128xf32>
    %360 = arith.addf %358, %359 : vector<8x128xf32>
    %361 = arith.negf %360 : vector<8x128xf32>
    %362 = math.exp %361 : vector<8x128xf32>
    %cst_93 = arith.constant 1.000000e+00 : f32
    %363 = vector.broadcast %cst_93 : f32 to vector<8x128xf32>
    %364 = arith.addf %363, %362 : vector<8x128xf32>
    %365 = arith.divf %363, %364 : vector<8x128xf32>
    %366 = vector.extract_strided_slice %347 {offsets = [0, 256], sizes = [8, 128], strides = [1, 1]} : vector<8x384xf32> to vector<8x128xf32>
    %367 = vector.extract_strided_slice %349 {offsets = [0, 256], sizes = [8, 128], strides = [1, 1]} : vector<8x384xf32> to vector<8x128xf32>
    %368 = arith.mulf %357, %367 : vector<8x128xf32>
    %369 = arith.addf %366, %368 : vector<8x128xf32>
    %370 = math.tanh %369 : vector<8x128xf32>
    %371 = arith.subf %341, %370 : vector<8x128xf32>
    %372 = arith.mulf %365, %371 : vector<8x128xf32>
    %373 = arith.addf %370, %372 : vector<8x128xf32>
    %374 = arith.index_cast %345 : i32 to index
    %c0_94 = arith.constant 0 : index
    %375 = vector.load %arg14[%374, %c0_94] : memref<64x128xf32, #tpu.memory_space<vmem>>, vector<8x128xf32>
    tpu.vector_store %arg14[%374, %c0_94], %373 {strides = array<i32>} : memref<64x128xf32, #tpu.memory_space<vmem>>, vector<8x128xf32>,
    %c3_i32_95 = arith.constant 3 : i32
    %c8_i32_96 = arith.constant 8 : i32
    %376 = arith.muli %c3_i32_95, %c8_i32_96 : i32
    %377 = tpu.assume_multiple %376, 8 : i32
    %378 = arith.index_cast %377 : i32 to index
    %c0_97 = arith.constant 0 : index
    %379 = vector.load %arg13[%378, %c0_97] : memref<64x384xf32, #tpu.memory_space<vmem>>, vector<8x384xf32>
    %cst_98 = arith.constant dense<0.000000e+00> : vector<8x384xf32>
    %380 = tpu.matmul %373, %269, %cst_98 {dimension_numbers = #tpu.dot_dimension_numbers<[1], [0], [0], [1], [0, 0, 1, 1], [], []>} : vector<8x128xf32>, vector<128x384xf32>, vector<8x384xf32> -> vector<8x384xf32>
    %381 = arith.addf %380, %278 : vector<8x384xf32>
    %382 = vector.extract_strided_slice %379 {offsets = [0, 0], sizes = [8, 128], strides = [1, 1]} : vector<8x384xf32> to vector<8x128xf32>
    %383 = vector.extract_strided_slice %381 {offsets = [0, 0], sizes = [8, 128], strides = [1, 1]} : vector<8x384xf32> to vector<8x128xf32>
    %384 = arith.addf %382, %383 : vector<8x128xf32>
    %385 = arith.negf %384 : vector<8x128xf32>
    %386 = math.exp %385 : vector<8x128xf32>
    %cst_99 = arith.constant 1.000000e+00 : f32
    %387 = vector.broadcast %cst_99 : f32 to vector<8x128xf32>
    %388 = arith.addf %387, %386 : vector<8x128xf32>
    %389 = arith.divf %387, %388 : vector<8x128xf32>
    %390 = vector.extract_strided_slice %379 {offsets = [0, 128], sizes = [8, 128], strides = [1, 1]} : vector<8x384xf32> to vector<8x128xf32>
    %391 = vector.extract_strided_slice %381 {offsets = [0, 128], sizes = [8, 128], strides = [1, 1]} : vector<8x384xf32> to vector<8x128xf32>
    %392 = arith.addf %390, %391 : vector<8x128xf32>
    %393 = arith.negf %392 : vector<8x128xf32>
    %394 = math.exp %393 : vector<8x128xf32>
    %cst_100 = arith.constant 1.000000e+00 : f32
    %395 = vector.broadcast %cst_100 : f32 to vector<8x128xf32>
    %396 = arith.addf %395, %394 : vector<8x128xf32>
    %397 = arith.divf %395, %396 : vector<8x128xf32>
    %398 = vector.extract_strided_slice %379 {offsets = [0, 256], sizes = [8, 128], strides = [1, 1]} : vector<8x384xf32> to vector<8x128xf32>
    %399 = vector.extract_strided_slice %381 {offsets = [0, 256], sizes = [8, 128], strides = [1, 1]} : vector<8x384xf32> to vector<8x128xf32>
    %400 = arith.mulf %389, %399 : vector<8x128xf32>
    %401 = arith.addf %398, %400 : vector<8x128xf32>
    %402 = math.tanh %401 : vector<8x128xf32>
    %403 = arith.subf %373, %402 : vector<8x128xf32>
    %404 = arith.mulf %397, %403 : vector<8x128xf32>
    %405 = arith.addf %402, %404 : vector<8x128xf32>
    %406 = arith.index_cast %377 : i32 to index
    %c0_101 = arith.constant 0 : index
    %407 = vector.load %arg14[%406, %c0_101] : memref<64x128xf32, #tpu.memory_space<vmem>>, vector<8x128xf32>
    tpu.vector_store %arg14[%406, %c0_101], %405 {strides = array<i32>} : memref<64x128xf32, #tpu.memory_space<vmem>>, vector<8x128xf32>,
    %c4_i32_102 = arith.constant 4 : i32
    %c8_i32_103 = arith.constant 8 : i32
    %408 = arith.muli %c4_i32_102, %c8_i32_103 : i32
    %409 = tpu.assume_multiple %408, 8 : i32
    %410 = arith.index_cast %409 : i32 to index
    %c0_104 = arith.constant 0 : index
    %411 = vector.load %arg13[%410, %c0_104] : memref<64x384xf32, #tpu.memory_space<vmem>>, vector<8x384xf32>
    %cst_105 = arith.constant dense<0.000000e+00> : vector<8x384xf32>
    %412 = tpu.matmul %405, %269, %cst_105 {dimension_numbers = #tpu.dot_dimension_numbers<[1], [0], [0], [1], [0, 0, 1, 1], [], []>} : vector<8x128xf32>, vector<128x384xf32>, vector<8x384xf32> -> vector<8x384xf32>
    %413 = arith.addf %412, %278 : vector<8x384xf32>
    %414 = vector.extract_strided_slice %411 {offsets = [0, 0], sizes = [8, 128], strides = [1, 1]} : vector<8x384xf32> to vector<8x128xf32>
    %415 = vector.extract_strided_slice %413 {offsets = [0, 0], sizes = [8, 128], strides = [1, 1]} : vector<8x384xf32> to vector<8x128xf32>
    %416 = arith.addf %414, %415 : vector<8x128xf32>
    %417 = arith.negf %416 : vector<8x128xf32>
    %418 = math.exp %417 : vector<8x128xf32>
    %cst_106 = arith.constant 1.000000e+00 : f32
    %419 = vector.broadcast %cst_106 : f32 to vector<8x128xf32>
    %420 = arith.addf %419, %418 : vector<8x128xf32>
    %421 = arith.divf %419, %420 : vector<8x128xf32>
    %422 = vector.extract_strided_slice %411 {offsets = [0, 128], sizes = [8, 128], strides = [1, 1]} : vector<8x384xf32> to vector<8x128xf32>
    %423 = vector.extract_strided_slice %413 {offsets = [0, 128], sizes = [8, 128], strides = [1, 1]} : vector<8x384xf32> to vector<8x128xf32>
    %424 = arith.addf %422, %423 : vector<8x128xf32>
    %425 = arith.negf %424 : vector<8x128xf32>
    %426 = math.exp %425 : vector<8x128xf32>
    %cst_107 = arith.constant 1.000000e+00 : f32
    %427 = vector.broadcast %cst_107 : f32 to vector<8x128xf32>
    %428 = arith.addf %427, %426 : vector<8x128xf32>
    %429 = arith.divf %427, %428 : vector<8x128xf32>
    %430 = vector.extract_strided_slice %411 {offsets = [0, 256], sizes = [8, 128], strides = [1, 1]} : vector<8x384xf32> to vector<8x128xf32>
    %431 = vector.extract_strided_slice %413 {offsets = [0, 256], sizes = [8, 128], strides = [1, 1]} : vector<8x384xf32> to vector<8x128xf32>
    %432 = arith.mulf %421, %431 : vector<8x128xf32>
    %433 = arith.addf %430, %432 : vector<8x128xf32>
    %434 = math.tanh %433 : vector<8x128xf32>
    %435 = arith.subf %405, %434 : vector<8x128xf32>
    %436 = arith.mulf %429, %435 : vector<8x128xf32>
    %437 = arith.addf %434, %436 : vector<8x128xf32>
    %438 = arith.index_cast %409 : i32 to index
    %c0_108 = arith.constant 0 : index
    %439 = vector.load %arg14[%438, %c0_108] : memref<64x128xf32, #tpu.memory_space<vmem>>, vector<8x128xf32>
    tpu.vector_store %arg14[%438, %c0_108], %437 {strides = array<i32>} : memref<64x128xf32, #tpu.memory_space<vmem>>, vector<8x128xf32>,
    %c5_i32_109 = arith.constant 5 : i32
    %c8_i32_110 = arith.constant 8 : i32
    %440 = arith.muli %c5_i32_109, %c8_i32_110 : i32
    %441 = tpu.assume_multiple %440, 8 : i32
    %442 = arith.index_cast %441 : i32 to index
    %c0_111 = arith.constant 0 : index
    %443 = vector.load %arg13[%442, %c0_111] : memref<64x384xf32, #tpu.memory_space<vmem>>, vector<8x384xf32>
    %cst_112 = arith.constant dense<0.000000e+00> : vector<8x384xf32>
    %444 = tpu.matmul %437, %269, %cst_112 {dimension_numbers = #tpu.dot_dimension_numbers<[1], [0], [0], [1], [0, 0, 1, 1], [], []>} : vector<8x128xf32>, vector<128x384xf32>, vector<8x384xf32> -> vector<8x384xf32>
    %445 = arith.addf %444, %278 : vector<8x384xf32>
    %446 = vector.extract_strided_slice %443 {offsets = [0, 0], sizes = [8, 128], strides = [1, 1]} : vector<8x384xf32> to vector<8x128xf32>
    %447 = vector.extract_strided_slice %445 {offsets = [0, 0], sizes = [8, 128], strides = [1, 1]} : vector<8x384xf32> to vector<8x128xf32>
    %448 = arith.addf %446, %447 : vector<8x128xf32>
    %449 = arith.negf %448 : vector<8x128xf32>
    %450 = math.exp %449 : vector<8x128xf32>
    %cst_113 = arith.constant 1.000000e+00 : f32
    %451 = vector.broadcast %cst_113 : f32 to vector<8x128xf32>
    %452 = arith.addf %451, %450 : vector<8x128xf32>
    %453 = arith.divf %451, %452 : vector<8x128xf32>
    %454 = vector.extract_strided_slice %443 {offsets = [0, 128], sizes = [8, 128], strides = [1, 1]} : vector<8x384xf32> to vector<8x128xf32>
    %455 = vector.extract_strided_slice %445 {offsets = [0, 128], sizes = [8, 128], strides = [1, 1]} : vector<8x384xf32> to vector<8x128xf32>
    %456 = arith.addf %454, %455 : vector<8x128xf32>
    %457 = arith.negf %456 : vector<8x128xf32>
    %458 = math.exp %457 : vector<8x128xf32>
    %cst_114 = arith.constant 1.000000e+00 : f32
    %459 = vector.broadcast %cst_114 : f32 to vector<8x128xf32>
    %460 = arith.addf %459, %458 : vector<8x128xf32>
    %461 = arith.divf %459, %460 : vector<8x128xf32>
    %462 = vector.extract_strided_slice %443 {offsets = [0, 256], sizes = [8, 128], strides = [1, 1]} : vector<8x384xf32> to vector<8x128xf32>
    %463 = vector.extract_strided_slice %445 {offsets = [0, 256], sizes = [8, 128], strides = [1, 1]} : vector<8x384xf32> to vector<8x128xf32>
    %464 = arith.mulf %453, %463 : vector<8x128xf32>
    %465 = arith.addf %462, %464 : vector<8x128xf32>
    %466 = math.tanh %465 : vector<8x128xf32>
    %467 = arith.subf %437, %466 : vector<8x128xf32>
    %468 = arith.mulf %461, %467 : vector<8x128xf32>
    %469 = arith.addf %466, %468 : vector<8x128xf32>
    %470 = arith.index_cast %441 : i32 to index
    %c0_115 = arith.constant 0 : index
    %471 = vector.load %arg14[%470, %c0_115] : memref<64x128xf32, #tpu.memory_space<vmem>>, vector<8x128xf32>
    tpu.vector_store %arg14[%470, %c0_115], %469 {strides = array<i32>} : memref<64x128xf32, #tpu.memory_space<vmem>>, vector<8x128xf32>,
    %c6_i32_116 = arith.constant 6 : i32
    %c8_i32_117 = arith.constant 8 : i32
    %472 = arith.muli %c6_i32_116, %c8_i32_117 : i32
    %473 = tpu.assume_multiple %472, 8 : i32
    %474 = arith.index_cast %473 : i32 to index
    %c0_118 = arith.constant 0 : index
    %475 = vector.load %arg13[%474, %c0_118] : memref<64x384xf32, #tpu.memory_space<vmem>>, vector<8x384xf32>
    %cst_119 = arith.constant dense<0.000000e+00> : vector<8x384xf32>
    %476 = tpu.matmul %469, %269, %cst_119 {dimension_numbers = #tpu.dot_dimension_numbers<[1], [0], [0], [1], [0, 0, 1, 1], [], []>} : vector<8x128xf32>, vector<128x384xf32>, vector<8x384xf32> -> vector<8x384xf32>
    %477 = arith.addf %476, %278 : vector<8x384xf32>
    %478 = vector.extract_strided_slice %475 {offsets = [0, 0], sizes = [8, 128], strides = [1, 1]} : vector<8x384xf32> to vector<8x128xf32>
    %479 = vector.extract_strided_slice %477 {offsets = [0, 0], sizes = [8, 128], strides = [1, 1]} : vector<8x384xf32> to vector<8x128xf32>
    %480 = arith.addf %478, %479 : vector<8x128xf32>
    %481 = arith.negf %480 : vector<8x128xf32>
    %482 = math.exp %481 : vector<8x128xf32>
    %cst_120 = arith.constant 1.000000e+00 : f32
    %483 = vector.broadcast %cst_120 : f32 to vector<8x128xf32>
    %484 = arith.addf %483, %482 : vector<8x128xf32>
    %485 = arith.divf %483, %484 : vector<8x128xf32>
    %486 = vector.extract_strided_slice %475 {offsets = [0, 128], sizes = [8, 128], strides = [1, 1]} : vector<8x384xf32> to vector<8x128xf32>
    %487 = vector.extract_strided_slice %477 {offsets = [0, 128], sizes = [8, 128], strides = [1, 1]} : vector<8x384xf32> to vector<8x128xf32>
    %488 = arith.addf %486, %487 : vector<8x128xf32>
    %489 = arith.negf %488 : vector<8x128xf32>
    %490 = math.exp %489 : vector<8x128xf32>
    %cst_121 = arith.constant 1.000000e+00 : f32
    %491 = vector.broadcast %cst_121 : f32 to vector<8x128xf32>
    %492 = arith.addf %491, %490 : vector<8x128xf32>
    %493 = arith.divf %491, %492 : vector<8x128xf32>
    %494 = vector.extract_strided_slice %475 {offsets = [0, 256], sizes = [8, 128], strides = [1, 1]} : vector<8x384xf32> to vector<8x128xf32>
    %495 = vector.extract_strided_slice %477 {offsets = [0, 256], sizes = [8, 128], strides = [1, 1]} : vector<8x384xf32> to vector<8x128xf32>
    %496 = arith.mulf %485, %495 : vector<8x128xf32>
    %497 = arith.addf %494, %496 : vector<8x128xf32>
    %498 = math.tanh %497 : vector<8x128xf32>
    %499 = arith.subf %469, %498 : vector<8x128xf32>
    %500 = arith.mulf %493, %499 : vector<8x128xf32>
    %501 = arith.addf %498, %500 : vector<8x128xf32>
    %502 = arith.index_cast %473 : i32 to index
    %c0_122 = arith.constant 0 : index
    %503 = vector.load %arg14[%502, %c0_122] : memref<64x128xf32, #tpu.memory_space<vmem>>, vector<8x128xf32>
    tpu.vector_store %arg14[%502, %c0_122], %501 {strides = array<i32>} : memref<64x128xf32, #tpu.memory_space<vmem>>, vector<8x128xf32>,
    %c7_i32_123 = arith.constant 7 : i32
    %c8_i32_124 = arith.constant 8 : i32
    %504 = arith.muli %c7_i32_123, %c8_i32_124 : i32
    %505 = tpu.assume_multiple %504, 8 : i32
    %506 = arith.index_cast %505 : i32 to index
    %c0_125 = arith.constant 0 : index
    %507 = vector.load %arg13[%506, %c0_125] : memref<64x384xf32, #tpu.memory_space<vmem>>, vector<8x384xf32>
    %cst_126 = arith.constant dense<0.000000e+00> : vector<8x384xf32>
    %508 = tpu.matmul %501, %269, %cst_126 {dimension_numbers = #tpu.dot_dimension_numbers<[1], [0], [0], [1], [0, 0, 1, 1], [], []>} : vector<8x128xf32>, vector<128x384xf32>, vector<8x384xf32> -> vector<8x384xf32>
    %509 = arith.addf %508, %278 : vector<8x384xf32>
    %510 = vector.extract_strided_slice %507 {offsets = [0, 0], sizes = [8, 128], strides = [1, 1]} : vector<8x384xf32> to vector<8x128xf32>
    %511 = vector.extract_strided_slice %509 {offsets = [0, 0], sizes = [8, 128], strides = [1, 1]} : vector<8x384xf32> to vector<8x128xf32>
    %512 = arith.addf %510, %511 : vector<8x128xf32>
    %513 = arith.negf %512 : vector<8x128xf32>
    %514 = math.exp %513 : vector<8x128xf32>
    %cst_127 = arith.constant 1.000000e+00 : f32
    %515 = vector.broadcast %cst_127 : f32 to vector<8x128xf32>
    %516 = arith.addf %515, %514 : vector<8x128xf32>
    %517 = arith.divf %515, %516 : vector<8x128xf32>
    %518 = vector.extract_strided_slice %507 {offsets = [0, 128], sizes = [8, 128], strides = [1, 1]} : vector<8x384xf32> to vector<8x128xf32>
    %519 = vector.extract_strided_slice %509 {offsets = [0, 128], sizes = [8, 128], strides = [1, 1]} : vector<8x384xf32> to vector<8x128xf32>
    %520 = arith.addf %518, %519 : vector<8x128xf32>
    %521 = arith.negf %520 : vector<8x128xf32>
    %522 = math.exp %521 : vector<8x128xf32>
    %cst_128 = arith.constant 1.000000e+00 : f32
    %523 = vector.broadcast %cst_128 : f32 to vector<8x128xf32>
    %524 = arith.addf %523, %522 : vector<8x128xf32>
    %525 = arith.divf %523, %524 : vector<8x128xf32>
    %526 = vector.extract_strided_slice %507 {offsets = [0, 256], sizes = [8, 128], strides = [1, 1]} : vector<8x384xf32> to vector<8x128xf32>
    %527 = vector.extract_strided_slice %509 {offsets = [0, 256], sizes = [8, 128], strides = [1, 1]} : vector<8x384xf32> to vector<8x128xf32>
    %528 = arith.mulf %517, %527 : vector<8x128xf32>
    %529 = arith.addf %526, %528 : vector<8x128xf32>
    %530 = math.tanh %529 : vector<8x128xf32>
    %531 = arith.subf %501, %530 : vector<8x128xf32>
    %532 = arith.mulf %525, %531 : vector<8x128xf32>
    %533 = arith.addf %530, %532 : vector<8x128xf32>
    %534 = arith.index_cast %505 : i32 to index
    %c0_129 = arith.constant 0 : index
    %535 = vector.load %arg14[%534, %c0_129] : memref<64x128xf32, #tpu.memory_space<vmem>>, vector<8x128xf32>
    tpu.vector_store %arg14[%534, %c0_129], %533 {strides = array<i32>} : memref<64x128xf32, #tpu.memory_space<vmem>>, vector<8x128xf32>,
    %c8_i32_130 = arith.constant 8 : i32
    %c0_131 = arith.constant 0 : index
    %c0_132 = arith.constant 0 : index
    %536 = vector.load %arg14[%c0_131, %c0_132] : memref<64x128xf32, #tpu.memory_space<vmem>>, vector<64x128xf32>
    %c0_133 = arith.constant 0 : index
    %c0_134 = arith.constant 0 : index
    %537 = vector.load %arg10[%c0_133, %c0_134] : memref<128x128xf32, #tpu.memory_space<vmem>>, vector<128x128xf32>
    %cst_135 = arith.constant dense<0.000000e+00> : vector<64x128xf32>
    %538 = tpu.matmul %536, %537, %cst_135 {dimension_numbers = #tpu.dot_dimension_numbers<[1], [0], [0], [1], [0, 0, 1, 1], [], []>} : vector<64x128xf32>, vector<128x128xf32>, vector<64x128xf32> -> vector<64x128xf32>
    %c0_136 = arith.constant 0 : index
    %c0_137 = arith.constant 0 : index
    %539 = vector.load %arg11[%c0_136, %c0_137] : memref<1x128xf32, #tpu.memory_space<vmem>>, vector<1x128xf32>
    %540 = vector.broadcast %539 : vector<1x128xf32> to vector<64x128xf32>
    %541 = arith.addf %538, %540 : vector<64x128xf32>
    %c0_138 = arith.constant 0 : index
    %c0_139 = arith.constant 0 : index
    %542 = vector.load %arg12[%c0_138, %c0_139] : memref<64x128xf32, #tpu.memory_space<vmem>>, vector<64x128xf32>
    tpu.vector_store %arg12[%c0_138, %c0_139], %541 {strides = array<i32>} : memref<64x128xf32, #tpu.memory_space<vmem>>, vector<64x128xf32>,
    return
  }
  func.func @transform_0(%arg0: i32) -> (i32, i32) {
    %c0_i32 = arith.constant 0 : i32
    %c0_i32_0 = arith.constant 0 : i32
    %c0_i32_1 = arith.constant 0 : i32
    return %c0_i32, %c0_i32_0 : i32, i32
  }
  func.func @transform_1(%arg0: i32) -> (i32, i32) {
    %c0_i32 = arith.constant 0 : i32
    %c0_i32_0 = arith.constant 0 : i32
    %c0_i32_1 = arith.constant 0 : i32
    return %c0_i32, %c0_i32_0 : i32, i32
  }
  func.func @transform_2(%arg0: i32) -> (i32, i32) {
    %c0_i32 = arith.constant 0 : i32
    %c0_i32_0 = arith.constant 0 : i32
    %c0_i32_1 = arith.constant 0 : i32
    return %c0_i32, %c0_i32_0 : i32, i32
  }
  func.func @transform_3(%arg0: i32) -> (i32, i32) {
    %c0_i32 = arith.constant 0 : i32
    %c0_i32_0 = arith.constant 0 : i32
    %c0_i32_1 = arith.constant 0 : i32
    return %c0_i32, %c0_i32_0 : i32, i32
  }
  func.func @transform_4(%arg0: i32) -> (i32, i32) {
    %c0_i32 = arith.constant 0 : i32
    %c0_i32_0 = arith.constant 0 : i32
    %c0_i32_1 = arith.constant 0 : i32
    return %c0_i32, %c0_i32_0 : i32, i32
  }
  func.func @transform_5(%arg0: i32) -> (i32, i32) {
    %c0_i32 = arith.constant 0 : i32
    %c0_i32_0 = arith.constant 0 : i32
    %c0_i32_1 = arith.constant 0 : i32
    return %c0_i32, %c0_i32_0 : i32, i32
  }
  func.func @transform_6(%arg0: i32) -> (i32, i32) {
    %c0_i32 = arith.constant 0 : i32
    %c0_i32_0 = arith.constant 0 : i32
    %c0_i32_1 = arith.constant 0 : i32
    return %c0_i32, %c0_i32_0 : i32, i32
  }
  func.func @transform_7(%arg0: i32) -> (i32, i32) {
    %c0_i32 = arith.constant 0 : i32
    %c0_i32_0 = arith.constant 0 : i32
    %c0_i32_1 = arith.constant 0 : i32
    return %c0_i32, %c0_i32_0 : i32, i32
  }
  func.func @transform_8(%arg0: i32) -> (i32, i32) {
    %c0_i32 = arith.constant 0 : i32
    %c0_i32_0 = arith.constant 0 : i32
    %c0_i32_1 = arith.constant 0 : i32
    return %c0_i32, %c0_i32_0 : i32, i32
  }
  func.func @transform_9(%arg0: i32) -> (i32, i32) {
    %c0_i32 = arith.constant 0 : i32
    %c0_i32_0 = arith.constant 0 : i32
    %c0_i32_1 = arith.constant 0 : i32
    return %c0_i32, %c0_i32_0 : i32, i32
  }
  func.func @transform_10(%arg0: i32) -> (i32, i32) {
    %c0_i32 = arith.constant 0 : i32
    %c0_i32_0 = arith.constant 0 : i32
    %c0_i32_1 = arith.constant 0 : i32
    return %c0_i32, %c0_i32_0 : i32, i32
  }
  func.func @transform_11(%arg0: i32) -> (i32, i32) {
    %c0_i32 = arith.constant 0 : i32
    %c0_i32_0 = arith.constant 0 : i32
    %c0_i32_1 = arith.constant 0 : i32
    return %c0_i32, %c0_i32_0 : i32, i32
  }
}

</mosaic_0001>

<bundles_post_ra>
// kernel: tpu_custom_call.1
= control target key start
LH: loop header
LB: loop body
LE: loop exit
PB: predicated region body
PF: predicated region fallthrough
CT: control target
= control target key end

     0   :  { %16 = vsyncpa [#allocation5], 0  ;;  %s7526_s0 = inlined_call_operand.vmem [shape: f32[64,32], index: 0, kind: input, shape index: {}]   ;;  %s7527_s1 = inlined_call_operand.hbm [shape: f32[32,384], index: 1, kind: input, shape index: {}]   ;;  %s7528_s2 = inlined_call_operand.hbm [shape: f32[128,384], index: 2, kind: input, shape index: {}]   ;;  %s7529_s3 = inlined_call_operand.hbm [shape: f32[1,384], index: 3, kind: input, shape index: {}]   ;;  %s7530_s4 = inlined_call_operand.hbm [shape: f32[1,384], index: 4, kind: input, shape index: {}]   ;;  %s7531_s5 = inlined_call_operand.hbm [shape: f32[128,384], index: 5, kind: input, shape index: {}]   ;;  %s7532_s6 = inlined_call_operand.hbm [shape: f32[128,384], index: 6, kind: input, shape index: {}]   ;;  %s7533_s7 = inlined_call_operand.hbm [shape: f32[1,384], index: 7, kind: input, shape index: {}]   ;;  %s7534_s8 = inlined_call_operand.hbm [shape: f32[1,384], index: 8, kind: input, shape index: {}]   ;;  %s7535_s9 = inlined_call_operand.vmem [shape: f32[128,128], index: 9, kind: input, shape index: {}]   ;;  %s7536_s10 = inlined_call_operand.vmem [shape: f32[1,128], index: 10, kind: input, shape index: {}]   ;;  %s7537_s11 = inlined_call_operand.hbm [shape: f32[64,128], index: 11, kind: output, shape index: {}]  }
   0x1   :  { %17 = vsyncpa [#allocation8], 0 }
   0x2   :  { %18 = vsyncpa [#allocation11], 0 }
   0x3   :  { %19 = vsyncpa [#allocation14], 0 }
   0x4   :  { %20 = vsyncpa [#allocation17], 0 }
   0x5   :  { %21 = vsyncpa [#allocation6], 0  ;;  %s6271_s17 = smov [#allocation7]   ;;  %s6272_s19 = smov [#allocation10]  }
   0x6   :  { %s41_s18 = sshll.u32 %s6271_s17, 4  ;;  %s64_s20 = sshll.u32 %s6272_s19, 4  ;;  %s42_s18 = int_to_ptr.vmem [resolvable:$true] %s41_s18  ;;  %s6347_s20 = int_to_ptr.vmem [resolvable:$true] %s64_s20 }
   0x7   :  { %s6061_s23 = scalar_lea.hbm %s7528_s2, 6144 }
   0x8   :  { %p6062_p0 = scmp.ne.s32.totalorder %s7528_s2, %s6061_s23  ;;  %p6065_p1 = scmp.lt.u32.totalorder %s6061_s23, %s7528_s2 }
   0xa   :  { %p6067_p2 = pnand %p6065_p1, %p6062_p0 }
   0xc   :  { %6070 = shalt.err (!%p6067_p2)
}
   0xd   :  { %s6071_s28 = scalar_lea.vmem %s42_s18, 6144  ;;  %p6076_p4 = scmp.lt.s32.totalorder %s42_s18, %s42_s18 }
   0xe   :  { %p6072_p3 = scmp.ne.s32.totalorder %s42_s18, %s6071_s28  ;;  %p6077_p5 = scmp.lt.s32.totalorder %s6071_s28, %s6071_s28 }
  0x10   :  { %p6078_p6 = por %p6077_p5, %p6076_p4 }
  0x12   :  { %p6079_p7 = pnand %p6078_p6, %p6072_p3 }
  0x14   :  { %6082 = shalt.err (!%p6079_p7)
}
  0x15   :  { %s6273_s29 = smov 384   ;;  %s6274_s30 = smov 24  }
  0x16   :  { %47 = dma.hbm_to_vmem [thread:$0]  %s7528_s2, 6144, %s42_s18, [#allocation8], %s6273_s29, %s6273_s29, %s6274_s30  }
  0x17   :  { %s6083_s16 = scalar_lea.hbm %s7530_s4, 48 }
  0x18   :  { %p6084_p8 = scmp.ne.s32.totalorder %s7530_s4, %s6083_s16  ;;  %p6087_p9 = scmp.lt.u32.totalorder %s6083_s16, %s7530_s4 }
  0x1a   :  { %p6089_p10 = pnand %p6087_p9, %p6084_p8 }
  0x1c   :  { %6092 = shalt.err (!%p6089_p10)
}
  0x1d   :  { %s6093_s23 = scalar_lea.vmem %s6347_s20, 48  ;;  %s6097_s2 = scalar_lea.vmem %s6347_s20, 64 }
  0x1e   :  { %p6094_p11 = scmp.ne.s32.totalorder %s6347_s20, %s6093_s23  ;;  %p6098_p12 = scmp.lt.s32.totalorder %s6347_s20, %s6347_s20 }
  0x1f   :  { %p6099_p13 = scmp.lt.s32.totalorder %s6097_s2, %s6093_s23 }
  0x21   :  { %p6100_p0 = por %p6099_p13, %p6098_p12 }
  0x23   :  { %p6101_p1 = pnand %p6100_p0, %p6094_p11 }
  0x25   :  { %6104 = shalt.err (!%p6101_p1)
}
  0x26   :  { %67 = dma.hbm_to_vmem [thread:$0]  %s7530_s4, 48, %s6347_s20, [#allocation11]  }
  0x27   :  { %s6275_s25 = smov [#allocation13]   ;;  %s6276_s27 = smov [#allocation4]  }
  0x28   :  { %s85_s26 = sshll.u32 %s6275_s25, 4  ;;  %s29_s28 = sshll.u32 %s6276_s27, 4  ;;  %s86_s26 = int_to_ptr.vmem [resolvable:$true] %s85_s26  ;;  %s6382_s28 = int_to_ptr.vmem [resolvable:$true] %s29_s28 }
  0x29   :  { %s6105_s14 = scalar_lea.hbm %s7532_s6, 6144 }
  0x2a   :  { %p6106_p2 = scmp.ne.s32.totalorder %s7532_s6, %s6105_s14  ;;  %p6109_p3 = scmp.lt.u32.totalorder %s6105_s14, %s7532_s6 }
  0x2c   :  { %p6111_p4 = pnand %p6109_p3, %p6106_p2 }
  0x2e   :  { %6114 = shalt.err (!%p6111_p4)
}
  0x2f   :  { %s6115_s4 = scalar_lea.vmem %s86_s26, 6144  ;;  %p6120_p6 = scmp.lt.s32.totalorder %s86_s26, %s86_s26 }
  0x30   :  { %p6116_p5 = scmp.ne.s32.totalorder %s86_s26, %s6115_s4  ;;  %p6121_p7 = scmp.lt.s32.totalorder %s6115_s4, %s6115_s4 }
  0x32   :  { %p6122_p8 = por %p6121_p7, %p6120_p6 }
  0x34   :  { %p6123_p9 = pnand %p6122_p8, %p6116_p5 }
  0x36   :  { %6126 = shalt.err (!%p6123_p9)
}
  0x37   :  { %91 = dma.hbm_to_vmem [thread:$0]  %s7532_s6, 6144, %s86_s26, [#allocation14], %s6273_s29, %s6273_s29, %s6274_s30  }
  0x38   :  { %s6127_s2 = scalar_lea.hbm %s7527_s1, 1536 }
  0x39   :  { %p6128_p10 = scmp.ne.s32.totalorder %s7527_s1, %s6127_s2  ;;  %p6131_p11 = scmp.lt.u32.totalorder %s6127_s2, %s7527_s1 }
  0x3b   :  { %p6133_p12 = pnand %p6131_p11, %p6128_p10 }
  0x3d   :  { %6136 = shalt.err (!%p6133_p12)
}
  0x3e   :  { %s6137_s12 = scalar_lea.vmem %s6382_s28, 1536  ;;  %p6142_p0 = scmp.lt.s32.totalorder %s6382_s28, %s6382_s28 }
  0x3f   :  { %p6138_p13 = scmp.ne.s32.totalorder %s6382_s28, %s6137_s12  ;;  %p6143_p1 = scmp.lt.s32.totalorder %s6137_s12, %s6137_s12 }
  0x41   :  { %p6144_p2 = por %p6143_p1, %p6142_p0 }
  0x43   :  { %p6145_p3 = pnand %p6144_p2, %p6138_p13 }
  0x45   :  { %6148 = shalt.err (!%p6145_p3)
}
  0x46   :  { %35 = dma.hbm_to_vmem [thread:$0]  %s7527_s1, 1536, %s6382_s28, [#allocation5], %s6273_s29, %s6273_s29, %s6274_s30  }
  0x47   :  { %s6277_s13 = smov [#allocation9]   ;;  %s6278_s15 = smov [#allocation12]  }
  0x48   :  { %s54_s14 = sshll.u32 %s6277_s13, 4  ;;  %s73_s16 = sshll.u32 %s6278_s15, 4  ;;  %s55_s14 = int_to_ptr.vmem [resolvable:$true] %s54_s14  ;;  %s6419_s16 = int_to_ptr.vmem [resolvable:$true] %s73_s16 }
  0x49   :  { %s6149_s4 = scalar_lea.hbm %s7529_s3, 48 }
  0x4a   :  { %p6150_p4 = scmp.ne.s32.totalorder %s7529_s3, %s6149_s4  ;;  %p6153_p5 = scmp.lt.u32.totalorder %s6149_s4, %s7529_s3 }
  0x4c   :  { %p6155_p6 = pnand %p6153_p5, %p6150_p4 }
  0x4e   :  { %6158 = shalt.err (!%p6155_p6)
}
  0x4f   :  { %s6159_s1 = scalar_lea.vmem %s55_s14, 48  ;;  %s6163_s28 = scalar_lea.vmem %s55_s14, 64 }
  0x50   :  { %p6160_p7 = scmp.ne.s32.totalorder %s55_s14, %s6159_s1  ;;  %p6164_p8 = scmp.lt.s32.totalorder %s55_s14, %s55_s14 }
  0x51   :  { %p6165_p9 = scmp.lt.s32.totalorder %s6163_s28, %s6159_s1 }
  0x53   :  { %p6166_p10 = por %p6165_p9, %p6164_p8 }
  0x55   :  { %p6167_p11 = pnand %p6166_p10, %p6160_p7 }
  0x57   :  { %6170 = shalt.err (!%p6167_p11)
}
  0x58   :  { %57 = dma.hbm_to_vmem [thread:$0]  %s7529_s3, 48, %s55_s14, [#allocation8]  }
  0x59   :  { %s6171_s27 = scalar_lea.hbm %s7531_s5, 6144 }
  0x5a   :  { %p6172_p12 = scmp.ne.s32.totalorder %s7531_s5, %s6171_s27  ;;  %p6175_p13 = scmp.lt.u32.totalorder %s6171_s27, %s7531_s5 }
  0x5c   :  { %p6177_p0 = pnand %p6175_p13, %p6172_p12 }
  0x5e   :  { %6180 = shalt.err (!%p6177_p0)
}
  0x5f   :  { %s6181_s15 = scalar_lea.vmem %s6419_s16, 6144  ;;  %p6186_p2 = scmp.lt.s32.totalorder %s6419_s16, %s6419_s16 }
  0x60   :  { %p6182_p1 = scmp.ne.s32.totalorder %s6419_s16, %s6181_s15  ;;  %p6187_p3 = scmp.lt.s32.totalorder %s6181_s15, %s6181_s15 }
  0x62   :  { %p6188_p4 = por %p6187_p3, %p6186_p2 }
  0x64   :  { %p6189_p5 = pnand %p6188_p4, %p6182_p1 }
  0x66   :  { %6192 = shalt.err (!%p6189_p5)
}
  0x67   :  { %79 = dma.hbm_to_vmem [thread:$0]  %s7531_s5, 6144, %s6419_s16, [#allocation11], %s6273_s29, %s6273_s29, %s6274_s30  }
  0x68   :  { %s6279_s17 = smov [#allocation15]   ;;  %s6280_s4 = smov [#allocation16]  }
  0x69   :  { %s98_s19 = sshll.u32 %s6279_s17, 4  ;;  %s108_s20 = sshll.u32 %s6280_s4, 4  ;;  %s99_s19 = int_to_ptr.vmem [resolvable:$true] %s98_s19  ;;  %s109_s20 = int_to_ptr.vmem [resolvable:$true] %s108_s20 }
  0x6a   :  { %s6193_s23 = scalar_lea.hbm %s7533_s7, 48 }
  0x6b   :  { %p6194_p6 = scmp.ne.s32.totalorder %s7533_s7, %s6193_s23  ;;  %p6197_p7 = scmp.lt.u32.totalorder %s6193_s23, %s7533_s7 }
  0x6d   :  { %p6199_p8 = pnand %p6197_p7, %p6194_p6 }
  0x6f   :  { %6202 = shalt.err (!%p6199_p8)
}
  0x70   :  { %s6203_s5 = scalar_lea.vmem %s99_s19, 48  ;;  %s6207_s29 = scalar_lea.vmem %s99_s19, 64 }
  0x71   :  { %p6204_p9 = scmp.ne.s32.totalorder %s99_s19, %s6203_s5  ;;  %p6208_p10 = scmp.lt.s32.totalorder %s99_s19, %s99_s19 }
  0x72   :  { %p6209_p11 = scmp.lt.s32.totalorder %s6207_s29, %s6203_s5 }
  0x74   :  { %p6210_p12 = por %p6209_p11, %p6208_p10 }
  0x76   :  { %p6211_p13 = pnand %p6210_p12, %p6204_p9 }
  0x78   :  { %6214 = shalt.err (!%p6211_p13)
}
  0x79   :  { %101 = dma.hbm_to_vmem [thread:$0]  %s7533_s7, 48, %s99_s19, [#allocation14]  }
  0x7a   :  { %s6215_s27 = scalar_lea.hbm %s7534_s8, 48 }
  0x7b   :  { %p6216_p0 = scmp.ne.s32.totalorder %s7534_s8, %s6215_s27  ;;  %p6219_p1 = scmp.lt.u32.totalorder %s6215_s27, %s7534_s8 }
  0x7d   :  { %p6221_p2 = pnand %p6219_p1, %p6216_p0 }
  0x7f   :  { %6224 = shalt.err (!%p6221_p2)
}
  0x80   :  { %s6225_s15 = scalar_lea.vmem %s109_s20, 48  ;;  %s6229_s3 = scalar_lea.vmem %s109_s20, 64 }
  0x81   :  { %p6226_p3 = scmp.ne.s32.totalorder %s109_s20, %s6225_s15  ;;  %p6230_p4 = scmp.lt.s32.totalorder %s109_s20, %s109_s20 }
  0x82   :  { %p6231_p5 = scmp.lt.s32.totalorder %s6229_s3, %s6225_s15 }
  0x84   :  { %p6232_p6 = por %p6231_p5, %p6230_p4 }
  0x86   :  { %p6233_p7 = pnand %p6232_p6, %p6226_p3 }
  0x88   :  { %6236 = shalt.err (!%p6233_p7)
}
  0x89   :  { %111 = dma.hbm_to_vmem [thread:$0]  %s7534_s8, 48, %s109_s20, [#allocation17]  }
  0x8a   :  { %6259 = dma.done.wait [#allocation5], 1536  }
  0x8b   :  { %6260 = vsyncadd [#allocation5], 4294965760 }
  0x8c   :  { %6261 = dma.done.wait [#allocation8], 6192  }
  0x8d   :  { %6262 = vsyncadd [#allocation8], 4294961104 }
  0x8e   :  { %6263 = dma.done.wait [#allocation11], 6192  }
  0x8f   :  { %6264 = vsyncadd [#allocation11], 4294961104 }
  0x90   :  { %6265 = dma.done.wait [#allocation14], 6192  }
  0x91   :  { %6266 = vsyncadd [#allocation14], 4294961104 }
  0x92   :  { %6267 = dma.done.wait [#allocation17], 48  }
  0x93   :  { %6268 = vsyncadd [#allocation17], 4294967248  ;;  %v6281_v0 = vmov 0.0   ;;  %vm226_vm0 = vcmask 261120   ;;  %v142_v1 = vld [vmem:[#allocation4 + $0x10] sm:$0xff]  ;;  %v145_v2 = vld [vmem:[#allocation4 + $0x28] sm:$0xff] }
  0x94   :  { %315 = vmatprep.mubr.f32.mxu0 %v6281_v0  ;;  %v148_v3 = vld [vmem:[#allocation4 + $0x40] sm:$0xff]  ;;  %v4789_v4 = vpack.c.bf16 %v145_v2, %v142_v1  ;;  %v151_v5 = vld [vmem:[#allocation4 + $0x58] sm:$0xff]  ;;  %v153_v8 = vld [vmem:[#allocation7 + $0x8] sm:$0xff]  ;;  %vm6283_vm1 = vmmov 0  }
  0x95   :  { %v6481_v6 = vld [vmem:[%s7526_s0] sm:$0xff]  ;;  %v4793_v7 = vpack.c.bf16 %v151_v5, %v148_v3  ;;  %v155_v12 = vld [vmem:[#allocation7 + $0x18] sm:$0xff]  ;;  %v162_v14 = vld [vmem:[#allocation7 + $0x50] sm:$0xff] }
  0x96   :  { %4121 = vmatprep.mubr.msk.f32.mxu1 %vm226_vm0, %v6481_v6  ;;  %v156_v9 = vld [vmem:[#allocation7 + $0x20] sm:$0xff]  ;;  %4790 = vmatprep.subr.bf16.mxu1 %v4789_v4  ;;  %v159_v13 = vld [vmem:[#allocation7 + $0x38] sm:$0xff]  ;;  %v6490_v15 = vld [vmem:[%s7526_s0 + $0x8] sm:$0xff] }
  0x97   :  { %4792 = vmatpush3.bf16.msra.mxu1 %v4789_v4  ;;  %v6485_v10 = vpack.c.bf16 %v156_v9, %v153_v8  ;;  %v152_v11 = vld [vmem:[#allocation7] sm:$0xff]  ;;  %v158_v17 = vld [vmem:[#allocation7 + $0x30] sm:$0xff]  ;;  %v161_v18 = vld [vmem:[#allocation7 + $0x48] sm:$0xff]  ;;  %v6495_v19 = vpack.c.bf16 %v162_v14, %v159_v13 }
  0x98   :  { %4794 = vmatprep.subr.bf16.mxu1 %v4793_v7  ;;  %v6492_v16 = vpack.c.bf16 %v155_v12, %v152_v11  ;;  %v6500_v20 = vld [vmem:[%s7526_s0 + $0x10] sm:$0xff]  ;;  %v141_v21 = vld [vmem:[#allocation4 + $0x8] sm:$0xff]  ;;  %v144_v22 = vld [vmem:[#allocation4 + $0x20] sm:$0xff]  ;;  %v6505_v29 = vpack.c.bf16 %v161_v18, %v158_v17  ;;  %v6282_v17 = vmov 0.0|0.0  }
  0x99   :  { %v165_v23 = vld [vmem:[#allocation7 + $0x68] sm:$0xff]  ;;  %v168_v24 = vld [vmem:[#allocation7 + $0x80] sm:$0xff]  ;;  %v4781_v25 = vpack.c.bf16 %v144_v22, %v141_v21  ;;  %v143_v28 = vld [vmem:[#allocation4 + $0x18] sm:$0xff] }
  0x9a   :  { %v140_v26 = vld [vmem:[#allocation4] sm:$0xff]  ;;  %v6512_v30 = vld [vmem:[%s7526_s0 + $0x18] sm:$0xff]  ;;  %v150_v33 = vld [vmem:[#allocation4 + $0x50] sm:$0xff]  ;;  %v6515_v34 = vpack.c.bf16 %v168_v24, %v165_v23 }
  0x9b   :  { %4796 = vmatpush3.bf16.msra.mxu1 %v4793_v7  ;;  %v164_v27 = vld [vmem:[#allocation7 + $0x60] sm:$0xff]  ;;  %v4783_v31 = vpack.c.bf16 %v143_v28, %v140_v26  ;;  %v147_v32 = vld [vmem:[#allocation4 + $0x38] sm:$0xff]  ;;  %4782 = vmatprep.subr.bf16.mxu0 %v4781_v25  ;;  %v174_v39 = vld [vmem:[#allocation7 + $0xb0] sm:$0xff] }
  0x9c   :  { %4798 = vmatprep.subr.bf16.mxu1 %v6485_v10  ;;  %v167_v35 = vld [vmem:[#allocation7 + $0x78] sm:$0xff]  ;;  %v6520_v37 = vld [vmem:[%s7526_s0 + $0x20] sm:$0xff]  ;;  %v4785_v38 = vpack.c.bf16 %v150_v33, %v147_v32  ;;  %v146_v40 = vld [vmem:[#allocation4 + $0x30] sm:$0xff] }
  0x9d   :  { %v171_v36 = vld [vmem:[#allocation7 + $0x98] sm:$0xff]  ;;  %4784 = vmatpush1.bf16.msra.mxu0 %v4783_v31  ;;  %v149_v41 = vld [vmem:[#allocation4 + $0x48] sm:$0xff]  ;;  %v6525_v43 = vpack.c.bf16 %v167_v35, %v164_v27  ;;  %v170_v46 = vld [vmem:[#allocation7 + $0x90] sm:$0xff] }
  0x9e   :  { %4122 = vmatmul.mubr.msk.f32.vlgmr.msra.gmra.mrb[0].mxu1 %vm226_vm0, %v6490_v15  ;;  %4786 = vmatprep.subr.bf16.mxu0 %v4785_v38  ;;  %v4787_v42 = vpack.c.bf16 %v149_v41, %v146_v40  ;;  %v6532_v44 = vld [vmem:[%s7526_s0 + $0x28] sm:$0xff]  ;;  %v6535_v45 = vpack.c.bf16 %v174_v39, %v171_v36  ;;  %v6540_v48 = vld [vmem:[%s7526_s0 + $0x30] sm:$0xff]  ;;  %v180_v50 = vld [vmem:[#allocation7 + $0xe0] sm:$0xff] }
  0x9f   :  { %4800 = vmatpush1.bf16.msra.mxu1 %v6492_v16  ;;  %4124 = vmatprep.mubr.msk.f32.mxu1 %vm226_vm0, %v6500_v20  ;;  %v173_v47 = vld [vmem:[#allocation7 + $0xa8] sm:$0xff]  ;;  %v6553_v52 = vld [vmem:[%s7526_s0 + $0x38] sm:$0xff]  ;;  %v176_v54 = vld [vmem:[#allocation7 + $0xc0] sm:$0xff] }
  0xa0   :  { %4802 = vmatprep.subr.bf16.mxu1 %v6495_v19  ;;  %v177_v49 = vld [vmem:[#allocation7 + $0xc8] sm:$0xff]  ;;  %v6546_v51 = vpack.c.bf16 %v173_v47, %v170_v46  ;;  %v179_v55 = vld [vmem:[#allocation7 + $0xd8] sm:$0xff]  ;;  %v186_v57 = vld [vmem:[#allocation7 + $0x110] sm:$0xff] }
  0xa1   :  { %4788 = vmatpush1.bf16.msra.mxu0 %v4787_v42  ;;  %v6556_v53 = vpack.c.bf16 %v180_v50, %v177_v49  ;;  %v183_v56 = vld [vmem:[#allocation7 + $0xf8] sm:$0xff]  ;;  %v6566_v58 = vpack.c.bf16 %v179_v55, %v176_v54  ;;  %v182_v60 = vld [vmem:[#allocation7 + $0xf0] sm:$0xff]  ;;  %v185_v61 = vld [vmem:[#allocation7 + $0x108] sm:$0xff]  ;;  %v211_v42 = vlaneseq }
  0xa2   :  { %4125 = vmatmul.mubr.msk.f32.gmra.mrb[2].mxu1 %vm226_vm0, %v6512_v30  ;;  %4854 = vmatprep.subr.bf16.mxu0 %v6485_v10  ;;  %v6570_v59 = vpack.c.bf16 %v186_v57, %v183_v56  ;;  %v189_v62 = vld [vmem:[#allocation7 + $0x128] sm:$0xff]  ;;  %v192_v63 = vld [vmem:[#allocation7 + $0x140] sm:$0xff]  ;;  %v6578_v1 = vpack.c.bf16 %v185_v61, %v182_v60  ;;  %v191_v4 = vld [vmem:[#allocation7 + $0x138] sm:$0xff] }
  0xa3   :  { %4804 = vmatpush1.bf16.msra.mxu1 %v6505_v29  ;;  %4127 = vmatprep.mubr.msk.f32.mxu1 %vm226_vm0, %v6520_v37  ;;  %v6581_v2 = vpack.c.bf16 %v192_v63, %v189_v62  ;;  %v188_v3 = vld [vmem:[#allocation7 + $0x120] sm:$0xff]  ;;  %v195_v5 = vld [vmem:[#allocation7 + $0x158] sm:$0xff]  ;;  %v194_v9 = vld [vmem:[#allocation7 + $0x150] sm:$0xff] }
  0xa4   :  { %4806 = vmatprep.subr.bf16.mxu1 %v6515_v34  ;;  %3732 = vmatmul.mubr.msk.f32.vlgmr.msra.gmra.mrb[0].mxu0 %vm226_vm0, %v6481_v6  ;;  %v198_v6 = vld [vmem:[#allocation7 + $0x170] sm:$0xff]  ;;  %v6589_v7 = vpack.c.bf16 %v191_v4, %v188_v3  ;;  %v197_v11 = vld [vmem:[#allocation7 + $0x168] sm:$0xff]  ;;  %v160_v18 = vld [vmem:[#allocation7 + $0x40] sm:$0xff] }
  0xa5   :  { %4856 = vmatpush1.bf16.msra.mxu0 %v6492_v16  ;;  %321 = vmatprep.mubr.f32.mxu0 %v6281_v0  ;;  %v6592_v8 = vpack.c.bf16 %v198_v6, %v195_v5  ;;  %v6600_v12 = vpack.c.bf16 %v197_v11, %v194_v9  ;;  %v154_v13 = vld [vmem:[#allocation7 + $0x10] sm:$0xff]  ;;  %v157_v14 = vld [vmem:[#allocation7 + $0x28] sm:$0xff]  ;;  %v172_v25 = vld [vmem:[#allocation7 + $0xa0] sm:$0xff] }
  0xa6   :  { %4128 = vmatmul.mubr.msk.f32.gmra.mrb[4].mxu1 %vm226_vm0, %v6532_v44  ;;  %4858 = vmatprep.subr.bf16.mxu0 %v6495_v19  ;;  %v166_v22 = vld [vmem:[#allocation7 + $0x70] sm:$0xff]  ;;  %v169_v23 = vld [vmem:[#allocation7 + $0x88] sm:$0xff]  ;;  %v175_v26 = vld [vmem:[#allocation7 + $0xb8] sm:$0xff] }
  0xa7   :  { %4808 = vmatpush1.bf16.msra.mxu1 %v6525_v43  ;;  %4130 = vmatprep.mubr.msk.f32.mxu1 %vm226_vm0, %v6540_v48  ;;  %v6630_v24 = vpack.c.bf16 %v169_v23, %v166_v22  ;;  %v6639_v27 = vpack.c.bf16 %v175_v26, %v172_v25  ;;  %v178_v28 = vld [vmem:[#allocation7 + $0xd0] sm:$0xff]  ;;  %v184_v32 = vld [vmem:[#allocation7 + $0x100] sm:$0xff]  ;;  %v187_v33 = vld [vmem:[#allocation7 + $0x118] sm:$0xff] }
  0xa8   :  { %4810 = vmatprep.subr.bf16.mxu1 %v6535_v45  ;;  %3733 = vmatmul.mubr.msk.f32.gmra.mrb[2].mxu0 %vm226_vm0, %v6490_v15  ;;  %v6609_v15 = vpack.c.bf16 %v157_v14, %v154_v13  ;;  %v6647_v35 = vpack.c.bf16 %v187_v33, %v184_v32  ;;  %v190_v36 = vld [vmem:[#allocation7 + $0x130] sm:$0xff]  ;;  %v196_v39 = vld [vmem:[#allocation7 + $0x160] sm:$0xff]  ;;  %v199_v40 = vld [vmem:[#allocation7 + $0x178] sm:$0xff] }
  0xa9   :  { %4860 = vmatpush1.bf16.msra.mxu0 %v6505_v29  ;;  %327 = vmatprep.mubr.f32.mxu0 %v6281_v0  ;;  %v6655_v41 = vpack.c.bf16 %v199_v40, %v196_v39  ;;  %v200_v47 = vld [vmem:[#allocation9] sm:$0x7] }
  0xaa   :  { %4131 = vmatmul.mubr.msk.f32.gmra.mrb[6].mxu1 %vm226_vm0, %v6553_v52  ;;  %4862 = vmatprep.subr.bf16.mxu0 %v6515_v34 }
  0xab   :  { %4812 = vmatpush1.bf16.msra.mxu1 %v6546_v51  ;;  %579 = vmatprep.mubr.f32.mxu1 %v6281_v0 }
  0xac   :  { %4814 = vmatprep.subr.bf16.mxu1 %v6556_v53  ;;  %3734 = vmatmul.mubr.msk.f32.gmra.mrb[4].mxu0 %vm226_vm0, %v6500_v20  ;;  %v163_v20 = vld [vmem:[#allocation7 + $0x58] sm:$0xff] }
  0xad   :  { %4864 = vmatpush1.bf16.msra.mxu0 %v6525_v43  ;;  %333 = vmatprep.mubr.f32.mxu0 %v6281_v0  ;;  %v6619_v21 = vpack.c.bf16 %v163_v20, %v160_v18  ;;  %v201_v20 = vld [vmem:[#allocation10] sm:$0x7] }
  0xae   :  { %4866 = vmatprep.subr.bf16.mxu0 %v6535_v45 }
  0xaf   :  { %4816 = vmatpush1.bf16.msra.mxu1 %v6566_v58 }
  0xb0   :  { %4818 = vmatprep.subr.bf16.mxu1 %v6570_v59  ;;  %3735 = vmatmul.mubr.msk.f32.gmra.mrb[6].mxu0 %vm226_vm0, %v6512_v30  ;;  %v181_v30 = vld [vmem:[#allocation7 + $0xe8] sm:$0xff] }
  0xb1   :  { %4868 = vmatpush1.bf16.msra.mxu0 %v6546_v51  ;;  %339 = vmatprep.mubr.f32.mxu0 %v6281_v0  ;;  %v6643_v31 = vpack.c.bf16 %v181_v30, %v178_v28 }
  0xb2   :  { %4870 = vmatprep.subr.bf16.mxu0 %v6556_v53 }
  0xb3   :  { %4820 = vmatpush1.bf16.msra.mxu1 %v6578_v1 }
  0xb4   :  { %4822 = vmatprep.subr.bf16.mxu1 %v6581_v2  ;;  %3736 = vmatmul.mubr.msk.f32.gmra.mrb[8].mxu0 %vm226_vm0, %v6520_v37  ;;  %v193_v37 = vld [vmem:[#allocation7 + $0x148] sm:$0xff] }
  0xb5   :  { %4872 = vmatpush1.bf16.msra.mxu0 %v6566_v58  ;;  %345 = vmatprep.mubr.f32.mxu0 %v6281_v0  ;;  %v6651_v38 = vpack.c.bf16 %v193_v37, %v190_v36 }
  0xb6   :  { %4874 = vmatprep.subr.bf16.mxu0 %v6570_v59 }
  0xb7   :  { %4824 = vmatpush1.bf16.msra.mxu1 %v6589_v7 }
  0xb8   :  { %4826 = vmatprep.subr.bf16.mxu1 %v6592_v8  ;;  %3737 = vmatmul.mubr.msk.f32.gmra.mrb[10].mxu0 %vm226_vm0, %v6532_v44  ;;  %v212_v44 = vshrl.u32 %v211_v42, 7 }
  0xb9   :  { %4876 = vmatpush1.bf16.msra.mxu0 %v6578_v1  ;;  %351 = vmatprep.mubr.f32.mxu0 %v6281_v0 }
  0xba   :  { %4878 = vmatprep.subr.bf16.mxu0 %v6581_v2  ;;  %v6679_v46 = vsub.s32 2, %v212_v44  ;;  %v6696_v13 = vsub.s32 0, %v212_v44  ;;  %v6698_v14 = vsub.s32 1, %v212_v44 }
  0xbb   :  { %4828 = vmatpush1.bf16.msra.mxu1 %v6600_v12 }
  0xbc   :  { %4829 = vmatprep.subr.bf16.mxu1 %v6282_v17  ;;  %3738 = vmatmul.mubr.msk.f32.gmra.mrb[12].mxu0 %vm226_vm0, %v6540_v48  ;;  %v222_v48 = vrot.slane %v200_v47, %v6679_v46  ;;  %v6701_v18 = vrot.slane %v200_v47, %v6696_v13  ;;  %v6704_v22 = vrot.slane %v200_v47, %v6698_v14 }
  0xbd   :  { %4880 = vmatpush1.bf16.msra.mxu0 %v6589_v7  ;;  %357 = vmatprep.mubr.f32.mxu0 %v6281_v0  ;;  %v6708_v25 = vrot.slane %v201_v20, %v6696_v13  ;;  %v6712_v28 = vrot.slane %v201_v20, %v6698_v14 }
  0xbe   :  { %580 = vmatmul.mubr.f32.vlgmr.msra.gmra.mrb[8].mxu1 %v6281_v0  ;;  %4882 = vmatprep.subr.bf16.mxu0 %v6592_v8 }
  0xbf   :  { %4831 = vmatpush3.bf16.msra.mxu1 %v6609_v15  ;;  %4165 = vmatprep.mubr.msk.f32.mxu1 %vm6283_vm1, %v6281_v0 }
  0xc0   :  { %4832 = vmatprep.subr.bf16.mxu1 %v6282_v17  ;;  %3739 = vmatmul.mubr.msk.f32.gmra.mrb[14].mxu0 %vm226_vm0, %v6553_v52 }
  0xc1   :  { %4884 = vmatpush1.bf16.msra.mxu0 %v6600_v12  ;;  %747 = vmatprep.mubr.f32.mxu0 %v6281_v0 }
  0xc2   :  { %4910 = vmatprep.subr.bf16.mxu0 %v6485_v10 }
  0xc3   :  { %4834 = vmatpush3.bf16.msra.mxu1 %v6619_v21 }
  0xc4   :  { %4835 = vmatprep.subr.bf16.mxu1 %v6282_v17 }
  0xc7   :  { %4837 = vmatpush3.bf16.msra.mxu1 %v6630_v24 }
  0xc8   :  { %4838 = vmatprep.subr.bf16.mxu1 %v6282_v17 }
  0xcb   :  { %4840 = vmatpush3.bf16.msra.mxu1 %v6639_v27 }
  0xcc   :  { %4841 = vmatprep.subr.bf16.mxu1 %v6282_v17 }
  0xcf   :  { %4843 = vmatpush3.bf16.msra.mxu1 %v6643_v31 }
  0xd0   :  { %4844 = vmatprep.subr.bf16.mxu1 %v6282_v17 }
  0xd3   :  { %4846 = vmatpush3.bf16.msra.mxu1 %v6647_v35 }
  0xd4   :  { %4847 = vmatprep.subr.bf16.mxu1 %v6282_v17 }
  0xd7   :  { %4849 = vmatpush3.bf16.msra.mxu1 %v6651_v38 }
  0xd8   :  { %4850 = vmatprep.subr.bf16.mxu1 %v6282_v17 }
  0xdb   :  { %4852 = vmatpush3.bf16.msra.mxu1 %v6655_v41 }
  0xdc   :  { %4885 = vmatprep.subr.bf16.mxu1 %v6282_v17 }
  0xde   :  { %4166 = vmatmul.mubr.f32.vlgmr.msra.gmra.mrb[10].mxu1 %v6281_v0 }
  0xdf   :  { %4887 = vmatpush3.bf16.msra.mxu1 %v6609_v15  ;;  %4200 = vmatprep.mubr.msk.f32.mxu1 %vm6283_vm1, %v6281_v0 }
  0xe0   :  { %4888 = vmatprep.subr.bf16.mxu1 %v6282_v17 }
  0xe3   :  { %4890 = vmatpush3.bf16.msra.mxu1 %v6619_v21 }
  0xe4   :  { %4891 = vmatprep.subr.bf16.mxu1 %v6282_v17 }
  0xe7   :  { %4893 = vmatpush3.bf16.msra.mxu1 %v6630_v24 }
  0xe8   :  { %4894 = vmatprep.subr.bf16.mxu1 %v6282_v17 }
  0xeb   :  { %4896 = vmatpush3.bf16.msra.mxu1 %v6639_v27 }
  0xec   :  { %4897 = vmatprep.subr.bf16.mxu1 %v6282_v17 }
  0xef   :  { %4899 = vmatpush3.bf16.msra.mxu1 %v6643_v31 }
  0xf0   :  { %4900 = vmatprep.subr.bf16.mxu1 %v6282_v17 }
  0xf3   :  { %4902 = vmatpush3.bf16.msra.mxu1 %v6647_v35 }
  0xf4   :  { %4903 = vmatprep.subr.bf16.mxu1 %v6282_v17 }
  0xf7   :  { %4905 = vmatpush3.bf16.msra.mxu1 %v6651_v38 }
  0xf8   :  { %4906 = vmatprep.subr.bf16.mxu1 %v6282_v17 }
  0xfb   :  { %4908 = vmatpush3.bf16.msra.mxu1 %v6655_v41 }
  0xfc   :  { %4941 = vmatprep.subr.bf16.mxu1 %v6282_v17 }
 0x171   :  { %v4123_v49 = vpop.f32.mrb[0].mxu1 }
 0x172   :  { %v6682_v50 = vadd.f32 %v4123_v49, %v222_v48  ;;  %v430_v52 = vpop.f32.mrb[1].mxu1  ;;  %v6717_v49 = vrot.slane %v201_v20, %v6679_v46 }
 0x175   :  { %v4126_v54 = vpop.f32.mrb[2].mxu1 }
 0x176   :  { %v6684_v55 = vadd.f32 %v4126_v54, %v222_v48  ;;  %v440_v56 = vpop.f32.mrb[3].mxu1 }
 0x177   :  { %v6686_v57 = vadd.f32 %v440_v56, %v222_v48  ;;  %v317_v3 = vpop.f32.mrb[0].mxu0 }
 0x178   :  { %v319_v4 = vpop.f32.mrb[1].mxu0  ;;  %v318_v23 = vadd.f32 %v317_v3, %v6701_v18 }
 0x179   :  { %v4129_v60 = vpop.f32.mrb[4].mxu1  ;;  %v320_v26 = vadd.f32 %v319_v4, %v6704_v22  ;;  %v431_v4 = vadd.f32 %v430_v52, %v222_v48 }
 0x17a   :  { %v6688_v61 = vadd.f32 %v4129_v60, %v222_v48  ;;  %v450_v62 = vpop.f32.mrb[5].mxu1  ;;  %v5790_v30 = vadd.f32 %v6708_v25, %v318_v23 }
 0x17b   :  { %v6690_v63 = vadd.f32 %v450_v62, %v222_v48  ;;  %v5793_v32 = vadd.f32 %v6712_v28, %v320_v26 }
 0x17d   :  { %v4132_v5 = vpop.f32.mrb[6].mxu1 }
 0x17e   :  { %v6692_v6 = vadd.f32 %v4132_v5, %v222_v48  ;;  %v460_v9 = vpop.f32.mrb[7].mxu1 }
 0x17f   :  { %v6694_v11 = vadd.f32 %v460_v9, %v222_v48  ;;  %v6761_v48 = vadd.f32 %v6708_v25, %v6701_v18 }
 0x191   :  { %v581_v33 = vpop.f32.mrb[8].mxu1 }
 0x192   :  { %v5791_v36 = vadd.f32 %v5790_v30, %v581_v33  ;;  %v583_v37 = vpop.f32.mrb[9].mxu1 }
 0x193   :  { %v5794_v39 = vadd.f32 %v5793_v32, %v583_v37 }
 0x194   :  { %v3748_v40 = vmul.f32 -1.442695, %v5791_v36 }
 0x195   :  { %v3749_v44 = vmul.f32 -1.442695, %v5794_v39 }
 0x196   :  { %5901 = vpow2.f32 %v3748_v40 }
 0x197   :  { %5903 = vpow2.f32 %v3749_v44  ;;  %v6766_v44 = vadd.f32 %v6712_v28, %v6704_v22 }
 0x1a0   :  { %v5902_v42 = vpop.eup %5901 }
 0x1a1   :  { %v660_v47 = vadd.f32 1.0, %v5902_v42  ;;  %v5904_v56 = vpop.eup %5903 }
 0x1a2   :  { %v667_v9 = vadd.f32 1.0, %v5904_v56 }
 0x1a3   :  { %5905 = vrcp.f32 %v660_v47 }
 0x1ad   :  { %v5906_v3 = vpop.eup %5905 }
 0x1b1   :  { %v652_v54 = vpop.f32.mrb[10].mxu1 }
 0x1b2   :  { %v653_v60 = vadd.f32 %v652_v54, %v6717_v49  ;;  %v4167_v62 = vpop.f32.mrb[11].mxu1 }
 0x1b4   :  { %v670_v5 = vmul.f32 %v5906_v3, %v653_v60 }
 0x1b6   :  { %v671_v23 = vadd.f32 %v670_v5, %v431_v4 }
 0x1b8   :  { %5907 = vtanh.f32 %v671_v23 }
 0x1b9   :  { %5909 = vrcp.f32 %v667_v9 }
 0x1c2   :  { %v5908_v26 = vpop.eup %5907 }
 0x1c3   :  { %v673_v30 = vsub.f32 0.0, %v5908_v26  ;;  %v5910_v32 = vpop.eup %5909 }
 0x1c5   :  { %v674_v33 = vmul.f32 %v5910_v32, %v673_v30 }
 0x1c7   :  { %v6720_v36 = vadd.f32 %v5908_v26, %v674_v33 }
 0x1c9   :  { %748 = vmatmul.mubr.f32.vlgmr.msra.gmra.mrb[2].mxu0 %v6720_v36  ;;  %4201 = vmatmul.mubr.f32.vlgmr.msra.gmra.mrb[12].mxu1 %v6720_v36 }
 0x1ca   :  { %4912 = vmatpush1.bf16.msra.mxu0 %v6492_v16  ;;  %4943 = vmatpush3.bf16.msra.mxu1 %v6609_v15 }
 0x1cb   :  { %4914 = vmatprep.subr.bf16.mxu0 %v6495_v19  ;;  %4944 = vmatprep.subr.bf16.mxu1 %v6282_v17 }
 0x1cc   :  { %916 = vmatprep.mubr.f32.mxu0 %v6281_v0  ;;  %4235 = vmatprep.mubr.msk.f32.mxu1 %vm6283_vm1, %v6281_v0 }
 0x1ce   :  { %4916 = vmatpush1.bf16.msra.mxu0 %v6505_v29  ;;  %4946 = vmatpush3.bf16.msra.mxu1 %v6619_v21 }
 0x1cf   :  { %4918 = vmatprep.subr.bf16.mxu0 %v6515_v34  ;;  %4947 = vmatprep.subr.bf16.mxu1 %v6282_v17 }
 0x1d2   :  { %4920 = vmatpush1.bf16.msra.mxu0 %v6525_v43  ;;  %4949 = vmatpush3.bf16.msra.mxu1 %v6630_v24 }
 0x1d3   :  { %4922 = vmatprep.subr.bf16.mxu0 %v6535_v45  ;;  %4950 = vmatprep.subr.bf16.mxu1 %v6282_v17 }
 0x1d6   :  { %4924 = vmatpush1.bf16.msra.mxu0 %v6546_v51  ;;  %4952 = vmatpush3.bf16.msra.mxu1 %v6639_v27 }
 0x1d7   :  { %4926 = vmatprep.subr.bf16.mxu0 %v6556_v53  ;;  %4953 = vmatprep.subr.bf16.mxu1 %v6282_v17 }
 0x1da   :  { %4928 = vmatpush1.bf16.msra.mxu0 %v6566_v58  ;;  %4955 = vmatpush3.bf16.msra.mxu1 %v6643_v31 }
 0x1db   :  { %4930 = vmatprep.subr.bf16.mxu0 %v6570_v59  ;;  %4956 = vmatprep.subr.bf16.mxu1 %v6282_v17 }
 0x1de   :  { %4932 = vmatpush1.bf16.msra.mxu0 %v6578_v1  ;;  %4958 = vmatpush3.bf16.msra.mxu1 %v6647_v35 }
 0x1df   :  { %4934 = vmatprep.subr.bf16.mxu0 %v6581_v2  ;;  %4959 = vmatprep.subr.bf16.mxu1 %v6282_v17 }
 0x1e2   :  { %4936 = vmatpush1.bf16.msra.mxu0 %v6589_v7  ;;  %4961 = vmatpush3.bf16.msra.mxu1 %v6651_v38 }
 0x1e3   :  { %4938 = vmatprep.subr.bf16.mxu0 %v6592_v8  ;;  %4962 = vmatprep.subr.bf16.mxu1 %v6282_v17 }
 0x1e6   :  { %4940 = vmatpush1.bf16.msra.mxu0 %v6600_v12  ;;  %4964 = vmatpush3.bf16.msra.mxu1 %v6655_v41 }
 0x1e7   :  { %4966 = vmatprep.subr.bf16.mxu0 %v6485_v10  ;;  %4997 = vmatprep.subr.bf16.mxu1 %v6282_v17 }
 0x29c   :  { %v749_v52 = vpop.f32.mrb[2].mxu0  ;;  %v820_v20 = vpop.f32.mrb[12].mxu1 }
 0x29d   :  { %v5796_v37 = vadd.f32 %v6761_v48, %v749_v52  ;;  %v751_v39 = vpop.f32.mrb[3].mxu0  ;;  %v4202_v40 = vpop.f32.mrb[13].mxu1  ;;  %v821_v25 = vadd.f32 %v820_v20, %v6717_v49 }
 0x29e   :  { %v5798_v47 = vadd.f32 %v6766_v44, %v751_v39 }
 0x29f   :  { %v3750_v42 = vmul.f32 -1.442695, %v5796_v37 }
 0x2a0   :  { %v3751_v54 = vmul.f32 -1.442695, %v5798_v47 }
 0x2a1   :  { %5911 = vpow2.f32 %v3750_v42 }
 0x2a2   :  { %5913 = vpow2.f32 %v3751_v54 }
 0x2ab   :  { %v5912_v56 = vpop.eup %5911 }
 0x2ac   :  { %v828_v60 = vadd.f32 1.0, %v5912_v56  ;;  %v5914_v18 = vpop.eup %5913 }
 0x2ad   :  { %v835_v5 = vadd.f32 1.0, %v5914_v18 }
 0x2ae   :  { %5915 = vrcp.f32 %v828_v60 }
 0x2b8   :  { %v5916_v62 = vpop.eup %5915 }
 0x2b9   :  { %v838_v3 = vmul.f32 %v5916_v62, %v821_v25 }
 0x2bb   :  { %v839_v4 = vadd.f32 %v838_v3, %v6682_v50 }
 0x2bd   :  { %5917 = vtanh.f32 %v839_v4 }
 0x2be   :  { %5919 = vrcp.f32 %v835_v5 }
 0x2c7   :  { %v5918_v22 = vpop.eup %5917 }
 0x2c8   :  { %v841_v28 = vsub.f32 %v6720_v36, %v5918_v22  ;;  %v5920_v9 = vpop.eup %5919 }
 0x2ca   :  { %v842_v23 = vmul.f32 %v5920_v9, %v841_v28 }
 0x2cc   :  { %v6772_v26 = vadd.f32 %v5918_v22, %v842_v23 }
 0x2ce   :  { %917 = vmatmul.mubr.f32.vlgmr.msra.gmra.mrb[4].mxu0 %v6772_v26  ;;  %4236 = vmatmul.mubr.f32.vlgmr.msra.gmra.mrb[14].mxu1 %v6772_v26 }
 0x2cf   :  { %4968 = vmatpush1.bf16.msra.mxu0 %v6492_v16  ;;  %4999 = vmatpush3.bf16.msra.mxu1 %v6609_v15 }
 0x2d0   :  { %4970 = vmatprep.subr.bf16.mxu0 %v6495_v19  ;;  %5000 = vmatprep.subr.bf16.mxu1 %v6282_v17 }
 0x2d1   :  { %1085 = vmatprep.mubr.f32.mxu0 %v6281_v0  ;;  %4270 = vmatprep.mubr.msk.f32.mxu1 %vm6283_vm1, %v6281_v0 }
 0x2d3   :  { %4972 = vmatpush1.bf16.msra.mxu0 %v6505_v29  ;;  %5002 = vmatpush3.bf16.msra.mxu1 %v6619_v21 }
 0x2d4   :  { %4974 = vmatprep.subr.bf16.mxu0 %v6515_v34  ;;  %5003 = vmatprep.subr.bf16.mxu1 %v6282_v17 }
 0x2d7   :  { %4976 = vmatpush1.bf16.msra.mxu0 %v6525_v43  ;;  %5005 = vmatpush3.bf16.msra.mxu1 %v6630_v24 }
 0x2d8   :  { %4978 = vmatprep.subr.bf16.mxu0 %v6535_v45  ;;  %5006 = vmatprep.subr.bf16.mxu1 %v6282_v17 }
 0x2db   :  { %4980 = vmatpush1.bf16.msra.mxu0 %v6546_v51  ;;  %5008 = vmatpush3.bf16.msra.mxu1 %v6639_v27 }
 0x2dc   :  { %4982 = vmatprep.subr.bf16.mxu0 %v6556_v53  ;;  %5009 = vmatprep.subr.bf16.mxu1 %v6282_v17 }
 0x2df   :  { %4984 = vmatpush1.bf16.msra.mxu0 %v6566_v58  ;;  %5011 = vmatpush3.bf16.msra.mxu1 %v6643_v31 }
 0x2e0   :  { %4986 = vmatprep.subr.bf16.mxu0 %v6570_v59  ;;  %5012 = vmatprep.subr.bf16.mxu1 %v6282_v17 }
 0x2e3   :  { %4988 = vmatpush1.bf16.msra.mxu0 %v6578_v1  ;;  %5014 = vmatpush3.bf16.msra.mxu1 %v6647_v35 }
 0x2e4   :  { %4990 = vmatprep.subr.bf16.mxu0 %v6581_v2  ;;  %5015 = vmatprep.subr.bf16.mxu1 %v6282_v17 }
 0x2e7   :  { %4992 = vmatpush1.bf16.msra.mxu0 %v6589_v7  ;;  %5017 = vmatpush3.bf16.msra.mxu1 %v6651_v38 }
 0x2e8   :  { %4994 = vmatprep.subr.bf16.mxu0 %v6592_v8  ;;  %5018 = vmatprep.subr.bf16.mxu1 %v6282_v17 }
 0x2eb   :  { %4996 = vmatpush1.bf16.msra.mxu0 %v6600_v12  ;;  %5020 = vmatpush3.bf16.msra.mxu1 %v6655_v41 }
 0x2ec   :  { %5022 = vmatprep.subr.bf16.mxu0 %v6485_v10  ;;  %5053 = vmatprep.subr.bf16.mxu1 %v6282_v17 }
 0x3a1   :  { %v918_v50 = vpop.f32.mrb[4].mxu0  ;;  %v989_v30 = vpop.f32.mrb[14].mxu1 }
 0x3a2   :  { %v5800_v32 = vadd.f32 %v6761_v48, %v918_v50  ;;  %v920_v33 = vpop.f32.mrb[5].mxu0  ;;  %v4237_v52 = vpop.f32.mrb[15].mxu1  ;;  %v990_v54 = vadd.f32 %v989_v30, %v6717_v49 }
 0x3a3   :  { %v5802_v37 = vadd.f32 %v6766_v44, %v920_v33 }
 0x3a4   :  { %v3752_v20 = vmul.f32 -1.442695, %v5800_v32 }
 0x3a5   :  { %v3753_v39 = vmul.f32 -1.442695, %v5802_v37 }
 0x3a6   :  { %5921 = vpow2.f32 %v3752_v20 }
 0x3a7   :  { %5923 = vpow2.f32 %v3753_v39 }
 0x3b0   :  { %v5922_v40 = vpop.eup %5921 }
 0x3b1   :  { %v997_v42 = vadd.f32 1.0, %v5922_v40  ;;  %v5924_v47 = vpop.eup %5923 }
 0x3b2   :  { %v1004_v25 = vadd.f32 1.0, %v5924_v47 }
 0x3b3   :  { %5925 = vrcp.f32 %v997_v42 }
 0x3bd   :  { %v5926_v56 = vpop.eup %5925 }
 0x3be   :  { %v1007_v60 = vmul.f32 %v5926_v56, %v990_v54 }
 0x3c0   :  { %v1008_v18 = vadd.f32 %v1007_v60, %v6686_v57 }
 0x3c2   :  { %5927 = vtanh.f32 %v1008_v18 }
 0x3c3   :  { %5929 = vrcp.f32 %v1004_v25 }
 0x3cc   :  { %v5928_v62 = vpop.eup %5927 }
 0x3cd   :  { %v1010_v3 = vsub.f32 %v6772_v26, %v5928_v62  ;;  %v5930_v4 = vpop.eup %5929 }
 0x3cf   :  { %v1011_v5 = vmul.f32 %v5930_v4, %v1010_v3 }
 0x3d1   :  { %v6816_v22 = vadd.f32 %v5928_v62, %v1011_v5 }
 0x3d3   :  { %1086 = vmatmul.mubr.f32.vlgmr.msra.gmra.mrb[6].mxu0 %v6816_v22  ;;  %4271 = vmatmul.mubr.f32.vlgmr.msra.gmra.mrb[16].mxu1 %v6816_v22 }
 0x3d4   :  { %5024 = vmatpush1.bf16.msra.mxu0 %v6492_v16  ;;  %5055 = vmatpush3.bf16.msra.mxu1 %v6609_v15 }
 0x3d5   :  { %5026 = vmatprep.subr.bf16.mxu0 %v6495_v19  ;;  %5056 = vmatprep.subr.bf16.mxu1 %v6282_v17 }
 0x3d6   :  { %1254 = vmatprep.mubr.f32.mxu0 %v6281_v0  ;;  %4305 = vmatprep.mubr.msk.f32.mxu1 %vm6283_vm1, %v6281_v0 }
 0x3d8   :  { %5028 = vmatpush1.bf16.msra.mxu0 %v6505_v29  ;;  %5058 = vmatpush3.bf16.msra.mxu1 %v6619_v21 }
 0x3d9   :  { %5030 = vmatprep.subr.bf16.mxu0 %v6515_v34  ;;  %5059 = vmatprep.subr.bf16.mxu1 %v6282_v17 }
 0x3dc   :  { %5032 = vmatpush1.bf16.msra.mxu0 %v6525_v43  ;;  %5061 = vmatpush3.bf16.msra.mxu1 %v6630_v24 }
 0x3dd   :  { %5034 = vmatprep.subr.bf16.mxu0 %v6535_v45  ;;  %5062 = vmatprep.subr.bf16.mxu1 %v6282_v17 }
 0x3e0   :  { %5036 = vmatpush1.bf16.msra.mxu0 %v6546_v51  ;;  %5064 = vmatpush3.bf16.msra.mxu1 %v6639_v27 }
 0x3e1   :  { %5038 = vmatprep.subr.bf16.mxu0 %v6556_v53  ;;  %5065 = vmatprep.subr.bf16.mxu1 %v6282_v17 }
 0x3e4   :  { %5040 = vmatpush1.bf16.msra.mxu0 %v6566_v58  ;;  %5067 = vmatpush3.bf16.msra.mxu1 %v6643_v31 }
 0x3e5   :  { %5042 = vmatprep.subr.bf16.mxu0 %v6570_v59  ;;  %5068 = vmatprep.subr.bf16.mxu1 %v6282_v17 }
 0x3e8   :  { %5044 = vmatpush1.bf16.msra.mxu0 %v6578_v1  ;;  %5070 = vmatpush3.bf16.msra.mxu1 %v6647_v35 }
 0x3e9   :  { %5046 = vmatprep.subr.bf16.mxu0 %v6581_v2  ;;  %5071 = vmatprep.subr.bf16.mxu1 %v6282_v17 }
 0x3ec   :  { %5048 = vmatpush1.bf16.msra.mxu0 %v6589_v7  ;;  %5073 = vmatpush3.bf16.msra.mxu1 %v6651_v38 }
 0x3ed   :  { %5050 = vmatprep.subr.bf16.mxu0 %v6592_v8  ;;  %5074 = vmatprep.subr.bf16.mxu1 %v6282_v17 }
 0x3f0   :  { %5052 = vmatpush1.bf16.msra.mxu0 %v6600_v12  ;;  %5076 = vmatpush3.bf16.msra.mxu1 %v6655_v41 }
 0x3f1   :  { %5078 = vmatprep.subr.bf16.mxu0 %v6485_v10  ;;  %5109 = vmatprep.subr.bf16.mxu1 %v6282_v17 }
 0x4a6   :  { %v1087_v57 = vpop.f32.mrb[6].mxu0  ;;  %v1158_v28 = vpop.f32.mrb[16].mxu1 }
 0x4a7   :  { %v5804_v9 = vadd.f32 %v6761_v48, %v1087_v57  ;;  %v1089_v23 = vpop.f32.mrb[7].mxu0  ;;  %v4272_v50 = vpop.f32.mrb[17].mxu1  ;;  %v1159_v39 = vadd.f32 %v1158_v28, %v6717_v49 }
 0x4a8   :  { %v5806_v32 = vadd.f32 %v6766_v44, %v1089_v23 }
 0x4a9   :  { %v3754_v30 = vmul.f32 -1.442695, %v5804_v9 }
 0x4aa   :  { %v3755_v33 = vmul.f32 -1.442695, %v5806_v32 }
 0x4ab   :  { %5931 = vpow2.f32 %v3754_v30 }
 0x4ac   :  { %5933 = vpow2.f32 %v3755_v33 }
 0x4b5   :  { %v5932_v52 = vpop.eup %5931 }
 0x4b6   :  { %v1166_v20 = vadd.f32 1.0, %v5932_v52  ;;  %v5934_v37 = vpop.eup %5933 }
 0x4b7   :  { %v1173_v54 = vadd.f32 1.0, %v5934_v37 }
 0x4b8   :  { %5935 = vrcp.f32 %v1166_v20 }
 0x4c2   :  { %v5936_v40 = vpop.eup %5935 }
 0x4c3   :  { %v1176_v42 = vmul.f32 %v5936_v40, %v1159_v39 }
 0x4c5   :  { %v1177_v47 = vadd.f32 %v1176_v42, %v6684_v55 }
 0x4c7   :  { %5937 = vtanh.f32 %v1177_v47 }
 0x4c8   :  { %5939 = vrcp.f32 %v1173_v54 }
 0x4d1   :  { %v5938_v56 = vpop.eup %5937 }
 0x4d2   :  { %v1179_v60 = vsub.f32 %v6816_v22, %v5938_v56  ;;  %v5940_v18 = vpop.eup %5939 }
 0x4d4   :  { %v1180_v25 = vmul.f32 %v5940_v18, %v1179_v60 }
 0x4d6   :  { %v6860_v62 = vadd.f32 %v5938_v56, %v1180_v25 }
 0x4d8   :  { %1255 = vmatmul.mubr.f32.vlgmr.msra.gmra.mrb[8].mxu0 %v6860_v62  ;;  %4306 = vmatmul.mubr.f32.vlgmr.msra.gmra.mrb[18].mxu1 %v6860_v62 }
 0x4d9   :  { %5080 = vmatpush1.bf16.msra.mxu0 %v6492_v16  ;;  %5111 = vmatpush3.bf16.msra.mxu1 %v6609_v15 }
 0x4da   :  { %5082 = vmatprep.subr.bf16.mxu0 %v6495_v19  ;;  %5112 = vmatprep.subr.bf16.mxu1 %v6282_v17 }
 0x4db   :  { %1423 = vmatprep.mubr.f32.mxu0 %v6281_v0  ;;  %4340 = vmatprep.mubr.msk.f32.mxu1 %vm6283_vm1, %v6281_v0 }
 0x4dd   :  { %5084 = vmatpush1.bf16.msra.mxu0 %v6505_v29  ;;  %5114 = vmatpush3.bf16.msra.mxu1 %v6619_v21 }
 0x4de   :  { %5086 = vmatprep.subr.bf16.mxu0 %v6515_v34  ;;  %5115 = vmatprep.subr.bf16.mxu1 %v6282_v17 }
 0x4e1   :  { %5088 = vmatpush1.bf16.msra.mxu0 %v6525_v43  ;;  %5117 = vmatpush3.bf16.msra.mxu1 %v6630_v24 }
 0x4e2   :  { %5090 = vmatprep.subr.bf16.mxu0 %v6535_v45  ;;  %5118 = vmatprep.subr.bf16.mxu1 %v6282_v17 }
 0x4e5   :  { %5092 = vmatpush1.bf16.msra.mxu0 %v6546_v51  ;;  %5120 = vmatpush3.bf16.msra.mxu1 %v6639_v27 }
 0x4e6   :  { %5094 = vmatprep.subr.bf16.mxu0 %v6556_v53  ;;  %5121 = vmatprep.subr.bf16.mxu1 %v6282_v17 }
 0x4e9   :  { %5096 = vmatpush1.bf16.msra.mxu0 %v6566_v58  ;;  %5123 = vmatpush3.bf16.msra.mxu1 %v6643_v31 }
 0x4ea   :  { %5098 = vmatprep.subr.bf16.mxu0 %v6570_v59  ;;  %5124 = vmatprep.subr.bf16.mxu1 %v6282_v17 }
 0x4ed   :  { %5100 = vmatpush1.bf16.msra.mxu0 %v6578_v1  ;;  %5126 = vmatpush3.bf16.msra.mxu1 %v6647_v35 }
 0x4ee   :  { %5102 = vmatprep.subr.bf16.mxu0 %v6581_v2  ;;  %5127 = vmatprep.subr.bf16.mxu1 %v6282_v17 }
 0x4f1   :  { %5104 = vmatpush1.bf16.msra.mxu0 %v6589_v7  ;;  %5129 = vmatpush3.bf16.msra.mxu1 %v6651_v38 }
 0x4f2   :  { %5106 = vmatprep.subr.bf16.mxu0 %v6592_v8  ;;  %5130 = vmatprep.subr.bf16.mxu1 %v6282_v17 }
 0x4f5   :  { %5108 = vmatpush1.bf16.msra.mxu0 %v6600_v12  ;;  %5132 = vmatpush3.bf16.msra.mxu1 %v6655_v41 }
 0x4f6   :  { %5134 = vmatprep.subr.bf16.mxu0 %v6485_v10  ;;  %5165 = vmatprep.subr.bf16.mxu1 %v6282_v17 }
 0x5ab   :  { %v1256_v55 = vpop.f32.mrb[8].mxu0  ;;  %v1327_v3 = vpop.f32.mrb[18].mxu1 }
 0x5ac   :  { %v5808_v4 = vadd.f32 %v6761_v48, %v1256_v55  ;;  %v1258_v5 = vpop.f32.mrb[9].mxu0  ;;  %v4307_v57 = vpop.f32.mrb[19].mxu1  ;;  %v1328_v33 = vadd.f32 %v1327_v3, %v6717_v49 }
 0x5ad   :  { %v5810_v9 = vadd.f32 %v6766_v44, %v1258_v5 }
 0x5ae   :  { %v3756_v28 = vmul.f32 -1.442695, %v5808_v4 }
 0x5af   :  { %v3757_v23 = vmul.f32 -1.442695, %v5810_v9 }
 0x5b0   :  { %5941 = vpow2.f32 %v3756_v28 }
 0x5b1   :  { %5943 = vpow2.f32 %v3757_v23 }
 0x5ba   :  { %v5942_v50 = vpop.eup %5941 }
 0x5bb   :  { %v1335_v30 = vadd.f32 1.0, %v5942_v50  ;;  %v5944_v32 = vpop.eup %5943 }
 0x5bc   :  { %v1342_v39 = vadd.f32 1.0, %v5944_v32 }
 0x5bd   :  { %5945 = vrcp.f32 %v1335_v30 }
 0x5c7   :  { %v5946_v52 = vpop.eup %5945 }
 0x5c8   :  { %v1345_v20 = vmul.f32 %v5946_v52, %v1328_v33 }
 0x5ca   :  { %v1346_v37 = vadd.f32 %v1345_v20, %v6690_v63 }
 0x5cc   :  { %5947 = vtanh.f32 %v1346_v37 }
 0x5cd   :  { %5949 = vrcp.f32 %v1342_v39 }
 0x5d6   :  { %v5948_v40 = vpop.eup %5947 }
 0x5d7   :  { %v1348_v42 = vsub.f32 %v6860_v62, %v5948_v40  ;;  %v5950_v47 = vpop.eup %5949 }
 0x5d9   :  { %v1349_v54 = vmul.f32 %v5950_v47, %v1348_v42  ;;  %v1863_v42 = vld [vmem:[#allocation12 + $0x18] sm:$0xff] }
 0x5db   :  { %v6904_v56 = vadd.f32 %v5948_v40, %v1349_v54  ;;  %v1860_v40 = vld [vmem:[#allocation12] sm:$0xff]  ;;  %v1867_v54 = vld [vmem:[#allocation12 + $0x38] sm:$0xff] }
 0x5dd   :  { %1424 = vmatmul.mubr.f32.vlgmr.msra.gmra.mrb[10].mxu0 %v6904_v56  ;;  %4341 = vmatmul.mubr.f32.vlgmr.msra.gmra.mrb[20].mxu1 %v6904_v56 }
 0x5de   :  { %5136 = vmatpush1.bf16.msra.mxu0 %v6492_v16  ;;  %5167 = vmatpush3.bf16.msra.mxu1 %v6609_v15 }
 0x5df   :  { %5138 = vmatprep.subr.bf16.mxu0 %v6495_v19  ;;  %5168 = vmatprep.subr.bf16.mxu1 %v6282_v17 }
 0x5e0   :  { %1592 = vmatprep.mubr.f32.mxu0 %v6281_v0  ;;  %4375 = vmatprep.mubr.msk.f32.mxu1 %vm6283_vm1, %v6281_v0 }
 0x5e2   :  { %5140 = vmatpush1.bf16.msra.mxu0 %v6505_v29  ;;  %5170 = vmatpush3.bf16.msra.mxu1 %v6619_v21 }
 0x5e3   :  { %5142 = vmatprep.subr.bf16.mxu0 %v6515_v34  ;;  %5171 = vmatprep.subr.bf16.mxu1 %v6282_v17 }
 0x5e6   :  { %5144 = vmatpush1.bf16.msra.mxu0 %v6525_v43  ;;  %5173 = vmatpush3.bf16.msra.mxu1 %v6630_v24 }
 0x5e7   :  { %5146 = vmatprep.subr.bf16.mxu0 %v6535_v45  ;;  %5174 = vmatprep.subr.bf16.mxu1 %v6282_v17 }
 0x5ea   :  { %5148 = vmatpush1.bf16.msra.mxu0 %v6546_v51  ;;  %5176 = vmatpush3.bf16.msra.mxu1 %v6639_v27 }
 0x5eb   :  { %5150 = vmatprep.subr.bf16.mxu0 %v6556_v53  ;;  %5177 = vmatprep.subr.bf16.mxu1 %v6282_v17 }
 0x5ee   :  { %5152 = vmatpush1.bf16.msra.mxu0 %v6566_v58  ;;  %5179 = vmatpush3.bf16.msra.mxu1 %v6643_v31 }
 0x5ef   :  { %5154 = vmatprep.subr.bf16.mxu0 %v6570_v59  ;;  %5180 = vmatprep.subr.bf16.mxu1 %v6282_v17 }
 0x5f2   :  { %5156 = vmatpush1.bf16.msra.mxu0 %v6578_v1  ;;  %5182 = vmatpush3.bf16.msra.mxu1 %v6647_v35 }
 0x5f3   :  { %5158 = vmatprep.subr.bf16.mxu0 %v6581_v2  ;;  %5183 = vmatprep.subr.bf16.mxu1 %v6282_v17 }
 0x5f6   :  { %5160 = vmatpush1.bf16.msra.mxu0 %v6589_v7  ;;  %5185 = vmatpush3.bf16.msra.mxu1 %v6651_v38 }
 0x5f7   :  { %5162 = vmatprep.subr.bf16.mxu0 %v6592_v8  ;;  %5186 = vmatprep.subr.bf16.mxu1 %v6282_v17 }
 0x5fa   :  { %5164 = vmatpush1.bf16.msra.mxu0 %v6600_v12  ;;  %5188 = vmatpush3.bf16.msra.mxu1 %v6655_v41 }
 0x5fb   :  { %5190 = vmatprep.subr.bf16.mxu0 %v6485_v10  ;;  %5221 = vmatprep.subr.bf16.mxu1 %v6282_v17 }
 0x6b0   :  { %v1425_v63 = vpop.f32.mrb[10].mxu0  ;;  %v1496_v60 = vpop.f32.mrb[20].mxu1 }
 0x6b1   :  { %v5812_v18 = vadd.f32 %v6761_v48, %v1425_v63  ;;  %v1427_v25 = vpop.f32.mrb[11].mxu0  ;;  %v4342_v55 = vpop.f32.mrb[21].mxu1  ;;  %v1497_v10 = vadd.f32 %v1496_v60, %v6717_v49  ;;  %v1870_v63 = vld [vmem:[#allocation12 + $0x50] sm:$0xff] }
 0x6b2   :  { %v5814_v4 = vadd.f32 %v6766_v44, %v1427_v25  ;;  %v1871_v25 = vld [vmem:[#allocation12 + $0x58] sm:$0xff]  ;;  %v5247_v55 = vpack.c.bf16 %v1863_v42, %v1860_v40  ;;  %v1893_v40 = vld [vmem:[#allocation12 + $0x108] sm:$0xff] }
 0x6b3   :  { %v3758_v3 = vmul.f32 -1.442695, %v5812_v18  ;;  %v1868_v18 = vld [vmem:[#allocation12 + $0x40] sm:$0xff]  ;;  %v1897_v42 = vld [vmem:[#allocation12 + $0x128] sm:$0xff] }
 0x6b4   :  { %v3759_v5 = vmul.f32 -1.442695, %v5814_v4  ;;  %v5249_v4 = vpack.c.bf16 %v1870_v63, %v1867_v54  ;;  %v1898_v54 = vld [vmem:[#allocation12 + $0x130] sm:$0xff]  ;;  %v1901_v63 = vld [vmem:[#allocation12 + $0x148] sm:$0xff] }
 0x6b5   :  { %5951 = vpow2.f32 %v3758_v3 }
 0x6b6   :  { %5953 = vpow2.f32 %v3759_v5  ;;  %v1866_v5 = vld [vmem:[#allocation12 + $0x30] sm:$0xff] }
 0x6bf   :  { %v5952_v57 = vpop.eup %5951 }
 0x6c0   :  { %v1504_v28 = vadd.f32 1.0, %v5952_v57  ;;  %v5954_v9 = vpop.eup %5953  ;;  %v1873_v57 = vld [vmem:[#allocation12 + $0x68] sm:$0xff] }
 0x6c1   :  { %v1511_v32 = vadd.f32 1.0, %v5954_v9  ;;  %v1876_v9 = vld [vmem:[#allocation12 + $0x80] sm:$0xff] }
 0x6c2   :  { %5955 = vrcp.f32 %v1504_v28  ;;  %v5281_v28 = vpack.c.bf16 %v1871_v25, %v1868_v18  ;;  %v5301_v25 = vpack.c.bf16 %v1901_v63, %v1898_v54  ;;  %v1948_v54 = vld [vmem:[#allocation13 + $0x140] sm:$0xff] }
 0x6c3   :  { %v1944_v63 = vld [vmem:[#allocation13 + $0x120] sm:$0xff] }
 0x6cc   :  { %v5956_v23 = vpop.eup %5955 }
 0x6cd   :  { %v1514_v50 = vmul.f32 %v5956_v23, %v1497_v10  ;;  %v1874_v10 = vld [vmem:[#allocation12 + $0x70] sm:$0xff]  ;;  %v1877_v23 = vld [vmem:[#allocation12 + $0x88] sm:$0xff] }
 0x6cf   :  { %v1515_v30 = vadd.f32 %v1514_v50, %v6688_v61 }
 0x6d1   :  { %5957 = vtanh.f32 %v1515_v30  ;;  %v5253_v30 = vpack.c.bf16 %v1876_v9, %v1873_v57  ;;  %v1904_v57 = vld [vmem:[#allocation12 + $0x160] sm:$0xff] }
 0x6d2   :  { %5959 = vrcp.f32 %v1511_v32  ;;  %v5285_v32 = vpack.c.bf16 %v1877_v23, %v1874_v10 }
 0x6db   :  { %v5958_v33 = vpop.eup %5957 }
 0x6dc   :  { %v1517_v52 = vsub.f32 %v6904_v56, %v5958_v33  ;;  %v5960_v20 = vpop.eup %5959 }
 0x6de   :  { %v1518_v37 = vmul.f32 %v5960_v20, %v1517_v52  ;;  %v1875_v52 = vld [vmem:[#allocation12 + $0x78] sm:$0xff] }
 0x6df   :  { %v1879_v20 = vld [vmem:[#allocation12 + $0x98] sm:$0xff] }
 0x6e0   :  { %v6948_v39 = vadd.f32 %v5958_v33, %v1518_v37  ;;  %v1872_v33 = vld [vmem:[#allocation12 + $0x60] sm:$0xff]  ;;  %v1882_v37 = vld [vmem:[#allocation12 + $0xb0] sm:$0xff] }
 0x6e2   :  { %1593 = vmatmul.mubr.f32.vlgmr.msra.gmra.mrb[12].mxu0 %v6948_v39  ;;  %4376 = vmatmul.mubr.f32.vlgmr.msra.gmra.mrb[22].mxu1 %v6948_v39 }
 0x6e3   :  { %5192 = vmatpush1.bf16.msra.mxu0 %v6492_v16  ;;  %5223 = vmatpush3.bf16.msra.mxu1 %v6609_v15  ;;  %v1861_v16 = vld [vmem:[#allocation12 + $0x8] sm:$0xff] }
 0x6e4   :  { %5194 = vmatprep.subr.bf16.mxu0 %v6495_v19  ;;  %5224 = vmatprep.subr.bf16.mxu1 %v6282_v17  ;;  %v1864_v19 = vld [vmem:[#allocation12 + $0x20] sm:$0xff] }
 0x6e5   :  { %1761 = vmatprep.mubr.f32.mxu0 %v6281_v0  ;;  %4410 = vmatprep.mubr.msk.f32.mxu1 %vm6283_vm1, %v6281_v0 }
 0x6e7   :  { %5196 = vmatpush1.bf16.msra.mxu0 %v6505_v29  ;;  %5226 = vmatpush3.bf16.msra.mxu1 %v6619_v21  ;;  %v1862_v29 = vld [vmem:[#allocation12 + $0x10] sm:$0xff] }
 0x6e8   :  { %5198 = vmatprep.subr.bf16.mxu0 %v6515_v34  ;;  %5227 = vmatprep.subr.bf16.mxu1 %v6282_v17  ;;  %v5245_v34 = vpack.c.bf16 %v1864_v19, %v1861_v16  ;;  %v1880_v16 = vld [vmem:[#allocation12 + $0xa0] sm:$0xff]  ;;  %v1883_v19 = vld [vmem:[#allocation12 + $0xb8] sm:$0xff] }
 0x6eb   :  { %5200 = vmatpush1.bf16.msra.mxu0 %v6525_v43  ;;  %5229 = vmatpush3.bf16.msra.mxu1 %v6630_v24  ;;  %v1865_v43 = vld [vmem:[#allocation12 + $0x28] sm:$0xff] }
 0x6ec   :  { %5202 = vmatprep.subr.bf16.mxu0 %v6535_v45  ;;  %5230 = vmatprep.subr.bf16.mxu1 %v6282_v17  ;;  %v5277_v45 = vpack.c.bf16 %v1865_v43, %v1862_v29  ;;  %v5255_v29 = vpack.c.bf16 %v1875_v52, %v1872_v33  ;;  %v5289_v43 = vpack.c.bf16 %v1883_v19, %v1880_v16  ;;  %v1908_v33 = vld [vmem:[#allocation13] sm:$0xff]  ;;  %v1917_v16 = vld [vmem:[#allocation13 + $0x48] sm:$0xff] }
 0x6ef   :  { %5204 = vmatpush1.bf16.msra.mxu0 %v6546_v51  ;;  %5232 = vmatpush3.bf16.msra.mxu1 %v6639_v27 }
 0x6f0   :  { %5206 = vmatprep.subr.bf16.mxu0 %v6556_v53  ;;  %5233 = vmatprep.subr.bf16.mxu1 %v6282_v17 }
 0x6f3   :  { %5208 = vmatpush1.bf16.msra.mxu0 %v6566_v58  ;;  %5235 = vmatpush3.bf16.msra.mxu1 %v6643_v31 }
 0x6f4   :  { %5210 = vmatprep.subr.bf16.mxu0 %v6570_v59  ;;  %5236 = vmatprep.subr.bf16.mxu1 %v6282_v17 }
 0x6f7   :  { %5212 = vmatpush1.bf16.msra.mxu0 %v6578_v1  ;;  %5238 = vmatpush3.bf16.msra.mxu1 %v6647_v35 }
 0x6f8   :  { %5214 = vmatprep.subr.bf16.mxu0 %v6581_v2  ;;  %5239 = vmatprep.subr.bf16.mxu1 %v6282_v17 }
 0x6fb   :  { %5216 = vmatpush1.bf16.msra.mxu0 %v6589_v7  ;;  %5241 = vmatpush3.bf16.msra.mxu1 %v6651_v38 }
 0x6fc   :  { %5218 = vmatprep.subr.bf16.mxu0 %v6592_v8  ;;  %5242 = vmatprep.subr.bf16.mxu1 %v6282_v17 }
 0x6ff   :  { %5220 = vmatpush1.bf16.msra.mxu0 %v6600_v12  ;;  %5244 = vmatpush3.bf16.msra.mxu1 %v6655_v41 }
 0x700   :  { %5246 = vmatprep.subr.bf16.mxu0 %v5245_v34  ;;  %5278 = vmatprep.subr.bf16.mxu1 %v5277_v45  ;;  %v5257_v34 = vpack.c.bf16 %v1882_v37, %v1879_v20  ;;  %v1914_v37 = vld [vmem:[#allocation13 + $0x30] sm:$0xff] }
 0x701   :  { %v7025_v19 = vpack.c.bf16 %v1917_v16, %v1914_v37  ;;  %v1934_v37 = vld [vmem:[#allocation13 + $0xd0] sm:$0xff]  ;;  %v1937_v16 = vld [vmem:[#allocation13 + $0xe8] sm:$0xff] }
 0x7b5   :  { %v1594_v51 = vpop.f32.mrb[12].mxu0  ;;  %v1665_v53 = vpop.f32.mrb[22].mxu1 }
 0x7b6   :  { %v5816_v58 = vadd.f32 %v6761_v48, %v1594_v51  ;;  %v1596_v59 = vpop.f32.mrb[13].mxu0  ;;  %v4377_v1 = vpop.f32.mrb[23].mxu1  ;;  %v1666_v24 = vadd.f32 %v1665_v53, %v6717_v49  ;;  %v1881_v51 = vld [vmem:[#allocation12 + $0xa8] sm:$0xff] }
 0x7b7   :  { %v5818_v7 = vadd.f32 %v6766_v44, %v1596_v59  ;;  %v1885_v53 = vld [vmem:[#allocation12 + $0xc8] sm:$0xff]  ;;  %v1886_v59 = vld [vmem:[#allocation12 + $0xd0] sm:$0xff] }
 0x7b8   :  { %v3760_v2 = vmul.f32 -1.442695, %v5816_v58  ;;  %v1888_v58 = vld [vmem:[#allocation12 + $0xe0] sm:$0xff]  ;;  %v1889_v1 = vld [vmem:[#allocation12 + $0xe8] sm:$0xff] }
 0x7b9   :  { %v3761_v8 = vmul.f32 -1.442695, %v5818_v7  ;;  %v5261_v7 = vpack.c.bf16 %v1888_v58, %v1885_v53  ;;  %v1927_v58 = vld [vmem:[#allocation13 + $0x98] sm:$0xff] }
 0x7ba   :  { %5961 = vpow2.f32 %v3760_v2 }
 0x7bb   :  { %5963 = vpow2.f32 %v3761_v8  ;;  %v5293_v8 = vpack.c.bf16 %v1889_v1, %v1886_v59  ;;  %v1930_v59 = vld [vmem:[#allocation13 + $0xb0] sm:$0xff] }
 0x7bc   :  { %v7035_v1 = vpack.c.bf16 %v1930_v59, %v1927_v58  ;;  %v1946_v58 = vld [vmem:[#allocation13 + $0x130] sm:$0xff]  ;;  %v1949_v59 = vld [vmem:[#allocation13 + $0x148] sm:$0xff] }
 0x7c4   :  { %v5962_v12 = vpop.eup %5961 }
 0x7c5   :  { %v1673_v15 = vadd.f32 1.0, %v5962_v12  ;;  %v5964_v21 = vpop.eup %5963  ;;  %v1884_v12 = vld [vmem:[#allocation12 + $0xc0] sm:$0xff] }
 0x7c6   :  { %v1680_v38 = vadd.f32 1.0, %v5964_v21  ;;  %v1891_v21 = vld [vmem:[#allocation12 + $0xf8] sm:$0xff] }
 0x7c7   :  { %5965 = vrcp.f32 %v1673_v15  ;;  %v1887_v15 = vld [vmem:[#allocation12 + $0xd8] sm:$0xff] }
 0x7d1   :  { %v5966_v27 = vpop.eup %5965 }
 0x7d2   :  { %v1683_v31 = vmul.f32 %v5966_v27, %v1666_v24  ;;  %v1894_v24 = vld [vmem:[#allocation12 + $0x110] sm:$0xff]  ;;  %v1892_v27 = vld [vmem:[#allocation12 + $0x100] sm:$0xff] }
 0x7d4   :  { %v1684_v35 = vadd.f32 %v1683_v31, %v6694_v11  ;;  %v1869_v11 = vld [vmem:[#allocation12 + $0x48] sm:$0xff]  ;;  %v1895_v31 = vld [vmem:[#allocation12 + $0x118] sm:$0xff] }
 0x7d5   :  { %v5251_v50 = vpack.c.bf16 %v1869_v11, %v1866_v5  ;;  %v1903_v5 = vld [vmem:[#allocation12 + $0x158] sm:$0xff]  ;;  %v1906_v11 = vld [vmem:[#allocation12 + $0x170] sm:$0xff] }
 0x7d6   :  { %5967 = vtanh.f32 %v1684_v35  ;;  %v5263_v35 = vpack.c.bf16 %v1887_v15, %v1884_v12  ;;  %v5273_v10 = vpack.c.bf16 %v1906_v11, %v1903_v5  ;;  %v1933_v12 = vld [vmem:[#allocation13 + $0xc8] sm:$0xff]  ;;  %v1936_v15 = vld [vmem:[#allocation13 + $0xe0] sm:$0xff]  ;;  %v1951_v11 = vld [vmem:[#allocation13 + $0x158] sm:$0xff] }
 0x7d7   :  { %5969 = vrcp.f32 %v1680_v38  ;;  %v5265_v38 = vpack.c.bf16 %v1894_v24, %v1891_v21  ;;  %v7041_v21 = vpack.c.bf16 %v1936_v15, %v1933_v12  ;;  %v1932_v24 = vld [vmem:[#allocation13 + $0xc0] sm:$0xff]  ;;  %v1955_v12 = vld [vmem:[#allocation13 + $0x178] sm:$0xff] }
 0x7e0   :  { %v5968_v41 = vpop.eup %5967 }
 0x7e1   :  { %v1686_v61 = vsub.f32 %v6948_v39, %v5968_v41  ;;  %v5970_v47 = vpop.eup %5969 }
 0x7e3   :  { %v1687_v60 = vmul.f32 %v5970_v47, %v1686_v61  ;;  %v1890_v61 = vld [vmem:[#allocation12 + $0xf0] sm:$0xff]  ;;  %v1900_v47 = vld [vmem:[#allocation12 + $0x140] sm:$0xff] }
 0x7e4   :  { %v5269_v18 = vpack.c.bf16 %v1900_v47, %v1897_v42  ;;  %v1945_v47 = vld [vmem:[#allocation13 + $0x128] sm:$0xff] }
 0x7e5   :  { %v6990_v3 = vadd.f32 %v5968_v41, %v1687_v60  ;;  %v5297_v41 = vpack.c.bf16 %v1895_v31, %v1892_v27  ;;  %v5267_v60 = vpack.c.bf16 %v1893_v40, %v1890_v61  ;;  %v1935_v27 = vld [vmem:[#allocation13 + $0xd8] sm:$0xff]  ;;  %v1938_v61 = vld [vmem:[#allocation13 + $0xf0] sm:$0xff]  ;;  %v1941_v40 = vld [vmem:[#allocation13 + $0x108] sm:$0xff] }
 0x7e6   :  { %v7043_v31 = vpack.c.bf16 %v1935_v27, %v1932_v24  ;;  %v7049_v42 = vpack.c.bf16 %v1941_v40, %v1938_v61 }
 0x7e7   :  { %1762 = vmatmul.mubr.f32.vlgmr.msra.gmra.mrb[14].mxu0 %v6990_v3  ;;  %4411 = vmatmul.mubr.f32.vlgmr.msra.gmra.mrb[24].mxu1 %v6990_v3 }
 0x7e8   :  { %5248 = vmatpush1.bf16.msra.mxu0 %v5247_v55  ;;  %5280 = vmatpush3.bf16.msra.mxu1 %v5277_v45  ;;  %v1878_v45 = vld [vmem:[#allocation12 + $0x90] sm:$0xff]  ;;  %v1896_v55 = vld [vmem:[#allocation12 + $0x120] sm:$0xff] }
 0x7e9   :  { %4445 = vmatprep.mubr.f32.mxu1 %v6720_v36  ;;  %5250 = vmatprep.subr.bf16.mxu0 %v5249_v4  ;;  %v5259_v2 = vpack.c.bf16 %v1881_v51, %v1878_v45  ;;  %v1899_v4 = vld [vmem:[#allocation12 + $0x138] sm:$0xff]  ;;  %v1920_v45 = vld [vmem:[#allocation13 + $0x60] sm:$0xff] }
 0x7ea   :  { %5282 = vmatprep.subr.bf16.mxu1 %v5281_v28  ;;  %2046 = vmatprep.mubr.f32.mxu0 %v6281_v0  ;;  %v5271_v9 = vpack.c.bf16 %v1899_v4, %v1896_v55  ;;  %v1923_v51 = vld [vmem:[#allocation13 + $0x78] sm:$0xff]  ;;  %v1913_v55 = vld [vmem:[#allocation13 + $0x28] sm:$0xff] }
 0x7eb   :  { %v7031_v53 = vpack.c.bf16 %v1923_v51, %v1920_v45  ;;  %v1943_v45 = vld [vmem:[#allocation13 + $0x118] sm:$0xff] }
 0x7ec   :  { %5252 = vmatpush1.bf16.msra.mxu0 %v5251_v50  ;;  %5284 = vmatpush3.bf16.msra.mxu1 %v5281_v28  ;;  %v1907_v28 = vld [vmem:[#allocation12 + $0x178] sm:$0xff]  ;;  %v1902_v50 = vld [vmem:[#allocation12 + $0x150] sm:$0xff] }
 0x7ed   :  { %5254 = vmatprep.subr.bf16.mxu0 %v5253_v30  ;;  %5286 = vmatprep.subr.bf16.mxu1 %v5285_v32  ;;  %v5305_v23 = vpack.c.bf16 %v1907_v28, %v1904_v57  ;;  %v1905_v30 = vld [vmem:[#allocation12 + $0x168] sm:$0xff]  ;;  %v1954_v57 = vld [vmem:[#allocation13 + $0x170] sm:$0xff] }
 0x7ee   :  { %v7060_v28 = vpack.c.bf16 %v1954_v57, %v1951_v11 }
 0x7f0   :  { %5256 = vmatpush1.bf16.msra.mxu0 %v5255_v29  ;;  %5288 = vmatpush3.bf16.msra.mxu1 %v5285_v32  ;;  %v5275_v32 = vpack.c.bf16 %v1905_v30, %v1902_v50  ;;  %v1921_v29 = vld [vmem:[#allocation13 + $0x68] sm:$0xff]  ;;  %v1916_v50 = vld [vmem:[#allocation13 + $0x40] sm:$0xff]  ;;  %v1919_v30 = vld [vmem:[#allocation13 + $0x58] sm:$0xff] }
 0x7f1   :  { %5258 = vmatprep.subr.bf16.mxu0 %v5257_v34  ;;  %5290 = vmatprep.subr.bf16.mxu1 %v5289_v43  ;;  %v1924_v34 = vld [vmem:[#allocation13 + $0x80] sm:$0xff] }
 0x7f4   :  { %5260 = vmatpush1.bf16.msra.mxu0 %v5259_v2  ;;  %5292 = vmatpush3.bf16.msra.mxu1 %v5289_v43  ;;  %v7029_v43 = vpack.c.bf16 %v1924_v34, %v1921_v29  ;;  %v1926_v2 = vld [vmem:[#allocation13 + $0x90] sm:$0xff]  ;;  %v7081_v29 = vpack.c.bf16 %v1937_v16, %v1934_v37  ;;  %v1940_v34 = vld [vmem:[#allocation13 + $0x100] sm:$0xff] }
 0x7f5   :  { %5262 = vmatprep.subr.bf16.mxu0 %v5261_v7  ;;  %5294 = vmatprep.subr.bf16.mxu1 %v5293_v8  ;;  %v1929_v7 = vld [vmem:[#allocation13 + $0xa8] sm:$0xff]  ;;  %v7085_v51 = vpack.c.bf16 %v1943_v45, %v1940_v34  ;;  %v1956_v16 = vld [vmem:[#allocation15] sm:$0x7] }
 0x7f6   :  { %v1970_v34 = vrot.slane %v1956_v16, %v6696_v13 }
 0x7f8   :  { %5264 = vmatpush1.bf16.msra.mxu0 %v5263_v35  ;;  %5296 = vmatpush3.bf16.msra.mxu1 %v5293_v8  ;;  %v7037_v8 = vpack.c.bf16 %v1929_v7, %v1926_v2  ;;  %v1939_v35 = vld [vmem:[#allocation13 + $0xf8] sm:$0xff]  ;;  %v7089_v2 = vpack.c.bf16 %v1949_v59, %v1946_v58  ;;  %v1952_v7 = vld [vmem:[#allocation13 + $0x160] sm:$0xff] }
 0x7f9   :  { %5266 = vmatprep.subr.bf16.mxu0 %v5265_v38  ;;  %5298 = vmatprep.subr.bf16.mxu1 %v5297_v41  ;;  %v1942_v38 = vld [vmem:[#allocation13 + $0x110] sm:$0xff]  ;;  %v7093_v15 = vpack.c.bf16 %v1955_v12, %v1952_v7 }
 0x7fc   :  { %5268 = vmatpush1.bf16.msra.mxu0 %v5267_v60  ;;  %5300 = vmatpush3.bf16.msra.mxu1 %v5297_v41  ;;  %v7047_v41 = vpack.c.bf16 %v1942_v38, %v1939_v35  ;;  %v7052_v60 = vpack.c.bf16 %v1948_v54, %v1945_v47 }
 0x7fd   :  { %5270 = vmatprep.subr.bf16.mxu0 %v5269_v18  ;;  %5302 = vmatprep.subr.bf16.mxu1 %v5301_v25  ;;  %v1947_v18 = vld [vmem:[#allocation13 + $0x138] sm:$0xff] }
 0x7fe   :  { %v7055_v4 = vpack.c.bf16 %v1947_v18, %v1944_v63 }
 0x800   :  { %5272 = vmatpush1.bf16.msra.mxu0 %v5271_v9  ;;  %5304 = vmatpush3.bf16.msra.mxu1 %v5301_v25  ;;  %v1910_v25 = vld [vmem:[#allocation13 + $0x10] sm:$0xff] }
 0x801   :  { %5274 = vmatprep.subr.bf16.mxu0 %v5273_v10  ;;  %5306 = vmatprep.subr.bf16.mxu1 %v5305_v23  ;;  %v7057_v5 = vpack.c.bf16 %v1913_v55, %v1910_v25  ;;  %v1950_v9 = vld [vmem:[#allocation13 + $0x150] sm:$0xff]  ;;  %v1953_v10 = vld [vmem:[#allocation13 + $0x168] sm:$0xff] }
 0x804   :  { %5276 = vmatpush1.bf16.msra.mxu0 %v5275_v32  ;;  %5308 = vmatpush3.bf16.msra.mxu1 %v5305_v23  ;;  %v7066_v23 = vpack.c.bf16 %v1953_v10, %v1950_v9  ;;  %v7068_v32 = vpack.c.bf16 %v1919_v30, %v1916_v50 }
 0x805   :  { %5341 = vmatprep.subr.bf16.mxu1 %v6282_v17 }
 0x807   :  { %2047 = vmatmul.mubr.f32.vlgmr.msra.gmra.mrb[16].mxu0 %v6720_v36  ;;  %4446 = vmatmul.mubr.f32.vlgmr.msra.gmra.mrb[26].mxu1 %v6772_v26  ;;  %v1909_v36 = vld [vmem:[#allocation13 + $0x8] sm:$0xff] }
 0x808   :  { %4448 = vmatprep.mubr.f32.mxu1 %v6816_v22  ;;  %2052 = vmatprep.mubr.f32.mxu0 %v6281_v0 }
 0x809   :  { %5343 = vmatpush3.bf16.msra.mxu1 %v7057_v5 }
 0x80a   :  { %5344 = vmatprep.subr.bf16.mxu1 %v6282_v17 }
 0x80b   :  { %2053 = vmatmul.mubr.f32.gmra.mrb[18].mxu0 %v6772_v26  ;;  %4449 = vmatmul.mubr.f32.gmra.mrb[28].mxu1 %v6860_v62  ;;  %v1912_v26 = vld [vmem:[#allocation13 + $0x20] sm:$0xff] }
 0x80c   :  { %4451 = vmatprep.mubr.f32.mxu1 %v6904_v56  ;;  %2058 = vmatprep.mubr.f32.mxu0 %v6281_v0 }
 0x80d   :  { %5346 = vmatpush3.bf16.msra.mxu1 %v7068_v32 }
 0x80e   :  { %5347 = vmatprep.subr.bf16.mxu1 %v6282_v17 }
 0x80f   :  { %2059 = vmatmul.mubr.f32.gmra.mrb[20].mxu0 %v6816_v22  ;;  %4452 = vmatmul.mubr.f32.gmra.mrb[30].mxu1 %v6948_v39  ;;  %v7017_v22 = vpack.c.bf16 %v1912_v26, %v1909_v36  ;;  %v1922_v36 = vld [vmem:[#allocation13 + $0x70] sm:$0xff]  ;;  %v1925_v26 = vld [vmem:[#allocation13 + $0x88] sm:$0xff] }
 0x810   :  { %4454 = vmatprep.mubr.f32.mxu1 %v6990_v3  ;;  %2064 = vmatprep.mubr.f32.mxu0 %v6281_v0 }
 0x811   :  { %5310 = vmatprep.subr.bf16.mxu0 %v7017_v22 }
 0x813   :  { %2065 = vmatmul.mubr.f32.gmra.mrb[22].mxu0 %v6860_v62  ;;  %v1911_v62 = vld [vmem:[#allocation13 + $0x18] sm:$0xff] }
 0x814   :  { %2070 = vmatprep.mubr.f32.mxu0 %v6281_v0  ;;  %v7019_v52 = vpack.c.bf16 %v1911_v62, %v1908_v33  ;;  %v1928_v33 = vld [vmem:[#allocation13 + $0xa0] sm:$0xff]  ;;  %v7074_v62 = vpack.c.bf16 %v1925_v26, %v1922_v36 }
 0x816   :  { %5312 = vmatpush1.bf16.msra.mxu0 %v7019_v52  ;;  %5349 = vmatpush3.bf16.msra.mxu1 %v7074_v62 }
 0x817   :  { %2071 = vmatmul.mubr.f32.gmra.mrb[24].mxu0 %v6904_v56  ;;  %v1915_v56 = vld [vmem:[#allocation13 + $0x38] sm:$0xff]  ;;  %5350 = vmatprep.subr.bf16.mxu1 %v6282_v17 }
 0x818   :  { %2076 = vmatprep.mubr.f32.mxu0 %v6281_v0 }
 0x81b   :  { %2077 = vmatmul.mubr.f32.gmra.mrb[26].mxu0 %v6948_v39  ;;  %v1918_v39 = vld [vmem:[#allocation13 + $0x50] sm:$0xff] }
 0x81c   :  { %2082 = vmatprep.mubr.f32.mxu0 %v6281_v0  ;;  %v7023_v20 = vpack.c.bf16 %v1918_v39, %v1915_v56  ;;  %v1931_v56 = vld [vmem:[#allocation13 + $0xb8] sm:$0xff] }
 0x81d   :  { %v7077_v39 = vpack.c.bf16 %v1931_v56, %v1928_v33 }
 0x81e   :  { %5314 = vmatprep.subr.bf16.mxu0 %v7023_v20 }
 0x81f   :  { %2083 = vmatmul.mubr.f32.gmra.mrb[28].mxu0 %v6990_v3  ;;  %5352 = vmatpush3.bf16.msra.mxu1 %v7077_v39 }
 0x820   :  { %2088 = vmatprep.mubr.f32.mxu0 %v6281_v0  ;;  %5316 = vmatpush1.bf16.msra.mxu0 %v7025_v19 }
 0x821   :  { %5318 = vmatprep.subr.bf16.mxu0 %v7029_v43  ;;  %5353 = vmatprep.subr.bf16.mxu1 %v6282_v17 }
 0x823   :  { %5355 = vmatpush3.bf16.msra.mxu1 %v7081_v29 }
 0x824   :  { %5320 = vmatpush1.bf16.msra.mxu0 %v7031_v53  ;;  %5356 = vmatprep.subr.bf16.mxu1 %v6282_v17 }
 0x825   :  { %5322 = vmatprep.subr.bf16.mxu0 %v7035_v1 }
 0x827   :  { %5358 = vmatpush3.bf16.msra.mxu1 %v7085_v51 }
 0x828   :  { %5324 = vmatpush1.bf16.msra.mxu0 %v7037_v8  ;;  %5359 = vmatprep.subr.bf16.mxu1 %v6282_v17 }
 0x829   :  { %5326 = vmatprep.subr.bf16.mxu0 %v7041_v21 }
 0x82b   :  { %5361 = vmatpush3.bf16.msra.mxu1 %v7089_v2 }
 0x82c   :  { %5328 = vmatpush1.bf16.msra.mxu0 %v7043_v31  ;;  %5362 = vmatprep.subr.bf16.mxu1 %v6282_v17 }
 0x82d   :  { %5330 = vmatprep.subr.bf16.mxu0 %v7047_v41 }
 0x82f   :  { %5364 = vmatpush3.bf16.msra.mxu1 %v7093_v15 }
 0x830   :  { %5332 = vmatpush1.bf16.msra.mxu0 %v7049_v42  ;;  %5397 = vmatprep.subr.bf16.mxu1 %v6282_v17 }
 0x831   :  { %5334 = vmatprep.subr.bf16.mxu0 %v7052_v60 }
 0x834   :  { %5336 = vmatpush1.bf16.msra.mxu0 %v7055_v4 }
 0x835   :  { %5338 = vmatprep.subr.bf16.mxu0 %v7060_v28 }
 0x838   :  { %5340 = vmatpush1.bf16.msra.mxu0 %v7066_v23 }
 0x839   :  { %5366 = vmatprep.subr.bf16.mxu0 %v7017_v22 }
 0x8ba   :  { %v1763_v24 = vpop.f32.mrb[14].mxu0  ;;  %v1834_v27 = vpop.f32.mrb[24].mxu1 }
 0x8bb   :  { %v5820_v35 = vadd.f32 %v6761_v48, %v1763_v24  ;;  %v1765_v38 = vpop.f32.mrb[15].mxu0  ;;  %v4412_v61 = vpop.f32.mrb[25].mxu1  ;;  %v1835_v55 = vadd.f32 %v1834_v27, %v6717_v49  ;;  %v1974_v27 = vrot.slane %v1956_v16, %v6698_v14 }
 0x8bc   :  { %v5822_v47 = vadd.f32 %v6766_v44, %v1765_v38 }
 0x8bd   :  { %v3762_v40 = vmul.f32 -1.442695, %v5820_v35 }
 0x8be   :  { %v3763_v54 = vmul.f32 -1.442695, %v5822_v47 }
 0x8bf   :  { %5971 = vpow2.f32 %v3762_v40 }
 0x8c0   :  { %5973 = vpow2.f32 %v3763_v54 }
 0x8c9   :  { %v5972_v63 = vpop.eup %5971 }
 0x8ca   :  { %v1842_v18 = vadd.f32 1.0, %v5972_v63  ;;  %v5974_v25 = vpop.eup %5973 }
 0x8cb   :  { %v1849_v10 = vadd.f32 1.0, %v5974_v25 }
 0x8cc   :  { %5975 = vrcp.f32 %v1842_v18 }
 0x8d6   :  { %v5976_v11 = vpop.eup %5975 }
 0x8d7   :  { %v1852_v57 = vmul.f32 %v5976_v11, %v1835_v55 }
 0x8d9   :  { %v1853_v9 = vadd.f32 %v1852_v57, %v6692_v6 }
 0x8da   :  { %v7102_v48 = vpop.f32.mrb[26].mxu1 }
 0x8db   :  { %5977 = vtanh.f32 %v1853_v9  ;;  %v7104_v50 = vpop.f32.mrb[27].mxu1 }
 0x8dc   :  { %5979 = vrcp.f32 %v1849_v10 }
 0x8de   :  { %v7106_v44 = vpop.f32.mrb[28].mxu1 }
 0x8df   :  { %v7108_v30 = vpop.f32.mrb[29].mxu1 }
 0x8e2   :  { %v7110_v36 = vpop.f32.mrb[30].mxu1 }
 0x8e3   :  { %v7112_v26 = vpop.f32.mrb[31].mxu1 }
 0x8e5   :  { %v5978_v49 = vpop.eup %5977 }
 0x8e6   :  { %v1855_v33 = vsub.f32 %v6990_v3, %v5978_v49  ;;  %v5980_v56 = vpop.eup %5979  ;;  %v1957_v3 = vld [vmem:[#allocation16] sm:$0x7] }
 0x8e7   :  { %v2228_v45 = vrot.slane %v1957_v3, %v6696_v13  ;;  %v2232_v35 = vrot.slane %v1957_v3, %v6698_v14  ;;  %v7170_v55 = vrot.slane %v1957_v3, %v6679_v46  ;;  %v7173_v14 = vrot.slane %v1956_v16, %v6679_v46 }
 0x8e8   :  { %v1856_v6 = vmul.f32 %v5980_v56, %v1855_v33 }
 0x8e9   :  { %v7159_v59 = vadd.f32 %v2228_v45, %v1970_v34  ;;  %v7166_v54 = vadd.f32 %v2232_v35, %v1974_v27  ;;  %v2162_v10 = vadd.f32 %v7104_v50, %v7173_v14 }
 0x8ea   :  { %v1857_v37 = vadd.f32 %v5978_v49, %v1856_v6 }
 0x8ec   :  { %2089 = vmatmul.mubr.f32.gmra.mrb[30].mxu0 %v1857_v37  ;;  %4455 = vmatmul.mubr.f32.gmra.mrb[32].mxu1 %v1857_v37 }
 0x8ed   :  { %2307 = vmatprep.mubr.f32.mxu0 %v6281_v0  ;;  %4489 = vmatprep.mubr.msk.f32.mxu1 %vm6283_vm1, %v6281_v0 }
 0x8f0   :  { %2308 = vmatmul.mubr.f32.vlgmr.msra.gmra.mrb[16].mxu0 %v6281_v0  ;;  %4490 = vmatmul.mubr.f32.vlgmr.msra.gmra.mrb[34].mxu1 %v6281_v0 }
 0x8f1   :  { %5368 = vmatpush1.bf16.msra.mxu0 %v7019_v52  ;;  %5399 = vmatpush3.bf16.msra.mxu1 %v7057_v5 }
 0x8f2   :  { %5370 = vmatprep.subr.bf16.mxu0 %v7023_v20  ;;  %5400 = vmatprep.subr.bf16.mxu1 %v6282_v17 }
 0x8f3   :  { %2472 = vmatprep.mubr.f32.mxu0 %v6281_v0  ;;  %4524 = vmatprep.mubr.msk.f32.mxu1 %vm6283_vm1, %v6281_v0 }
 0x8f5   :  { %5372 = vmatpush1.bf16.msra.mxu0 %v7025_v19  ;;  %5402 = vmatpush3.bf16.msra.mxu1 %v7068_v32 }
 0x8f6   :  { %5374 = vmatprep.subr.bf16.mxu0 %v7029_v43  ;;  %5403 = vmatprep.subr.bf16.mxu1 %v6282_v17 }
 0x8f9   :  { %5376 = vmatpush1.bf16.msra.mxu0 %v7031_v53  ;;  %5405 = vmatpush3.bf16.msra.mxu1 %v7074_v62 }
 0x8fa   :  { %5378 = vmatprep.subr.bf16.mxu0 %v7035_v1  ;;  %5406 = vmatprep.subr.bf16.mxu1 %v6282_v17 }
 0x8fd   :  { %5380 = vmatpush1.bf16.msra.mxu0 %v7037_v8  ;;  %5408 = vmatpush3.bf16.msra.mxu1 %v7077_v39 }
 0x8fe   :  { %5382 = vmatprep.subr.bf16.mxu0 %v7041_v21  ;;  %5409 = vmatprep.subr.bf16.mxu1 %v6282_v17 }
 0x901   :  { %5384 = vmatpush1.bf16.msra.mxu0 %v7043_v31  ;;  %5411 = vmatpush3.bf16.msra.mxu1 %v7081_v29 }
 0x902   :  { %5386 = vmatprep.subr.bf16.mxu0 %v7047_v41  ;;  %5412 = vmatprep.subr.bf16.mxu1 %v6282_v17 }
 0x905   :  { %5388 = vmatpush1.bf16.msra.mxu0 %v7049_v42  ;;  %5414 = vmatpush3.bf16.msra.mxu1 %v7085_v51 }
 0x906   :  { %5390 = vmatprep.subr.bf16.mxu0 %v7052_v60  ;;  %5415 = vmatprep.subr.bf16.mxu1 %v6282_v17 }
 0x909   :  { %5392 = vmatpush1.bf16.msra.mxu0 %v7055_v4  ;;  %5417 = vmatpush3.bf16.msra.mxu1 %v7089_v2 }
 0x90a   :  { %5394 = vmatprep.subr.bf16.mxu0 %v7060_v28  ;;  %5418 = vmatprep.subr.bf16.mxu1 %v6282_v17 }
 0x90d   :  { %5396 = vmatpush1.bf16.msra.mxu0 %v7066_v23  ;;  %5420 = vmatpush3.bf16.msra.mxu1 %v7093_v15 }
 0x90e   :  { %5422 = vmatprep.subr.bf16.mxu0 %v7017_v22  ;;  %5453 = vmatprep.subr.bf16.mxu1 %v6282_v17 }
 0x9bf   :  { %v7157_v58 = vpop.f32.mrb[32].mxu1 }
 0x9c0   :  { %v7161_v7 = vpop.f32.mrb[33].mxu1 }
 0x9c3   :  { %v2309_v12 = vpop.f32.mrb[16].mxu0  ;;  %v2380_v24 = vpop.f32.mrb[34].mxu1 }
 0x9c4   :  { %v5824_v38 = vadd.f32 %v7159_v59, %v2309_v12  ;;  %v2311_v61 = vpop.f32.mrb[17].mxu0  ;;  %v4491_v40 = vpop.f32.mrb[35].mxu1  ;;  %v2381_v11 = vadd.f32 %v2380_v24, %v7170_v55 }
 0x9c5   :  { %v5826_v13 = vadd.f32 %v7166_v54, %v2311_v61 }
 0x9c6   :  { %v3764_v47 = vmul.f32 -1.442695, %v5824_v38 }
 0x9c7   :  { %v3765_v63 = vmul.f32 -1.442695, %v5826_v13 }
 0x9c8   :  { %5981 = vpow2.f32 %v3764_v47 }
 0x9c9   :  { %5983 = vpow2.f32 %v3765_v63 }
 0x9d2   :  { %v5982_v18 = vpop.eup %5981 }
 0x9d3   :  { %v2388_v25 = vadd.f32 1.0, %v5982_v18  ;;  %v5984_v57 = vpop.eup %5983  ;;  %v2167_v18 = vadd.f32 %v7102_v48, %v7173_v14 }
 0x9d4   :  { %v2395_v33 = vadd.f32 1.0, %v5984_v57 }
 0x9d5   :  { %5985 = vrcp.f32 %v2388_v25 }
 0x9df   :  { %v5986_v9 = vpop.eup %5985 }
 0x9e0   :  { %v2398_v49 = vmul.f32 %v5986_v9, %v2381_v11 }
 0x9e2   :  { %v2399_v56 = vadd.f32 %v2398_v49, %v2162_v10 }
 0x9e4   :  { %5987 = vtanh.f32 %v2399_v56 }
 0x9e5   :  { %5989 = vrcp.f32 %v2395_v33 }
 0x9ee   :  { %v5988_v6 = vpop.eup %5987 }
 0x9ef   :  { %v2401_v37 = vsub.f32 0.0, %v5988_v6  ;;  %v5990_v34 = vpop.eup %5989 }
 0x9f1   :  { %v2402_v3 = vmul.f32 %v5990_v34, %v2401_v37 }
 0x9f3   :  { %v7178_v45 = vadd.f32 %v5988_v6, %v2402_v3 }
 0x9f5   :  { %2473 = vmatmul.mubr.f32.vlgmr.msra.gmra.mrb[18].mxu0 %v7178_v45  ;;  %4525 = vmatmul.mubr.f32.vlgmr.msra.gmra.mrb[36].mxu1 %v7178_v45 }
 0x9f6   :  { %5424 = vmatpush1.bf16.msra.mxu0 %v7019_v52  ;;  %5455 = vmatpush3.bf16.msra.mxu1 %v7057_v5 }
 0x9f7   :  { %5426 = vmatprep.subr.bf16.mxu0 %v7023_v20  ;;  %5456 = vmatprep.subr.bf16.mxu1 %v6282_v17 }
 0x9f8   :  { %2637 = vmatprep.mubr.f32.mxu0 %v6281_v0  ;;  %4559 = vmatprep.mubr.msk.f32.mxu1 %vm6283_vm1, %v6281_v0 }
 0x9fa   :  { %5428 = vmatpush1.bf16.msra.mxu0 %v7025_v19  ;;  %5458 = vmatpush3.bf16.msra.mxu1 %v7068_v32 }
 0x9fb   :  { %5430 = vmatprep.subr.bf16.mxu0 %v7029_v43  ;;  %5459 = vmatprep.subr.bf16.mxu1 %v6282_v17 }
 0x9fe   :  { %5432 = vmatpush1.bf16.msra.mxu0 %v7031_v53  ;;  %5461 = vmatpush3.bf16.msra.mxu1 %v7074_v62 }
 0x9ff   :  { %5434 = vmatprep.subr.bf16.mxu0 %v7035_v1  ;;  %5462 = vmatprep.subr.bf16.mxu1 %v6282_v17 }
 0xa02   :  { %5436 = vmatpush1.bf16.msra.mxu0 %v7037_v8  ;;  %5464 = vmatpush3.bf16.msra.mxu1 %v7077_v39 }
 0xa03   :  { %5438 = vmatprep.subr.bf16.mxu0 %v7041_v21  ;;  %5465 = vmatprep.subr.bf16.mxu1 %v6282_v17 }
 0xa06   :  { %5440 = vmatpush1.bf16.msra.mxu0 %v7043_v31  ;;  %5467 = vmatpush3.bf16.msra.mxu1 %v7081_v29 }
 0xa07   :  { %5442 = vmatprep.subr.bf16.mxu0 %v7047_v41  ;;  %5468 = vmatprep.subr.bf16.mxu1 %v6282_v17 }
 0xa0a   :  { %5444 = vmatpush1.bf16.msra.mxu0 %v7049_v42  ;;  %5470 = vmatpush3.bf16.msra.mxu1 %v7085_v51 }
 0xa0b   :  { %5446 = vmatprep.subr.bf16.mxu0 %v7052_v60  ;;  %5471 = vmatprep.subr.bf16.mxu1 %v6282_v17 }
 0xa0e   :  { %5448 = vmatpush1.bf16.msra.mxu0 %v7055_v4  ;;  %5473 = vmatpush3.bf16.msra.mxu1 %v7089_v2 }
 0xa0f   :  { %5450 = vmatprep.subr.bf16.mxu0 %v7060_v28  ;;  %5474 = vmatprep.subr.bf16.mxu1 %v6282_v17 }
 0xa12   :  { %5452 = vmatpush1.bf16.msra.mxu0 %v7066_v23  ;;  %5476 = vmatpush3.bf16.msra.mxu1 %v7093_v15 }
 0xa13   :  { %5478 = vmatprep.subr.bf16.mxu0 %v7017_v22  ;;  %5509 = vmatprep.subr.bf16.mxu1 %v6282_v17 }
 0xac8   :  { %v2474_v46 = vpop.f32.mrb[18].mxu0  ;;  %v2545_v50 = vpop.f32.mrb[36].mxu1 }
 0xac9   :  { %v5828_v16 = vadd.f32 %v7159_v59, %v2474_v46  ;;  %v2476_v12 = vpop.f32.mrb[19].mxu0  ;;  %v4526_v24 = vpop.f32.mrb[37].mxu1  ;;  %v2546_v13 = vadd.f32 %v2545_v50, %v7170_v55 }
 0xaca   :  { %v5830_v35 = vadd.f32 %v7166_v54, %v2476_v12 }
 0xacb   :  { %v3766_v27 = vmul.f32 -1.442695, %v5828_v16 }
 0xacc   :  { %v3767_v38 = vmul.f32 -1.442695, %v5830_v35 }
 0xacd   :  { %5991 = vpow2.f32 %v3766_v27 }
 0xace   :  { %5993 = vpow2.f32 %v3767_v38 }
 0xad7   :  { %v5992_v61 = vpop.eup %5991 }
 0xad8   :  { %v2553_v40 = vadd.f32 1.0, %v5992_v61  ;;  %v5994_v47 = vpop.eup %5993  ;;  %v2172_v61 = vadd.f32 %v7108_v30, %v7173_v14 }
 0xad9   :  { %v2560_v57 = vadd.f32 1.0, %v5994_v47 }
 0xada   :  { %5995 = vrcp.f32 %v2553_v40 }
 0xae4   :  { %v5996_v63 = vpop.eup %5995 }
 0xae5   :  { %v2563_v25 = vmul.f32 %v5996_v63, %v2546_v13 }
 0xae7   :  { %v2564_v11 = vadd.f32 %v2563_v25, %v2167_v18 }
 0xae9   :  { %5997 = vtanh.f32 %v2564_v11 }
 0xaea   :  { %5999 = vrcp.f32 %v2560_v57 }
 0xaf3   :  { %v5998_v9 = vpop.eup %5997 }
 0xaf4   :  { %v2566_v10 = vsub.f32 %v7178_v45, %v5998_v9  ;;  %v6000_v49 = vpop.eup %5999 }
 0xaf6   :  { %v2567_v33 = vmul.f32 %v6000_v49, %v2566_v10 }
 0xaf8   :  { %v7223_v56 = vadd.f32 %v5998_v9, %v2567_v33 }
 0xafa   :  { %2638 = vmatmul.mubr.f32.vlgmr.msra.gmra.mrb[20].mxu0 %v7223_v56  ;;  %4560 = vmatmul.mubr.f32.vlgmr.msra.gmra.mrb[38].mxu1 %v7223_v56 }
 0xafb   :  { %5480 = vmatpush1.bf16.msra.mxu0 %v7019_v52  ;;  %5511 = vmatpush3.bf16.msra.mxu1 %v7057_v5 }
 0xafc   :  { %5482 = vmatprep.subr.bf16.mxu0 %v7023_v20  ;;  %5512 = vmatprep.subr.bf16.mxu1 %v6282_v17 }
 0xafd   :  { %2802 = vmatprep.mubr.f32.mxu0 %v6281_v0  ;;  %4594 = vmatprep.mubr.msk.f32.mxu1 %vm6283_vm1, %v6281_v0 }
 0xaff   :  { %5484 = vmatpush1.bf16.msra.mxu0 %v7025_v19  ;;  %5514 = vmatpush3.bf16.msra.mxu1 %v7068_v32 }
 0xb00   :  { %5486 = vmatprep.subr.bf16.mxu0 %v7029_v43  ;;  %5515 = vmatprep.subr.bf16.mxu1 %v6282_v17 }
 0xb03   :  { %5488 = vmatpush1.bf16.msra.mxu0 %v7031_v53  ;;  %5517 = vmatpush3.bf16.msra.mxu1 %v7074_v62 }
 0xb04   :  { %5490 = vmatprep.subr.bf16.mxu0 %v7035_v1  ;;  %5518 = vmatprep.subr.bf16.mxu1 %v6282_v17 }
 0xb07   :  { %5492 = vmatpush1.bf16.msra.mxu0 %v7037_v8  ;;  %5520 = vmatpush3.bf16.msra.mxu1 %v7077_v39 }
 0xb08   :  { %5494 = vmatprep.subr.bf16.mxu0 %v7041_v21  ;;  %5521 = vmatprep.subr.bf16.mxu1 %v6282_v17 }
 0xb0b   :  { %5496 = vmatpush1.bf16.msra.mxu0 %v7043_v31  ;;  %5523 = vmatpush3.bf16.msra.mxu1 %v7081_v29 }
 0xb0c   :  { %5498 = vmatprep.subr.bf16.mxu0 %v7047_v41  ;;  %5524 = vmatprep.subr.bf16.mxu1 %v6282_v17 }
 0xb0f   :  { %5500 = vmatpush1.bf16.msra.mxu0 %v7049_v42  ;;  %5526 = vmatpush3.bf16.msra.mxu1 %v7085_v51 }
 0xb10   :  { %5502 = vmatprep.subr.bf16.mxu0 %v7052_v60  ;;  %5527 = vmatprep.subr.bf16.mxu1 %v6282_v17 }
 0xb13   :  { %5504 = vmatpush1.bf16.msra.mxu0 %v7055_v4  ;;  %5529 = vmatpush3.bf16.msra.mxu1 %v7089_v2 }
 0xb14   :  { %5506 = vmatprep.subr.bf16.mxu0 %v7060_v28  ;;  %5530 = vmatprep.subr.bf16.mxu1 %v6282_v17 }
 0xb17   :  { %5508 = vmatpush1.bf16.msra.mxu0 %v7066_v23  ;;  %5532 = vmatpush3.bf16.msra.mxu1 %v7093_v15 }
 0xb18   :  { %5534 = vmatprep.subr.bf16.mxu0 %v7017_v22  ;;  %5565 = vmatprep.subr.bf16.mxu1 %v6282_v17 }
 0xbcd   :  { %v2639_v48 = vpop.f32.mrb[20].mxu0  ;;  %v2710_v6 = vpop.f32.mrb[38].mxu1 }
 0xbce   :  { %v5832_v37 = vadd.f32 %v7159_v59, %v2639_v48  ;;  %v2641_v34 = vpop.f32.mrb[21].mxu0  ;;  %v4561_v3 = vpop.f32.mrb[39].mxu1  ;;  %v2711_v35 = vadd.f32 %v2710_v6, %v7170_v55 }
 0xbcf   :  { %v5834_v50 = vadd.f32 %v7166_v54, %v2641_v34 }
 0xbd0   :  { %v3768_v46 = vmul.f32 -1.442695, %v5832_v37 }
 0xbd1   :  { %v3769_v16 = vmul.f32 -1.442695, %v5834_v50 }
 0xbd2   :  { %6001 = vpow2.f32 %v3768_v46 }
 0xbd3   :  { %6003 = vpow2.f32 %v3769_v16 }
 0xbdc   :  { %v6002_v12 = vpop.eup %6001 }
 0xbdd   :  { %v2718_v24 = vadd.f32 1.0, %v6002_v12  ;;  %v6004_v27 = vpop.eup %6003  ;;  %v2177_v12 = vadd.f32 %v7106_v44, %v7173_v14 }
 0xbde   :  { %v2725_v13 = vadd.f32 1.0, %v6004_v27 }
 0xbdf   :  { %6005 = vrcp.f32 %v2718_v24 }
 0xbe9   :  { %v6006_v38 = vpop.eup %6005 }
 0xbea   :  { %v2728_v40 = vmul.f32 %v6006_v38, %v2711_v35 }
 0xbec   :  { %v2729_v47 = vadd.f32 %v2728_v40, %v2172_v61 }
 0xbee   :  { %6007 = vtanh.f32 %v2729_v47 }
 0xbef   :  { %6009 = vrcp.f32 %v2725_v13 }
 0xbf8   :  { %v6008_v63 = vpop.eup %6007 }
 0xbf9   :  { %v2731_v18 = vsub.f32 %v7223_v56, %v6008_v63  ;;  %v6010_v25 = vpop.eup %6009 }
 0xbfb   :  { %v2732_v11 = vmul.f32 %v6010_v25, %v2731_v18 }
 0xbfd   :  { %v7268_v57 = vadd.f32 %v6008_v63, %v2732_v11 }
 0xbff   :  { %2803 = vmatmul.mubr.f32.vlgmr.msra.gmra.mrb[22].mxu0 %v7268_v57  ;;  %4595 = vmatmul.mubr.f32.vlgmr.msra.gmra.mrb[40].mxu1 %v7268_v57 }
 0xc00   :  { %5536 = vmatpush1.bf16.msra.mxu0 %v7019_v52  ;;  %5567 = vmatpush3.bf16.msra.mxu1 %v7057_v5 }
 0xc01   :  { %5538 = vmatprep.subr.bf16.mxu0 %v7023_v20  ;;  %5568 = vmatprep.subr.bf16.mxu1 %v6282_v17 }
 0xc02   :  { %2967 = vmatprep.mubr.f32.mxu0 %v6281_v0  ;;  %4629 = vmatprep.mubr.msk.f32.mxu1 %vm6283_vm1, %v6281_v0 }
 0xc04   :  { %5540 = vmatpush1.bf16.msra.mxu0 %v7025_v19  ;;  %5570 = vmatpush3.bf16.msra.mxu1 %v7068_v32 }
 0xc05   :  { %5542 = vmatprep.subr.bf16.mxu0 %v7029_v43  ;;  %5571 = vmatprep.subr.bf16.mxu1 %v6282_v17 }
 0xc08   :  { %5544 = vmatpush1.bf16.msra.mxu0 %v7031_v53  ;;  %5573 = vmatpush3.bf16.msra.mxu1 %v7074_v62 }
 0xc09   :  { %5546 = vmatprep.subr.bf16.mxu0 %v7035_v1  ;;  %5574 = vmatprep.subr.bf16.mxu1 %v6282_v17 }
 0xc0c   :  { %5548 = vmatpush1.bf16.msra.mxu0 %v7037_v8  ;;  %5576 = vmatpush3.bf16.msra.mxu1 %v7077_v39 }
 0xc0d   :  { %5550 = vmatprep.subr.bf16.mxu0 %v7041_v21  ;;  %5577 = vmatprep.subr.bf16.mxu1 %v6282_v17 }
 0xc10   :  { %5552 = vmatpush1.bf16.msra.mxu0 %v7043_v31  ;;  %5579 = vmatpush3.bf16.msra.mxu1 %v7081_v29 }
 0xc11   :  { %5554 = vmatprep.subr.bf16.mxu0 %v7047_v41  ;;  %5580 = vmatprep.subr.bf16.mxu1 %v6282_v17 }
 0xc14   :  { %5556 = vmatpush1.bf16.msra.mxu0 %v7049_v42  ;;  %5582 = vmatpush3.bf16.msra.mxu1 %v7085_v51 }
 0xc15   :  { %5558 = vmatprep.subr.bf16.mxu0 %v7052_v60  ;;  %5583 = vmatprep.subr.bf16.mxu1 %v6282_v17 }
 0xc18   :  { %5560 = vmatpush1.bf16.msra.mxu0 %v7055_v4  ;;  %5585 = vmatpush3.bf16.msra.mxu1 %v7089_v2 }
 0xc19   :  { %5562 = vmatprep.subr.bf16.mxu0 %v7060_v28  ;;  %5586 = vmatprep.subr.bf16.mxu1 %v6282_v17 }
 0xc1c   :  { %5564 = vmatpush1.bf16.msra.mxu0 %v7066_v23  ;;  %5588 = vmatpush3.bf16.msra.mxu1 %v7093_v15 }
 0xc1d   :  { %5590 = vmatprep.subr.bf16.mxu0 %v7017_v22  ;;  %5621 = vmatprep.subr.bf16.mxu1 %v6282_v17 }
 0xcd2   :  { %v2804_v30 = vpop.f32.mrb[22].mxu0  ;;  %v2875_v9 = vpop.f32.mrb[40].mxu1 }
 0xcd3   :  { %v5836_v10 = vadd.f32 %v7159_v59, %v2804_v30  ;;  %v2806_v49 = vpop.f32.mrb[23].mxu0  ;;  %v4596_v33 = vpop.f32.mrb[41].mxu1  ;;  %v2876_v50 = vadd.f32 %v2875_v9, %v7170_v55 }
 0xcd4   :  { %v5838_v6 = vadd.f32 %v7166_v54, %v2806_v49 }
 0xcd5   :  { %v3770_v48 = vmul.f32 -1.442695, %v5836_v10 }
 0xcd6   :  { %v3771_v37 = vmul.f32 -1.442695, %v5838_v6 }
 0xcd7   :  { %6011 = vpow2.f32 %v3770_v48 }
 0xcd8   :  { %6013 = vpow2.f32 %v3771_v37 }
 0xce1   :  { %v6012_v34 = vpop.eup %6011 }
 0xce2   :  { %v2883_v3 = vadd.f32 1.0, %v6012_v34  ;;  %v6014_v46 = vpop.eup %6013  ;;  %v2182_v34 = vadd.f32 %v7112_v26, %v7173_v14 }
 0xce3   :  { %v2890_v35 = vadd.f32 1.0, %v6014_v46 }
 0xce4   :  { %6015 = vrcp.f32 %v2883_v3 }
 0xcee   :  { %v6016_v16 = vpop.eup %6015 }
 0xcef   :  { %v2893_v24 = vmul.f32 %v6016_v16, %v2876_v50 }
 0xcf1   :  { %v2894_v27 = vadd.f32 %v2893_v24, %v2177_v12 }
 0xcf3   :  { %6017 = vtanh.f32 %v2894_v27 }
 0xcf4   :  { %6019 = vrcp.f32 %v2890_v35 }
 0xcfd   :  { %v6018_v38 = vpop.eup %6017 }
 0xcfe   :  { %v2896_v61 = vsub.f32 %v7268_v57, %v6018_v38  ;;  %v6020_v40 = vpop.eup %6019 }
 0xd00   :  { %v2897_v47 = vmul.f32 %v6020_v40, %v2896_v61 }
 0xd02   :  { %v7313_v13 = vadd.f32 %v6018_v38, %v2897_v47 }
 0xd04   :  { %2968 = vmatmul.mubr.f32.vlgmr.msra.gmra.mrb[24].mxu0 %v7313_v13  ;;  %4630 = vmatmul.mubr.f32.vlgmr.msra.gmra.mrb[42].mxu1 %v7313_v13 }
 0xd05   :  { %5592 = vmatpush1.bf16.msra.mxu0 %v7019_v52  ;;  %5623 = vmatpush3.bf16.msra.mxu1 %v7057_v5 }
 0xd06   :  { %5594 = vmatprep.subr.bf16.mxu0 %v7023_v20  ;;  %5624 = vmatprep.subr.bf16.mxu1 %v6282_v17 }
 0xd07   :  { %3132 = vmatprep.mubr.f32.mxu0 %v6281_v0  ;;  %4664 = vmatprep.mubr.msk.f32.mxu1 %vm6283_vm1, %v6281_v0 }
 0xd09   :  { %5596 = vmatpush1.bf16.msra.mxu0 %v7025_v19  ;;  %5626 = vmatpush3.bf16.msra.mxu1 %v7068_v32 }
 0xd0a   :  { %5598 = vmatprep.subr.bf16.mxu0 %v7029_v43  ;;  %5627 = vmatprep.subr.bf16.mxu1 %v6282_v17 }
 0xd0d   :  { %5600 = vmatpush1.bf16.msra.mxu0 %v7031_v53  ;;  %5629 = vmatpush3.bf16.msra.mxu1 %v7074_v62 }
 0xd0e   :  { %5602 = vmatprep.subr.bf16.mxu0 %v7035_v1  ;;  %5630 = vmatprep.subr.bf16.mxu1 %v6282_v17 }
 0xd11   :  { %5604 = vmatpush1.bf16.msra.mxu0 %v7037_v8  ;;  %5632 = vmatpush3.bf16.msra.mxu1 %v7077_v39 }
 0xd12   :  { %5606 = vmatprep.subr.bf16.mxu0 %v7041_v21  ;;  %5633 = vmatprep.subr.bf16.mxu1 %v6282_v17 }
 0xd15   :  { %5608 = vmatpush1.bf16.msra.mxu0 %v7043_v31  ;;  %5635 = vmatpush3.bf16.msra.mxu1 %v7081_v29 }
 0xd16   :  { %5610 = vmatprep.subr.bf16.mxu0 %v7047_v41  ;;  %5636 = vmatprep.subr.bf16.mxu1 %v6282_v17 }
 0xd19   :  { %5612 = vmatpush1.bf16.msra.mxu0 %v7049_v42  ;;  %5638 = vmatpush3.bf16.msra.mxu1 %v7085_v51 }
 0xd1a   :  { %5614 = vmatprep.subr.bf16.mxu0 %v7052_v60  ;;  %5639 = vmatprep.subr.bf16.mxu1 %v6282_v17 }
 0xd1d   :  { %5616 = vmatpush1.bf16.msra.mxu0 %v7055_v4  ;;  %5641 = vmatpush3.bf16.msra.mxu1 %v7089_v2 }
 0xd1e   :  { %5618 = vmatprep.subr.bf16.mxu0 %v7060_v28  ;;  %5642 = vmatprep.subr.bf16.mxu1 %v6282_v17 }
 0xd21   :  { %5620 = vmatpush1.bf16.msra.mxu0 %v7066_v23  ;;  %5644 = vmatpush3.bf16.msra.mxu1 %v7093_v15 }
 0xd22   :  { %5646 = vmatprep.subr.bf16.mxu0 %v7017_v22  ;;  %5677 = vmatprep.subr.bf16.mxu1 %v6282_v17 }
 0xdd7   :  { %v2969_v44 = vpop.f32.mrb[24].mxu0  ;;  %v3040_v63 = vpop.f32.mrb[42].mxu1 }
 0xdd8   :  { %v5840_v18 = vadd.f32 %v7159_v59, %v2969_v44  ;;  %v2971_v25 = vpop.f32.mrb[25].mxu0  ;;  %v4631_v11 = vpop.f32.mrb[43].mxu1  ;;  %v3041_v6 = vadd.f32 %v3040_v63, %v7170_v55 }
 0xdd9   :  { %v5842_v9 = vadd.f32 %v7166_v54, %v2971_v25 }
 0xdda   :  { %v3772_v30 = vmul.f32 -1.442695, %v5840_v18 }
 0xddb   :  { %v3773_v10 = vmul.f32 -1.442695, %v5842_v9 }
 0xddc   :  { %6021 = vpow2.f32 %v3772_v30 }
 0xddd   :  { %6023 = vpow2.f32 %v3773_v10  ;;  %v2187_v10 = vadd.f32 %v7110_v36, %v7173_v14 }
 0xde6   :  { %v6022_v49 = vpop.eup %6021 }
 0xde7   :  { %v3048_v33 = vadd.f32 1.0, %v6022_v49  ;;  %v6024_v48 = vpop.eup %6023 }
 0xde8   :  { %v3055_v50 = vadd.f32 1.0, %v6024_v48 }
 0xde9   :  { %6025 = vrcp.f32 %v3048_v33 }
 0xdf3   :  { %v6026_v37 = vpop.eup %6025 }
 0xdf4   :  { %v3058_v3 = vmul.f32 %v6026_v37, %v3041_v6 }
 0xdf6   :  { %v3059_v46 = vadd.f32 %v3058_v3, %v2182_v34 }
 0xdf8   :  { %6027 = vtanh.f32 %v3059_v46 }
 0xdf9   :  { %6029 = vrcp.f32 %v3055_v50 }
 0xe02   :  { %v6028_v16 = vpop.eup %6027 }
 0xe03   :  { %v3061_v12 = vsub.f32 %v7313_v13, %v6028_v16  ;;  %v6030_v24 = vpop.eup %6029 }
 0xe05   :  { %v3062_v27 = vmul.f32 %v6030_v24, %v3061_v12  ;;  %v3573_v12 = vld [vmem:[%s7535_s9 + $0x28] sm:$0xff] }
 0xe07   :  { %v7358_v35 = vadd.f32 %v6028_v16, %v3062_v27  ;;  %v3572_v16 = vld [vmem:[%s7535_s9 + $0x20] sm:$0xff]  ;;  %v3574_v27 = vld [vmem:[%s7535_s9 + $0x30] sm:$0xff] }
 0xe08   :  { %v5765_v24 = vpack.c.bf16 %v3573_v12, %v3572_v16 }
 0xe09   :  { %3133 = vmatmul.mubr.f32.vlgmr.msra.gmra.mrb[26].mxu0 %v7358_v35  ;;  %4665 = vmatmul.mubr.f32.vlgmr.msra.gmra.mrb[44].mxu1 %v7358_v35 }
 0xe0a   :  { %5648 = vmatpush1.bf16.msra.mxu0 %v7019_v52  ;;  %5679 = vmatpush3.bf16.msra.mxu1 %v7057_v5 }
 0xe0b   :  { %5650 = vmatprep.subr.bf16.mxu0 %v7023_v20  ;;  %5680 = vmatprep.subr.bf16.mxu1 %v6282_v17 }
 0xe0c   :  { %3297 = vmatprep.mubr.f32.mxu0 %v6281_v0  ;;  %4699 = vmatprep.mubr.msk.f32.mxu1 %vm6283_vm1, %v6281_v0 }
 0xe0e   :  { %5652 = vmatpush1.bf16.msra.mxu0 %v7025_v19  ;;  %5682 = vmatpush3.bf16.msra.mxu1 %v7068_v32 }
 0xe0f   :  { %5654 = vmatprep.subr.bf16.mxu0 %v7029_v43  ;;  %5683 = vmatprep.subr.bf16.mxu1 %v6282_v17 }
 0xe12   :  { %5656 = vmatpush1.bf16.msra.mxu0 %v7031_v53  ;;  %5685 = vmatpush3.bf16.msra.mxu1 %v7074_v62 }
 0xe13   :  { %5658 = vmatprep.subr.bf16.mxu0 %v7035_v1  ;;  %5686 = vmatprep.subr.bf16.mxu1 %v6282_v17 }
 0xe16   :  { %5660 = vmatpush1.bf16.msra.mxu0 %v7037_v8  ;;  %5688 = vmatpush3.bf16.msra.mxu1 %v7077_v39 }
 0xe17   :  { %5662 = vmatprep.subr.bf16.mxu0 %v7041_v21  ;;  %5689 = vmatprep.subr.bf16.mxu1 %v6282_v17 }
 0xe1a   :  { %5664 = vmatpush1.bf16.msra.mxu0 %v7043_v31  ;;  %5691 = vmatpush3.bf16.msra.mxu1 %v7081_v29 }
 0xe1b   :  { %5666 = vmatprep.subr.bf16.mxu0 %v7047_v41  ;;  %5692 = vmatprep.subr.bf16.mxu1 %v6282_v17 }
 0xe1e   :  { %5668 = vmatpush1.bf16.msra.mxu0 %v7049_v42  ;;  %5694 = vmatpush3.bf16.msra.mxu1 %v7085_v51 }
 0xe1f   :  { %5670 = vmatprep.subr.bf16.mxu0 %v7052_v60  ;;  %5695 = vmatprep.subr.bf16.mxu1 %v6282_v17 }
 0xe22   :  { %5672 = vmatpush1.bf16.msra.mxu0 %v7055_v4  ;;  %5697 = vmatpush3.bf16.msra.mxu1 %v7089_v2 }
 0xe23   :  { %5674 = vmatprep.subr.bf16.mxu0 %v7060_v28  ;;  %5698 = vmatprep.subr.bf16.mxu1 %v6282_v17 }
 0xe26   :  { %5676 = vmatpush1.bf16.msra.mxu0 %v7066_v23  ;;  %5700 = vmatpush3.bf16.msra.mxu1 %v7093_v15 }
 0xe27   :  { %5702 = vmatprep.subr.bf16.mxu0 %v7017_v22  ;;  %5733 = vmatprep.subr.bf16.mxu1 %v6282_v17 }
 0xedc   :  { %v3134_v26 = vpop.f32.mrb[26].mxu0  ;;  %v3205_v38 = vpop.f32.mrb[44].mxu1 }
 0xedd   :  { %v5844_v61 = vadd.f32 %v7159_v59, %v3134_v26  ;;  %v3136_v40 = vpop.f32.mrb[27].mxu0  ;;  %v4666_v47 = vpop.f32.mrb[45].mxu1  ;;  %v3206_v22 = vadd.f32 %v3205_v38, %v7170_v55  ;;  %v3575_v26 = vld [vmem:[%s7535_s9 + $0x38] sm:$0xff] }
 0xede   :  { %v5846_v63 = vadd.f32 %v7166_v54, %v3136_v40  ;;  %v5769_v38 = vpack.c.bf16 %v3575_v26, %v3574_v27  ;;  %v3578_v47 = vld [vmem:[%s7535_s9 + $0x50] sm:$0xff] }
 0xedf   :  { %v3774_v44 = vmul.f32 -1.442695, %v5844_v61  ;;  %v3576_v61 = vld [vmem:[%s7535_s9 + $0x40] sm:$0xff] }
 0xee0   :  { %v3775_v18 = vmul.f32 -1.442695, %v5846_v63 }
 0xee1   :  { %6031 = vpow2.f32 %v3774_v44  ;;  %v3579_v44 = vld [vmem:[%s7535_s9 + $0x58] sm:$0xff] }
 0xee2   :  { %6033 = vpow2.f32 %v3775_v18  ;;  %v5777_v63 = vpack.c.bf16 %v3579_v44, %v3578_v47  ;;  %v3580_v18 = vld [vmem:[%s7535_s9 + $0x60] sm:$0xff] }
 0xeeb   :  { %v6032_v25 = vpop.eup %6031 }
 0xeec   :  { %v3213_v11 = vadd.f32 1.0, %v6032_v25  ;;  %v6034_v30 = vpop.eup %6033  ;;  %v3581_v25 = vld [vmem:[%s7535_s9 + $0x68] sm:$0xff] }
 0xeed   :  { %v3220_v48 = vadd.f32 1.0, %v6034_v30  ;;  %v3582_v30 = vld [vmem:[%s7535_s9 + $0x70] sm:$0xff] }
 0xeee   :  { %6035 = vrcp.f32 %v3213_v11  ;;  %v5781_v11 = vpack.c.bf16 %v3581_v25, %v3580_v18 }
 0xef8   :  { %v6036_v9 = vpop.eup %6035 }
 0xef9   :  { %v3223_v49 = vmul.f32 %v6036_v9, %v3206_v22  ;;  %v3583_v22 = vld [vmem:[%s7535_s9 + $0x78] sm:$0xff] }
 0xefa   :  { %v5785_v9 = vpack.c.bf16 %v3583_v22, %v3582_v30 }
 0xefb   :  { %v3224_v33 = vadd.f32 %v3223_v49, %v2187_v10 }
 0xefd   :  { %6037 = vtanh.f32 %v3224_v33 }
 0xefe   :  { %6039 = vrcp.f32 %v3220_v48 }
 0xf07   :  { %v6038_v6 = vpop.eup %6037 }
 0xf08   :  { %v3226_v37 = vsub.f32 %v7358_v35, %v6038_v6  ;;  %v6040_v34 = vpop.eup %6039 }
 0xf0a   :  { %v3227_v3 = vmul.f32 %v6040_v34, %v3226_v37 }
 0xf0c   :  { %v7403_v46 = vadd.f32 %v6038_v6, %v3227_v3 }
 0xf0e   :  { %3298 = vmatmul.mubr.f32.vlgmr.msra.gmra.mrb[28].mxu0 %v7403_v46  ;;  %4700 = vmatmul.mubr.f32.vlgmr.msra.gmra.mrb[46].mxu1 %v7403_v46 }
 0xf0f   :  { %5704 = vmatpush1.bf16.msra.mxu0 %v7019_v52  ;;  %5735 = vmatpush3.bf16.msra.mxu1 %v7057_v5  ;;  %v3569_v52 = vld [vmem:[%s7535_s9 + $0x8] sm:$0xff] }
 0xf10   :  { %5706 = vmatprep.subr.bf16.mxu0 %v7023_v20  ;;  %5736 = vmatprep.subr.bf16.mxu1 %v6282_v17 }
 0xf11   :  { %3462 = vmatprep.mubr.f32.mxu0 %v6281_v0  ;;  %4734 = vmatprep.mubr.msk.f32.mxu1 %vm6283_vm1, %v6281_v0  ;;  %v3568_v0 = vld [vmem:[%s7535_s9] sm:$0xff] }
 0xf12   :  { %v5757_v20 = vpack.c.bf16 %v3569_v52, %v3568_v0  ;;  %v2197_v0 = vadd.f32 %v7157_v58, %v7173_v14 }
 0xf13   :  { %5708 = vmatpush1.bf16.msra.mxu0 %v7025_v19  ;;  %5738 = vmatpush3.bf16.msra.mxu1 %v7068_v32 }
 0xf14   :  { %5710 = vmatprep.subr.bf16.mxu0 %v7029_v43  ;;  %5739 = vmatprep.subr.bf16.mxu1 %v6282_v17 }
 0xf17   :  { %5712 = vmatpush1.bf16.msra.mxu0 %v7031_v53  ;;  %5741 = vmatpush3.bf16.msra.mxu1 %v7074_v62 }
 0xf18   :  { %5714 = vmatprep.subr.bf16.mxu0 %v7035_v1  ;;  %5742 = vmatprep.subr.bf16.mxu1 %v6282_v17 }
 0xf1b   :  { %5716 = vmatpush1.bf16.msra.mxu0 %v7037_v8  ;;  %5744 = vmatpush3.bf16.msra.mxu1 %v7077_v39 }
 0xf1c   :  { %5718 = vmatprep.subr.bf16.mxu0 %v7041_v21  ;;  %5745 = vmatprep.subr.bf16.mxu1 %v6282_v17 }
 0xf1f   :  { %5720 = vmatpush1.bf16.msra.mxu0 %v7043_v31  ;;  %5747 = vmatpush3.bf16.msra.mxu1 %v7081_v29 }
 0xf20   :  { %5722 = vmatprep.subr.bf16.mxu0 %v7047_v41  ;;  %5748 = vmatprep.subr.bf16.mxu1 %v6282_v17 }
 0xf23   :  { %5724 = vmatpush1.bf16.msra.mxu0 %v7049_v42  ;;  %5750 = vmatpush3.bf16.msra.mxu1 %v7085_v51 }
 0xf24   :  { %5726 = vmatprep.subr.bf16.mxu0 %v7052_v60  ;;  %5751 = vmatprep.subr.bf16.mxu1 %v6282_v17 }
 0xf27   :  { %5728 = vmatpush1.bf16.msra.mxu0 %v7055_v4  ;;  %5753 = vmatpush3.bf16.msra.mxu1 %v7089_v2  ;;  %v3570_v2 = vld [vmem:[%s7535_s9 + $0x10] sm:$0xff] }
 0xf28   :  { %5730 = vmatprep.subr.bf16.mxu0 %v7060_v28  ;;  %5754 = vmatprep.subr.bf16.mxu1 %v6282_v17  ;;  %v2192_v28 = vadd.f32 %v7161_v7, %v7173_v14 }
 0xf2b   :  { %5732 = vmatpush1.bf16.msra.mxu0 %v7066_v23  ;;  %5756 = vmatpush3.bf16.msra.mxu1 %v7093_v15  ;;  %v3571_v15 = vld [vmem:[%s7535_s9 + $0x18] sm:$0xff] }
 0xf2c   :  { %5758 = vmatprep.subr.bf16.mxu0 %v5757_v20  ;;  %v5761_v7 = vpack.c.bf16 %v3571_v15, %v3570_v2 }
 0xfe1   :  { %v3299_v19 = vpop.f32.mrb[28].mxu0  ;;  %v3370_v43 = vpop.f32.mrb[46].mxu1 }
 0xfe2   :  { %v5848_v53 = vadd.f32 %v7159_v59, %v3299_v19  ;;  %v3301_v1 = vpop.f32.mrb[29].mxu0  ;;  %v4701_v17 = vpop.f32.mrb[47].mxu1  ;;  %v3371_v4 = vadd.f32 %v3370_v43, %v7170_v55 }
 0xfe3   :  { %v5850_v21 = vadd.f32 %v7166_v54, %v3301_v1 }
 0xfe4   :  { %v3776_v8 = vmul.f32 -1.442695, %v5848_v53 }
 0xfe5   :  { %v3777_v31 = vmul.f32 -1.442695, %v5850_v21 }
 0xfe6   :  { %6041 = vpow2.f32 %v3776_v8 }
 0xfe7   :  { %6043 = vpow2.f32 %v3777_v31 }
 0xff0   :  { %v6042_v41 = vpop.eup %6041 }
 0xff1   :  { %v3378_v42 = vadd.f32 1.0, %v6042_v41  ;;  %v6044_v60 = vpop.eup %6043 }
 0xff2   :  { %v3385_v62 = vadd.f32 1.0, %v6044_v60 }
 0xff3   :  { %6045 = vrcp.f32 %v3378_v42 }
 0xffd   :  { %v6046_v5 = vpop.eup %6045 }
 0xffe   :  { %v3388_v23 = vmul.f32 %v6046_v5, %v3371_v4 }
0x1000   :  { %v3389_v32 = vadd.f32 %v3388_v23, %v2192_v28 }
0x1002   :  { %6047 = vtanh.f32 %v3389_v32 }
0x1003   :  { %6049 = vrcp.f32 %v3385_v62 }
0x100c   :  { %v6048_v39 = vpop.eup %6047 }
0x100d   :  { %v3391_v29 = vsub.f32 %v7403_v46, %v6048_v39  ;;  %v6050_v51 = vpop.eup %6049 }
0x100f   :  { %v3392_v36 = vmul.f32 %v6050_v51, %v3391_v29 }
0x1011   :  { %v7458_v50 = vadd.f32 %v6048_v39, %v3392_v36 }
0x1013   :  { %3463 = vmatmul.mubr.f32.vlgmr.msra.gmra.mrb[30].mxu0 %v7458_v50  ;;  %4735 = vmatmul.mubr.f32.vlgmr.msra.gmra.mrb[48].mxu1 %v7458_v50 }
0x1014   :  { %5760 = vmatpush3.bf16.msra.mxu0 %v5757_v20  ;;  %4769 = vmatprep.mubr.f32.mxu0 %v7178_v45  ;;  %v3577_v45 = vld [vmem:[%s7535_s9 + $0x48] sm:$0xff] }
0x1015   :  { %5762 = vmatprep.subr.bf16.mxu0 %v5761_v7  ;;  %v5773_v40 = vpack.c.bf16 %v3577_v45, %v3576_v61 }
0x1018   :  { %5764 = vmatpush3.bf16.msra.mxu0 %v5761_v7 }
0x1019   :  { %5766 = vmatprep.subr.bf16.mxu0 %v5765_v24 }
0x101c   :  { %5768 = vmatpush3.bf16.msra.mxu0 %v5765_v24 }
0x101d   :  { %5770 = vmatprep.subr.bf16.mxu0 %v5769_v38 }
0x1020   :  { %5772 = vmatpush3.bf16.msra.mxu0 %v5769_v38 }
0x1021   :  { %5774 = vmatprep.subr.bf16.mxu0 %v5773_v40 }
0x1024   :  { %5776 = vmatpush3.bf16.msra.mxu0 %v5773_v40 }
0x1025   :  { %5778 = vmatprep.subr.bf16.mxu0 %v5777_v63 }
0x1028   :  { %5780 = vmatpush3.bf16.msra.mxu0 %v5777_v63 }
0x1029   :  { %5782 = vmatprep.subr.bf16.mxu0 %v5781_v11 }
0x102c   :  { %5784 = vmatpush3.bf16.msra.mxu0 %v5781_v11 }
0x102d   :  { %5786 = vmatprep.subr.bf16.mxu0 %v5785_v9 }
0x1030   :  { %5788 = vmatpush3.bf16.msra.mxu0 %v5785_v9 }
0x1033   :  { %4770 = vmatmul.mubr.f32.vlgmr.msra.gmra.mrb[32].mxu0 %v7223_v56 }
0x1034   :  { %4772 = vmatprep.mubr.f32.mxu0 %v7268_v57 }
0x1037   :  { %4773 = vmatmul.mubr.f32.gmra.mrb[34].mxu0 %v7313_v13 }
0x1038   :  { %4775 = vmatprep.mubr.f32.mxu0 %v7358_v35 }
0x103b   :  { %4776 = vmatmul.mubr.f32.gmra.mrb[36].mxu0 %v7403_v46 }
0x103c   :  { %4778 = vmatprep.mubr.f32.mxu0 %v7458_v50 }
0x10e6   :  { %v3464_v10 = vpop.f32.mrb[30].mxu0  ;;  %v3535_v49 = vpop.f32.mrb[48].mxu1 }
0x10e7   :  { %v5852_v33 = vadd.f32 %v7159_v59, %v3464_v10  ;;  %v3466_v48 = vpop.f32.mrb[31].mxu0  ;;  %v4736_v6 = vpop.f32.mrb[49].mxu1  ;;  %v3536_v35 = vadd.f32 %v3535_v49, %v7170_v55  ;;  %v3780_v59 = vld [vmem:[%s7536_s10] ss:$0 sm:$0xff]  ;;  %s6284_s10 = smov [#allocation18]  }
0x10e8   :  { %v5854_v56 = vadd.f32 %v7166_v54, %v3466_v48  ;;  %s3709_s6 = sshll.u32 %s6284_s10, 4  ;;  %s3710_s6 = int_to_ptr.vmem [resolvable:$true] %s3709_s6 }
0x10e9   :  { %v3778_v37 = vmul.f32 -1.442695, %v5852_v33  ;;  %s6237_s26 = scalar_lea.vmem %s3710_s6, 1024  ;;  %p6242_p9 = scmp.lt.s32.totalorder %s3710_s6, %s3710_s6 }
0x10ea   :  { %v3779_v34 = vmul.f32 -1.442695, %v5854_v56  ;;  %p6238_p8 = scmp.ne.s32.totalorder %s3710_s6, %s6237_s26  ;;  %p6243_p10 = scmp.lt.s32.totalorder %s6237_s26, %s6237_s26 }
0x10eb   :  { %6051 = vpow2.f32 %v3778_v37 }
0x10ec   :  { %6053 = vpow2.f32 %v3779_v34  ;;  %p6244_p11 = por %p6243_p10, %p6242_p9 }
0x10ee   :  { %p6245_p12 = pnand %p6244_p11, %p6238_p8 }
0x10f5   :  { %v6052_v57 = vpop.eup %6051 }
0x10f6   :  { %v3543_v3 = vadd.f32 1.0, %v6052_v57  ;;  %v6054_v13 = vpop.eup %6053 }
0x10f7   :  { %v3550_v19 = vadd.f32 1.0, %v6054_v13 }
0x10f8   :  { %6055 = vrcp.f32 %v3543_v3 }
0x1102   :  { %v6056_v46 = vpop.eup %6055 }
0x1103   :  { %v3553_v52 = vmul.f32 %v6056_v46, %v3536_v35 }
0x1105   :  { %v3554_v20 = vadd.f32 %v3553_v52, %v2197_v0 }
0x1106   :  { %v4771_v54 = vpop.f32.mrb[32].mxu0 }
0x1107   :  { %6057 = vtanh.f32 %v3554_v20  ;;  %v3663_v43 = vadd.f32 %v4771_v54, %v3780_v59  ;;  %v3657_v53 = vpop.f32.mrb[33].mxu0 }
0x1108   :  { %v3658_v1 = vadd.f32 %v3780_v59, %v3657_v53  ;;  %6059 = vrcp.f32 %v3550_v19 }
0x1109   :  { %3697 = vst [vmem:[#allocation18 + $0x8] sm:$0xff] %v3663_v43 }
0x110a   :  { %3696 = vst [vmem:[#allocation18] sm:$0xff] %v3658_v1  ;;  %v4774_v55 = vpop.f32.mrb[34].mxu0 }
0x110b   :  { %v3673_v17 = vadd.f32 %v4774_v55, %v3780_v59  ;;  %v3667_v8 = vpop.f32.mrb[35].mxu0 }
0x110c   :  { %v3668_v21 = vadd.f32 %v3780_v59, %v3667_v8 }
0x110d   :  { %3699 = vst [vmem:[#allocation18 + $0x18] sm:$0xff] %v3673_v17 }
0x110e   :  { %3698 = vst [vmem:[#allocation18 + $0x10] sm:$0xff] %v3668_v21  ;;  %v4777_v58 = vpop.f32.mrb[36].mxu0 }
0x110f   :  { %v3683_v14 = vadd.f32 %v4777_v58, %v3780_v59  ;;  %v3677_v31 = vpop.f32.mrb[37].mxu0 }
0x1110   :  { %v3678_v41 = vadd.f32 %v3780_v59, %v3677_v31 }
0x1111   :  { %v6058_v42 = vpop.eup %6057  ;;  %3701 = vst [vmem:[#allocation18 + $0x28] sm:$0xff] %v3683_v14 }
0x1112   :  { %3700 = vst [vmem:[#allocation18 + $0x20] sm:$0xff] %v3678_v41  ;;  %v3556_v60 = vsub.f32 %v7458_v50, %v6058_v42  ;;  %v6060_v4 = vpop.eup %6059 }
0x1114   :  { %v3557_v5 = vmul.f32 %v6060_v4, %v3556_v60 }
0x1116   :  { %v3558_v28 = vadd.f32 %v6058_v42, %v3557_v5 }
0x1118   :  { %4779 = vmatmul.mubr.f32.gmra.mrb[38].mxu0 %v3558_v28 }
0x11eb   :  { %v4780_v23 = vpop.f32.mrb[38].mxu0 }
0x11ec   :  { %v3693_v32 = vadd.f32 %v4780_v23, %v3780_v59  ;;  %v3687_v62 = vpop.f32.mrb[39].mxu0 }
0x11ed   :  { %v3688_v39 = vadd.f32 %v3780_v59, %v3687_v62 }
0x11ee   :  { %3703 = vst [vmem:[#allocation18 + $0x38] sm:$0xff] %v3693_v32 }
0x11ef   :  { %3702 = vst [vmem:[#allocation18 + $0x30] sm:$0xff] %v3688_v39 }
0x11f0   :  { %6248 = shalt.err (!%p6245_p12)
}
0x11f1   :  { %s6249_s3 = scalar_lea.hbm %s7537_s11, 1024 }
0x11f2   :  { %p6250_p13 = scmp.ne.s32.totalorder %s7537_s11, %s6249_s3  ;;  %p6253_p0 = scmp.lt.u32.totalorder %s6249_s3, %s7537_s11 }
0x11f4   :  { %p6255_p1 = pnand %p6253_p0, %p6250_p13 }
0x11f6   :  { %6258 = shalt.err (!%p6255_p1)
}
0x11f7   :  { %s6285_s19 = smov 128   ;;  %s6286_s4 = smov 8  }
0x11f8   :  { %3715 = dma.vmem_to_hbm [thread:$0]  %s3710_s6, 1024, %s7537_s11, [#allocation6], %s6285_s19, %s6285_s19, %s6286_s4  }
0x11f9   :  { %6269 = dma.done.wait [#allocation6], 1024  }
0x11fa   :  { %6270 = vsyncadd [#allocation6], 4294966272 }
0x11fb   :  { %3719 = vsyncpa [#allocation5], 1 }
0x11fc   :  { %3720 = vsyncpa [#allocation8], 1 }
0x11fd   :  { %3721 = vsyncpa [#allocation11], 1 }
0x11fe   :  { %3722 = vsyncpa [#allocation14], 1 }
0x11ff   :  { %3723 = vsyncpa [#allocation17], 1 }
0x1200   :  { %3724 = vsyncpa [#allocation6], 1 }

</bundles_post_ra>
